<compile_context>
chip_gen: v7x
topology: tpu7x:2x2x1
jax: 0.10.0
libtpu: 0.0.40
codegen_flags: <defaults>
</compile_context>

<pallas_src>
import functools
import math

import jax
import jax.numpy as jnp
from jax.experimental import pallas as pl
from jax.experimental.pallas import tpu as pltpu

LN_EPS = 1e-5          # torch.nn.LayerNorm default eps
NEG_BIG = -1e30        # additive mask value keeping batches independent


# ----------------------------------------------------------------------------
# math helpers (f32, usable both inside the kernel and in the JAX reference)
# ----------------------------------------------------------------------------
def _layernorm(x, g, b):
    mu = jnp.mean(x, axis=-1, keepdims=True)
    xc = x - mu
    var = jnp.mean(xc * xc, axis=-1, keepdims=True)
    return xc * jax.lax.rsqrt(var + LN_EPS) * g + b


def _softmax(x):
    m = jnp.max(x, axis=-1, keepdims=True)
    e = jnp.exp(x - m)
    return e / jnp.sum(e, axis=-1, keepdims=True)


def _gelu_exact(x):
    # nn.GELU() (erf form).  erf via Abramowitz–Stegun 7.1.26 (|err| < 1.5e-7),
    # built only from exp / mul / add / where so it always lowers on Mosaic.
    z = x * (1.0 / math.sqrt(2.0))
    a = jnp.abs(z)
    t = 1.0 / (1.0 + 0.3275911 * a)
    poly = t * (0.254829592 + t * (-0.284496736 + t * (1.421413741
                + t * (-1.453152027 + t * 1.061405429))))
    erf_abs = 1.0 - poly * jnp.exp(-a * a)
    erf = jnp.where(z >= 0.0, erf_abs, -erf_abs)
    return 0.5 * x * (1.0 + erf)


# ----------------------------------------------------------------------------
# the single fused forward kernel
# ----------------------------------------------------------------------------
def _fused_forward_kernel(tok_ref, emb_ref, inw_ref, ln1w_ref, ln1b_ref,
                          wqkv_ref, cos_ref, sin_ref, rot_ref, bias_ref,
                          proj_ref, ln2w_ref, ln2b_ref,
                          rw_ref, rb_ref, mnw_ref, mnb_ref,
                          expand_ref, w1_ref, b1_ref, w2_ref, b2_ref,
                          lnow_ref, lnob_ref, avg_ref, o_ref,
                          *, d_attn, attn_scale):
    f32 = jnp.float32
    bf16 = jnp.bfloat16
    D = d_attn

    # ---- embedding lookup: exact one-hot matmul on the MXU -----------------
    tok = tok_ref[...]                                          # (M, 1) int32
    M = tok.shape[0]
    V = emb_ref.shape[0]
    vocab_iota = jax.lax.broadcasted_iota(jnp.int32, (M, V), 1)
    one_hot = (vocab_iota == tok).astype(f32)
    emb = jnp.dot(one_hot, emb_ref[...], preferred_element_type=f32)   # (M, dm)

    # ---- EmbeddingBlock.linear (bias-free) ----------------------------------
    x0 = jnp.dot(emb.astype(bf16), inw_ref[...],
                 preferred_element_type=f32)                    # (M, U)

    # ---- EncoderBlock --------------------------------------------------------
    h = _layernorm(x0, ln1w_ref[...], ln1b_ref[...])            # norm_1

    qkv = jnp.dot(h.astype(bf16), wqkv_ref[...],
                  preferred_element_type=f32)                   # (M, 3D)
    q = qkv[:, 0:D]
    k = qkv[:, D:2 * D]
    v = qkv[:, 2 * D:3 * D]

    # RoPE: interleaved rotate expressed as q @ R with a constant +/-1 matrix
    cos = cos_ref[...]
    sin = sin_ref[...]
    rot = rot_ref[...]
    q = q * cos + jnp.dot(q, rot, preferred_element_type=f32) * sin
    k = k * cos + jnp.dot(k, rot, preferred_element_type=f32) * sin

    # full (non-causal) softmax attention; batches kept independent via an
    # additive block-diagonal bias on the (M, M) score matrix.
    s = jax.lax.dot_general(q, k, (((1,), (1,)), ((), ())),
                            preferred_element_type=f32)         # (M, M)
    s = s * attn_scale + bias_ref[...]
    p = _softmax(s)
    attn = jnp.dot(p, v, preferred_element_type=f32)            # (M, D)

    y = jnp.dot(attn.astype(bf16), proj_ref[...],
                preferred_element_type=f32)                     # (M, U)
    h2 = _layernorm(y + h, ln2w_ref[...], ln2b_ref[...])        # norm_2

    # ---- MoE: all 8 experts as one block-diagonal matmul pair ----------------
    rlog = jnp.dot(h2, rw_ref[...], preferred_element_type=f32) + rb_ref[...]
    r = _softmax(_layernorm(rlog, mnw_ref[...], mnb_ref[...]))  # (M, E)

    hidden = jnp.dot(h2.astype(bf16), w1_ref[...],
                     preferred_element_type=f32) + b1_ref[...]  # (M, E*4U)
    hidden = _gelu_exact(hidden)
    r_exp = jnp.dot(r, expand_ref[...], preferred_element_type=f32)
    hidden = hidden * r_exp                                     # fold router weights
    y_moe = (jnp.dot(hidden.astype(bf16), w2_ref[...], preferred_element_type=f32)
             + jnp.dot(r, b2_ref[...], preferred_element_type=f32))   # (M, U)

    enc = y_moe + h2                                            # moe(x) + x

    # ---- EmbeddingBlock tail: norm_1(encoder(x) + x), mean over time --------
    xo = _layernorm(enc + x0, lnow_ref[...], lnob_ref[...])     # (M, U)
    o_ref[...] = jnp.dot(avg_ref[...], xo, preferred_element_type=f32)  # (B, U)


# ----------------------------------------------------------------------------
# wrappers
# ----------------------------------------------------------------------------
def _full_spec(a):
    # every kernel operand is 2-D and the block is the whole array
    assert a.ndim == 2, a.shape
    return pl.BlockSpec(a.shape, lambda i: (0, 0))


def embedding_model_forward(tokens, kp, *, d_attn=32):
    """EmbeddingModel.forward(tokens, labels=None) -> (B, units) 'key'."""
    B, T = tokens.shape
    M = B * T
    U = kp["in_w"].shape[1]
    tok2d = tokens.reshape(M, 1).astype(jnp.int32)
    # torch: attn_logits = (q @ k^T) / sqrt(1/d_model)  ->  * sqrt(d_model)
    attn_scale = math.sqrt(float(d_attn))

    args = (tok2d, kp["emb"], kp["in_w"], kp["enc_ln1_w"], kp["enc_ln1_b"],
            kp["wqkv"], kp["rope_cos"], kp["rope_sin"], kp["rot"], kp["attn_bias"],
            kp["proj_w"], kp["enc_ln2_w"], kp["enc_ln2_b"],
            kp["router_w"], kp["router_b"], kp["moe_ln_w"], kp["moe_ln_b"],
            kp["expand"], kp["moe_w1"], kp["moe_b1"], kp["moe_w2"], kp["moe_b2"],
            kp["out_ln_w"], kp["out_ln_b"], kp["avg"])

    kern = functools.partial(_fused_forward_kernel,
                             d_attn=d_attn, attn_scale=attn_scale)
    return pl.pallas_call(
        kern,
        out_shape=jax.ShapeDtypeStruct((B, U), jnp.float32),
        grid=(1,),
        in_specs=[_full_spec(a) for a in args],
        out_specs=pl.BlockSpec((B, U), lambda i: (0, 0)),
        compiler_params=pltpu.CompilerParams(
            dimension_semantics=("arbitrary",),
            vmem_limit_bytes=64 * 1024 * 1024),
    )(*args)


def prepare_kernel_inputs(params, B, T, *, d_attn=32, num_experts=8):
    """Host-side packing: bf16 weights, fused QKV, block-diag MoE, RoPE tables,
    batch-block attention mask and time-averaging matrix."""
    f32, bf16 = jnp.float32, jnp.bfloat16
    U = params["in_w"].shape[1]
    D, E = d_attn, num_experts
    HS, H4 = U // E, 4 * U
    M = B * T
    row = lambda v: v.reshape(1, -1).astype(f32)

    # RoPE tables (Attention.use_rope: indices = arange(D//2)/D, no +1)
    idx = jnp.arange(D // 2, dtype=f32) / D
    thetas = 10000.0 ** (-2.0 * idx)
    theta = jnp.arange(T, dtype=f32)[:, None] * thetas[None, :]          # (T, D/2)
    cos = jnp.repeat(jnp.cos(theta), 2, axis=-1)                         # (T, D)
    sin = jnp.repeat(jnp.sin(theta), 2, axis=-1)

    # interleaved "rotate": rot(x) = x @ R, out[2j] = -x[2j+1], out[2j+1] = x[2j]
    even = jnp.arange(0, D, 2)
    R = (jnp.zeros((D, D), f32)
         .at[even + 1, even].set(-1.0)
         .at[even, even + 1].set(1.0))

    bid = jnp.arange(M, dtype=jnp.int32) // T
    attn_bias = jnp.where(bid[:, None] == bid[None, :], 0.0, NEG_BIG).astype(f32)
    avg = (bid[None, :] == jnp.arange(B, dtype=jnp.int32)[:, None]).astype(f32) / T

    experts = params["experts"]
    moe_w1 = jnp.zeros((U, E * H4), f32)
    for e in range(E):          # block-diagonal first expert layer
        moe_w1 = moe_w1.at[e * HS:(e + 1) * HS,
                           e * H4:(e + 1) * H4].set(experts[e]["dense_w"])
    moe_b1 = jnp.concatenate([e["dense_b"] for e in experts]).reshape(1, E * H4)
    moe_w2 = jnp.concatenate([e["lin_w"] for e in experts], axis=0)       # (E*4U, U)
    moe_b2 = jnp.stack([e["lin_b"] for e in experts], axis=0)             # (E, U)
    expand = jnp.kron(jnp.eye(E, dtype=f32), jnp.ones((1, H4), f32))      # (E, E*4U)

    return dict(
        emb=params["embedding"].astype(f32),
        in_w=params["in_w"].astype(bf16),
        enc_ln1_w=row(params["enc_ln1_w"]), enc_ln1_b=row(params["enc_ln1_b"]),
        wqkv=jnp.concatenate([params["wq"], params["wk"], params["wv"]],
                             axis=1).astype(bf16),
        rope_cos=jnp.tile(cos, (B, 1)).astype(f32),
        rope_sin=jnp.tile(sin, (B, 1)).astype(f32),
        rot=R, attn_bias=attn_bias,
        proj_w=params["proj_w"].astype(bf16),
        enc_ln2_w=row(params["enc_ln2_w"]), enc_ln2_b=row(params["enc_ln2_b"]),
        router_w=params["router_w"].astype(f32), router_b=row(params["router_b"]),
        moe_ln_w=row(params["moe_ln_w"]), moe_ln_b=row(params["moe_ln_b"]),
        expand=expand,
        moe_w1=moe_w1.astype(bf16), moe_b1=moe_b1.astype(f32),
        moe_w2=moe_w2.astype(bf16), moe_b2=moe_b2.astype(f32),
        out_ln_w=row(params["emb_ln_w"]), out_ln_b=row(params["emb_ln_b"]),
        avg=avg,
    )


# ----------------------------------------------------------------------------
# pure-JAX reference (mirrors the kernel math / dtypes) for a correctness check
# ----------------------------------------------------------------------------
def reference_forward(tokens, kp, *, d_attn=32):
    f32, bf16 = jnp.float32, jnp.bfloat16
    D = d_attn
    B, T = tokens.shape
    M = B * T
    attn_scale = math.sqrt(float(d_attn))

    emb = kp["emb"][tokens.reshape(M).astype(jnp.int32)]                  # (M, dm)
    x0 = jnp.dot(emb.astype(bf16), kp["in_w"], preferred_element_type=f32)
    h = _layernorm(x0, kp["enc_ln1_w"], kp["enc_ln1_b"])
    qkv = jnp.dot(h.astype(bf16), kp["wqkv"], preferred_element_type=f32)
    q, k, v = qkv[:, 0:D], qkv[:, D:2 * D], qkv[:, 2 * D:3 * D]
    q = q * kp["rope_cos"] + jnp.dot(q, kp["rot"], preferred_element_type=f32) * kp["rope_sin"]
    k = k * kp["rope_cos"] + jnp.dot(k, kp["rot"], preferred_element_type=f32) * kp["rope_sin"]
    s = jnp.dot(q, k.T, preferred_element_type=f32) * attn_scale + kp["attn_bias"]
    p = _softmax(s)
    attn = jnp.dot(p, v, preferred_element_type=f32)
    y = jnp.dot(attn.astype(bf16), kp["proj_w"], preferred_element_type=f32)
    h2 = _layernorm(y + h, kp["enc_ln2_w"], kp["enc_ln2_b"])
    rlog = jnp.dot(h2, kp["router_w"], preferred_element_type=f32) + kp["router_b"]
    r = _softmax(_layernorm(rlog, kp["moe_ln_w"], kp["moe_ln_b"]))
    hidden = jnp.dot(h2.astype(bf16), kp["moe_w1"], preferred_element_type=f32) + kp["moe_b1"]
    hidden = _gelu_exact(hidden) * jnp.dot(r, kp["expand"], preferred_element_type=f32)
    y_moe = (jnp.dot(hidden.astype(bf16), kp["moe_w2"], preferred_element_type=f32)
             + jnp.dot(r, kp["moe_b2"], preferred_element_type=f32))
    enc = y_moe + h2
    xo = _layernorm(enc + x0, kp["out_ln_w"], kp["out_ln_b"])
    return jnp.dot(kp["avg"], xo, preferred_element_type=f32)


# ----------------------------------------------------------------------------
# deterministic parameter init (shapes follow the PyTorch __init__)
# ----------------------------------------------------------------------------
def init_params(key, vocab, d_model, units, *, d_attn=32, num_experts=8):
    f32 = jnp.float32
    HS = units // num_experts
    ks = iter(jax.random.split(key, 64))
    nk = lambda: next(ks)

    def w(fi, fo):
        return jax.random.normal(nk(), (fi, fo), f32) / math.sqrt(float(fi))

    def b(fo):
        return jax.random.normal(nk(), (fo,), f32) * 0.01

    embedding = jax.random.normal(nk(), (vocab, d_model), f32)
    if vocab > 44819:   # EmbeddingModel zeroes embedding row 44819 (real vocab only)
        embedding = embedding.at[44819].set(0.0)

    experts = [dict(dense_w=w(HS, 4 * units), dense_b=b(4 * units),
                    lin_w=w(4 * units, units), lin_b=b(units))
               for _ in range(num_experts)]

    return dict(
        embedding=embedding,
        in_w=w(d_model, units),
        enc_ln1_w=jnp.ones((units,), f32), enc_ln1_b=jnp.zeros((units,), f32),
        wq=w(units, d_attn), wk=w(units, d_attn), wv=w(units, d_attn),
        proj_w=w(d_attn, units),
        enc_ln2_w=jnp.ones((units,), f32), enc_ln2_b=jnp.zeros((units,), f32),
        router_w=w(units, num_experts), router_b=b(num_experts),
        moe_ln_w=jnp.ones((num_experts,), f32),
        moe_ln_b=jnp.zeros((num_experts,), f32),
        experts=experts,
        emb_ln_w=jnp.ones((units,), f32), emb_ln_b=jnp.zeros((units,), f32),
    )


# ----------------------------------------------------------------------------
if __name__ == "__main__":
    VOCAB, D_MODEL, UNITS = 64, 16, 64
    D_ATTN, NUM_EXPERTS = 32, 8           # EncoderBlock(32, units) / MoE(8 experts)
    B, T = 2, 8

    key = jax.random.PRNGKey(0)
    pkey, tkey = jax.random.split(key)
    params = init_params(pkey, VOCAB, D_MODEL, UNITS,
                         d_attn=D_ATTN, num_experts=NUM_EXPERTS)
    tokens = jax.random.randint(tkey, (B, T), 0, VOCAB)

    kernel_inputs = prepare_kernel_inputs(params, B, T,
                                          d_attn=D_ATTN, num_experts=NUM_EXPERTS)

    fwd = jax.jit(lambda toks: embedding_model_forward(toks, kernel_inputs,
                                                       d_attn=D_ATTN))
    out = jax.block_until_ready(fwd(tokens))

    assert out.shape == (B, UNITS), out.shape
    assert bool(jnp.all(jnp.isfinite(out)))

    ref = reference_forward(tokens, kernel_inputs, d_attn=D_ATTN)
    max_err = float(jnp.max(jnp.abs(out - ref)))
    assert max_err < 5e-2, f"kernel vs reference max abs err {max_err}"

    print("KERNEL_OK")
</pallas_src>

<mosaic_0001>
module attributes {stable_mosaic.version = 11 : i64} {
  func.func @_fused_forward_kernel(%arg0: i32, %arg1: memref<16x1xi32, #tpu.memory_space<vmem>>, %arg2: memref<64x16xf32, #tpu.memory_space<vmem>>, %arg3: memref<16x64xbf16, #tpu.memory_space<vmem>>, %arg4: memref<1x64xf32, #tpu.memory_space<vmem>>, %arg5: memref<1x64xf32, #tpu.memory_space<vmem>>, %arg6: memref<64x96xbf16, #tpu.memory_space<vmem>>, %arg7: memref<16x32xf32, #tpu.memory_space<vmem>>, %arg8: memref<16x32xf32, #tpu.memory_space<vmem>>, %arg9: memref<32x32xf32, #tpu.memory_space<vmem>>, %arg10: memref<16x16xf32, #tpu.memory_space<vmem>>, %arg11: memref<32x64xbf16, #tpu.memory_space<vmem>>, %arg12: memref<1x64xf32, #tpu.memory_space<vmem>>, %arg13: memref<1x64xf32, #tpu.memory_space<vmem>>, %arg14: memref<64x8xf32, #tpu.memory_space<vmem>>, %arg15: memref<1x8xf32, #tpu.memory_space<vmem>>, %arg16: memref<1x8xf32, #tpu.memory_space<vmem>>, %arg17: memref<1x8xf32, #tpu.memory_space<vmem>>, %arg18: memref<8x2048xf32, #tpu.memory_space<vmem>>, %arg19: memref<64x2048xbf16, #tpu.memory_space<vmem>>, %arg20: memref<1x2048xf32, #tpu.memory_space<vmem>>, %arg21: memref<2048x64xbf16, #tpu.memory_space<vmem>>, %arg22: memref<8x64xf32, #tpu.memory_space<vmem>>, %arg23: memref<1x64xf32, #tpu.memory_space<vmem>>, %arg24: memref<1x64xf32, #tpu.memory_space<vmem>>, %arg25: memref<2x16xf32, #tpu.memory_space<vmem>>, %arg26: memref<2x64xf32, #tpu.memory_space<vmem>>) attributes {dimension_semantics = [#tpu.dimension_semantics<arbitrary>], iteration_bounds = array<i64: 1>, scalar_prefetch = 0 : i64, scratch_operands = 0 : i64, tpu.core_type = #tpu.core_type<tc>, window_params = [{pipeline_mode = #tpu.pipeline_mode<synchronous>, transform_indices = @transform_0, window_bounds = array<i64: 16, 1>}, {pipeline_mode = #tpu.pipeline_mode<synchronous>, transform_indices = @transform_1, window_bounds = array<i64: 64, 16>}, {pipeline_mode = #tpu.pipeline_mode<synchronous>, transform_indices = @transform_2, window_bounds = array<i64: 16, 64>}, {pipeline_mode = #tpu.pipeline_mode<synchronous>, transform_indices = @transform_3, window_bounds = array<i64: 1, 64>}, {pipeline_mode = #tpu.pipeline_mode<synchronous>, transform_indices = @transform_4, window_bounds = array<i64: 1, 64>}, {pipeline_mode = #tpu.pipeline_mode<synchronous>, transform_indices = @transform_5, window_bounds = array<i64: 64, 96>}, {pipeline_mode = #tpu.pipeline_mode<synchronous>, transform_indices = @transform_6, window_bounds = array<i64: 16, 32>}, {pipeline_mode = #tpu.pipeline_mode<synchronous>, transform_indices = @transform_7, window_bounds = array<i64: 16, 32>}, {pipeline_mode = #tpu.pipeline_mode<synchronous>, transform_indices = @transform_8, window_bounds = array<i64: 32, 32>}, {pipeline_mode = #tpu.pipeline_mode<synchronous>, transform_indices = @transform_9, window_bounds = array<i64: 16, 16>}, {pipeline_mode = #tpu.pipeline_mode<synchronous>, transform_indices = @transform_10, window_bounds = array<i64: 32, 64>}, {pipeline_mode = #tpu.pipeline_mode<synchronous>, transform_indices = @transform_11, window_bounds = array<i64: 1, 64>}, {pipeline_mode = #tpu.pipeline_mode<synchronous>, transform_indices = @transform_12, window_bounds = array<i64: 1, 64>}, {pipeline_mode = #tpu.pipeline_mode<synchronous>, transform_indices = @transform_13, window_bounds = array<i64: 64, 8>}, {pipeline_mode = #tpu.pipeline_mode<synchronous>, transform_indices = @transform_14, window_bounds = array<i64: 1, 8>}, {pipeline_mode = #tpu.pipeline_mode<synchronous>, transform_indices = @transform_15, window_bounds = array<i64: 1, 8>}, {pipeline_mode = #tpu.pipeline_mode<synchronous>, transform_indices = @transform_16, window_bounds = array<i64: 1, 8>}, {pipeline_mode = #tpu.pipeline_mode<synchronous>, transform_indices = @transform_17, window_bounds = array<i64: 8, 2048>}, {pipeline_mode = #tpu.pipeline_mode<synchronous>, transform_indices = @transform_18, window_bounds = array<i64: 64, 2048>}, {pipeline_mode = #tpu.pipeline_mode<synchronous>, transform_indices = @transform_19, window_bounds = array<i64: 1, 2048>}, {pipeline_mode = #tpu.pipeline_mode<synchronous>, transform_indices = @transform_20, window_bounds = array<i64: 2048, 64>}, {pipeline_mode = #tpu.pipeline_mode<synchronous>, transform_indices = @transform_21, window_bounds = array<i64: 8, 64>}, {pipeline_mode = #tpu.pipeline_mode<synchronous>, transform_indices = @transform_22, window_bounds = array<i64: 1, 64>}, {pipeline_mode = #tpu.pipeline_mode<synchronous>, transform_indices = @transform_23, window_bounds = array<i64: 1, 64>}, {pipeline_mode = #tpu.pipeline_mode<synchronous>, transform_indices = @transform_24, window_bounds = array<i64: 2, 16>}, {pipeline_mode = #tpu.pipeline_mode<synchronous>, transform_indices = @transform_25, window_bounds = array<i64: 2, 64>}]} {
    %c0 = arith.constant 0 : index
    %c0_0 = arith.constant 0 : index
    %0 = vector.load %arg1[%c0, %c0_0] : memref<16x1xi32, #tpu.memory_space<vmem>>, vector<16x1xi32>
    %1 = tpu.iota {dimensions = array<i32: 1>} : vector<16x64xi32>
    %2 = vector.broadcast %0 : vector<16x1xi32> to vector<16x64xi32>
    %3 = arith.cmpi eq, %1, %2 : vector<16x64xi32>
    %4 = arith.extui %3 : vector<16x64xi1> to vector<16x64xi32>
    %5 = arith.sitofp %4 : vector<16x64xi32> to vector<16x64xf32>
    %c0_1 = arith.constant 0 : index
    %c0_2 = arith.constant 0 : index
    %6 = vector.load %arg2[%c0_1, %c0_2] : memref<64x16xf32, #tpu.memory_space<vmem>>, vector<64x16xf32>
    %cst = arith.constant dense<0.000000e+00> : vector<16x16xf32>
    %7 = tpu.matmul %5, %6, %cst {dimension_numbers = #tpu.dot_dimension_numbers<[1], [0], [0], [1], [0, 0, 1, 1], [], []>} : vector<16x64xf32>, vector<64x16xf32>, vector<16x16xf32> -> vector<16x16xf32>
    %8 = arith.truncf %7 : vector<16x16xf32> to vector<16x16xbf16>
    %c0_3 = arith.constant 0 : index
    %c0_4 = arith.constant 0 : index
    %9 = vector.load %arg3[%c0_3, %c0_4] : memref<16x64xbf16, #tpu.memory_space<vmem>>, vector<16x64xbf16>
    %cst_5 = arith.constant dense<0.000000e+00> : vector<16x64xf32>
    %10 = tpu.matmul %8, %9, %cst_5 {dimension_numbers = #tpu.dot_dimension_numbers<[1], [0], [0], [1], [0, 0, 1, 1], [], []>} : vector<16x16xbf16>, vector<16x64xbf16>, vector<16x64xf32> -> vector<16x64xf32>
    %c0_6 = arith.constant 0 : index
    %c0_7 = arith.constant 0 : index
    %11 = vector.load %arg4[%c0_6, %c0_7] : memref<1x64xf32, #tpu.memory_space<vmem>>, vector<1x64xf32>
    %c0_8 = arith.constant 0 : index
    %c0_9 = arith.constant 0 : index
    %12 = vector.load %arg5[%c0_8, %c0_9] : memref<1x64xf32, #tpu.memory_space<vmem>>, vector<1x64xf32>
    %cst_10 = arith.constant dense<0.000000e+00> : vector<16xf32>
    %13 = vector.multi_reduction <add>, %10, %cst_10 [1] : vector<16x64xf32> to vector<16xf32>
    %14 = vector.shape_cast %13 : vector<16xf32> to vector<16x1xf32>
    %cst_11 = arith.constant 6.400000e+01 : f32
    %15 = vector.broadcast %cst_11 : f32 to vector<16x1xf32>
    %16 = arith.divf %14, %15 : vector<16x1xf32>
    %17 = vector.broadcast %16 : vector<16x1xf32> to vector<16x64xf32>
    %18 = arith.subf %10, %17 : vector<16x64xf32>
    %19 = arith.mulf %18, %18 : vector<16x64xf32>
    %cst_12 = arith.constant dense<0.000000e+00> : vector<16xf32>
    %20 = vector.multi_reduction <add>, %19, %cst_12 [1] : vector<16x64xf32> to vector<16xf32>
    %21 = vector.shape_cast %20 : vector<16xf32> to vector<16x1xf32>
    %cst_13 = arith.constant 6.400000e+01 : f32
    %22 = vector.broadcast %cst_13 : f32 to vector<16x1xf32>
    %23 = arith.divf %21, %22 : vector<16x1xf32>
    %cst_14 = arith.constant 9.99999974E-6 : f32
    %24 = vector.broadcast %cst_14 : f32 to vector<16x1xf32>
    %25 = arith.addf %23, %24 : vector<16x1xf32>
    %26 = math.rsqrt %25 : vector<16x1xf32>
    %27 = vector.broadcast %26 : vector<16x1xf32> to vector<16x64xf32>
    %28 = arith.mulf %18, %27 : vector<16x64xf32>
    %29 = vector.broadcast %11 : vector<1x64xf32> to vector<16x64xf32>
    %30 = arith.mulf %28, %29 : vector<16x64xf32>
    %31 = vector.broadcast %12 : vector<1x64xf32> to vector<16x64xf32>
    %32 = arith.addf %30, %31 : vector<16x64xf32>
    %33 = arith.truncf %32 : vector<16x64xf32> to vector<16x64xbf16>
    %c0_15 = arith.constant 0 : index
    %c0_16 = arith.constant 0 : index
    %34 = vector.load %arg6[%c0_15, %c0_16] : memref<64x96xbf16, #tpu.memory_space<vmem>>, vector<64x96xbf16>
    %cst_17 = arith.constant dense<0.000000e+00> : vector<16x96xf32>
    %35 = tpu.matmul %33, %34, %cst_17 {dimension_numbers = #tpu.dot_dimension_numbers<[1], [0], [0], [1], [0, 0, 1, 1], [], []>} : vector<16x64xbf16>, vector<64x96xbf16>, vector<16x96xf32> -> vector<16x96xf32>
    %36 = vector.extract_strided_slice %35 {offsets = [0, 0], sizes = [16, 32], strides = [1, 1]} : vector<16x96xf32> to vector<16x32xf32>
    %37 = vector.extract_strided_slice %35 {offsets = [0, 32], sizes = [16, 32], strides = [1, 1]} : vector<16x96xf32> to vector<16x32xf32>
    %38 = vector.extract_strided_slice %35 {offsets = [0, 64], sizes = [16, 32], strides = [1, 1]} : vector<16x96xf32> to vector<16x32xf32>
    %c0_18 = arith.constant 0 : index
    %c0_19 = arith.constant 0 : index
    %39 = vector.load %arg7[%c0_18, %c0_19] : memref<16x32xf32, #tpu.memory_space<vmem>>, vector<16x32xf32>
    %c0_20 = arith.constant 0 : index
    %c0_21 = arith.constant 0 : index
    %40 = vector.load %arg8[%c0_20, %c0_21] : memref<16x32xf32, #tpu.memory_space<vmem>>, vector<16x32xf32>
    %c0_22 = arith.constant 0 : index
    %c0_23 = arith.constant 0 : index
    %41 = vector.load %arg9[%c0_22, %c0_23] : memref<32x32xf32, #tpu.memory_space<vmem>>, vector<32x32xf32>
    %42 = arith.mulf %36, %39 : vector<16x32xf32>
    %cst_24 = arith.constant dense<0.000000e+00> : vector<16x32xf32>
    %43 = tpu.matmul %36, %41, %cst_24 {dimension_numbers = #tpu.dot_dimension_numbers<[1], [0], [0], [1], [0, 0, 1, 1], [], []>} : vector<16x32xf32>, vector<32x32xf32>, vector<16x32xf32> -> vector<16x32xf32>
    %44 = arith.mulf %43, %40 : vector<16x32xf32>
    %45 = arith.addf %42, %44 : vector<16x32xf32>
    %46 = arith.mulf %37, %39 : vector<16x32xf32>
    %cst_25 = arith.constant dense<0.000000e+00> : vector<16x32xf32>
    %47 = tpu.matmul %37, %41, %cst_25 {dimension_numbers = #tpu.dot_dimension_numbers<[1], [0], [0], [1], [0, 0, 1, 1], [], []>} : vector<16x32xf32>, vector<32x32xf32>, vector<16x32xf32> -> vector<16x32xf32>
    %48 = arith.mulf %47, %40 : vector<16x32xf32>
    %49 = arith.addf %46, %48 : vector<16x32xf32>
    %cst_26 = arith.constant dense<0.000000e+00> : vector<16x16xf32>
    %50 = tpu.matmul %45, %49, %cst_26 {dimension_numbers = #tpu.dot_dimension_numbers<[1], [1], [0], [0], [0, 0, 1, 0], [], []>} : vector<16x32xf32>, vector<16x32xf32>, vector<16x16xf32> -> vector<16x16xf32>
    %cst_27 = arith.constant 5.65685415 : f32
    %51 = vector.broadcast %cst_27 : f32 to vector<16x16xf32>
    %52 = arith.mulf %50, %51 : vector<16x16xf32>
    %c0_28 = arith.constant 0 : index
    %c0_29 = arith.constant 0 : index
    %53 = vector.load %arg10[%c0_28, %c0_29] : memref<16x16xf32, #tpu.memory_space<vmem>>, vector<16x16xf32>
    %54 = arith.addf %52, %53 : vector<16x16xf32>
    %cst_30 = arith.constant dense<0xFF800000> : vector<16xf32>
    %55 = vector.multi_reduction <maximumf>, %54, %cst_30 [1] : vector<16x16xf32> to vector<16xf32>
    %56 = vector.shape_cast %55 : vector<16xf32> to vector<16x1xf32>
    %57 = vector.broadcast %56 : vector<16x1xf32> to vector<16x16xf32>
    %58 = arith.subf %54, %57 : vector<16x16xf32>
    %59 = math.exp %58 : vector<16x16xf32>
    %cst_31 = arith.constant dense<0.000000e+00> : vector<16xf32>
    %60 = vector.multi_reduction <add>, %59, %cst_31 [1] : vector<16x16xf32> to vector<16xf32>
    %61 = vector.shape_cast %60 : vector<16xf32> to vector<16x1xf32>
    %62 = vector.broadcast %61 : vector<16x1xf32> to vector<16x16xf32>
    %63 = arith.divf %59, %62 : vector<16x16xf32>
    %cst_32 = arith.constant dense<0.000000e+00> : vector<16x32xf32>
    %64 = tpu.matmul %63, %38, %cst_32 {dimension_numbers = #tpu.dot_dimension_numbers<[1], [0], [0], [1], [0, 0, 1, 1], [], []>} : vector<16x16xf32>, vector<16x32xf32>, vector<16x32xf32> -> vector<16x32xf32>
    %65 = arith.truncf %64 : vector<16x32xf32> to vector<16x32xbf16>
    %c0_33 = arith.constant 0 : index
    %c0_34 = arith.constant 0 : index
    %66 = vector.load %arg11[%c0_33, %c0_34] : memref<32x64xbf16, #tpu.memory_space<vmem>>, vector<32x64xbf16>
    %cst_35 = arith.constant dense<0.000000e+00> : vector<16x64xf32>
    %67 = tpu.matmul %65, %66, %cst_35 {dimension_numbers = #tpu.dot_dimension_numbers<[1], [0], [0], [1], [0, 0, 1, 1], [], []>} : vector<16x32xbf16>, vector<32x64xbf16>, vector<16x64xf32> -> vector<16x64xf32>
    %68 = arith.addf %67, %32 : vector<16x64xf32>
    %c0_36 = arith.constant 0 : index
    %c0_37 = arith.constant 0 : index
    %69 = vector.load %arg12[%c0_36, %c0_37] : memref<1x64xf32, #tpu.memory_space<vmem>>, vector<1x64xf32>
    %c0_38 = arith.constant 0 : index
    %c0_39 = arith.constant 0 : index
    %70 = vector.load %arg13[%c0_38, %c0_39] : memref<1x64xf32, #tpu.memory_space<vmem>>, vector<1x64xf32>
    %cst_40 = arith.constant dense<0.000000e+00> : vector<16xf32>
    %71 = vector.multi_reduction <add>, %68, %cst_40 [1] : vector<16x64xf32> to vector<16xf32>
    %72 = vector.shape_cast %71 : vector<16xf32> to vector<16x1xf32>
    %cst_41 = arith.constant 6.400000e+01 : f32
    %73 = vector.broadcast %cst_41 : f32 to vector<16x1xf32>
    %74 = arith.divf %72, %73 : vector<16x1xf32>
    %75 = vector.broadcast %74 : vector<16x1xf32> to vector<16x64xf32>
    %76 = arith.subf %68, %75 : vector<16x64xf32>
    %77 = arith.mulf %76, %76 : vector<16x64xf32>
    %cst_42 = arith.constant dense<0.000000e+00> : vector<16xf32>
    %78 = vector.multi_reduction <add>, %77, %cst_42 [1] : vector<16x64xf32> to vector<16xf32>
    %79 = vector.shape_cast %78 : vector<16xf32> to vector<16x1xf32>
    %cst_43 = arith.constant 6.400000e+01 : f32
    %80 = vector.broadcast %cst_43 : f32 to vector<16x1xf32>
    %81 = arith.divf %79, %80 : vector<16x1xf32>
    %cst_44 = arith.constant 9.99999974E-6 : f32
    %82 = vector.broadcast %cst_44 : f32 to vector<16x1xf32>
    %83 = arith.addf %81, %82 : vector<16x1xf32>
    %84 = math.rsqrt %83 : vector<16x1xf32>
    %85 = vector.broadcast %84 : vector<16x1xf32> to vector<16x64xf32>
    %86 = arith.mulf %76, %85 : vector<16x64xf32>
    %87 = vector.broadcast %69 : vector<1x64xf32> to vector<16x64xf32>
    %88 = arith.mulf %86, %87 : vector<16x64xf32>
    %89 = vector.broadcast %70 : vector<1x64xf32> to vector<16x64xf32>
    %90 = arith.addf %88, %89 : vector<16x64xf32>
    %c0_45 = arith.constant 0 : index
    %c0_46 = arith.constant 0 : index
    %91 = vector.load %arg14[%c0_45, %c0_46] : memref<64x8xf32, #tpu.memory_space<vmem>>, vector<64x8xf32>
    %cst_47 = arith.constant dense<0.000000e+00> : vector<16x8xf32>
    %92 = tpu.matmul %90, %91, %cst_47 {dimension_numbers = #tpu.dot_dimension_numbers<[1], [0], [0], [1], [0, 0, 1, 1], [], []>} : vector<16x64xf32>, vector<64x8xf32>, vector<16x8xf32> -> vector<16x8xf32>
    %c0_48 = arith.constant 0 : index
    %c0_49 = arith.constant 0 : index
    %93 = vector.load %arg15[%c0_48, %c0_49] : memref<1x8xf32, #tpu.memory_space<vmem>>, vector<1x8xf32>
    %94 = vector.broadcast %93 : vector<1x8xf32> to vector<16x8xf32>
    %95 = arith.addf %92, %94 : vector<16x8xf32>
    %c0_50 = arith.constant 0 : index
    %c0_51 = arith.constant 0 : index
    %96 = vector.load %arg16[%c0_50, %c0_51] : memref<1x8xf32, #tpu.memory_space<vmem>>, vector<1x8xf32>
    %c0_52 = arith.constant 0 : index
    %c0_53 = arith.constant 0 : index
    %97 = vector.load %arg17[%c0_52, %c0_53] : memref<1x8xf32, #tpu.memory_space<vmem>>, vector<1x8xf32>
    %cst_54 = arith.constant dense<0.000000e+00> : vector<16xf32>
    %98 = vector.multi_reduction <add>, %95, %cst_54 [1] : vector<16x8xf32> to vector<16xf32>
    %99 = vector.shape_cast %98 : vector<16xf32> to vector<16x1xf32>
    %cst_55 = arith.constant 8.000000e+00 : f32
    %100 = vector.broadcast %cst_55 : f32 to vector<16x1xf32>
    %101 = arith.divf %99, %100 : vector<16x1xf32>
    %102 = vector.broadcast %101 : vector<16x1xf32> to vector<16x8xf32>
    %103 = arith.subf %95, %102 : vector<16x8xf32>
    %104 = arith.mulf %103, %103 : vector<16x8xf32>
    %cst_56 = arith.constant dense<0.000000e+00> : vector<16xf32>
    %105 = vector.multi_reduction <add>, %104, %cst_56 [1] : vector<16x8xf32> to vector<16xf32>
    %106 = vector.shape_cast %105 : vector<16xf32> to vector<16x1xf32>
    %cst_57 = arith.constant 8.000000e+00 : f32
    %107 = vector.broadcast %cst_57 : f32 to vector<16x1xf32>
    %108 = arith.divf %106, %107 : vector<16x1xf32>
    %cst_58 = arith.constant 9.99999974E-6 : f32
    %109 = vector.broadcast %cst_58 : f32 to vector<16x1xf32>
    %110 = arith.addf %108, %109 : vector<16x1xf32>
    %111 = math.rsqrt %110 : vector<16x1xf32>
    %112 = vector.broadcast %111 : vector<16x1xf32> to vector<16x8xf32>
    %113 = arith.mulf %103, %112 : vector<16x8xf32>
    %114 = vector.broadcast %96 : vector<1x8xf32> to vector<16x8xf32>
    %115 = arith.mulf %113, %114 : vector<16x8xf32>
    %116 = vector.broadcast %97 : vector<1x8xf32> to vector<16x8xf32>
    %117 = arith.addf %115, %116 : vector<16x8xf32>
    %cst_59 = arith.constant dense<0xFF800000> : vector<16xf32>
    %118 = vector.multi_reduction <maximumf>, %117, %cst_59 [1] : vector<16x8xf32> to vector<16xf32>
    %119 = vector.shape_cast %118 : vector<16xf32> to vector<16x1xf32>
    %120 = vector.broadcast %119 : vector<16x1xf32> to vector<16x8xf32>
    %121 = arith.subf %117, %120 : vector<16x8xf32>
    %122 = math.exp %121 : vector<16x8xf32>
    %cst_60 = arith.constant dense<0.000000e+00> : vector<16xf32>
    %123 = vector.multi_reduction <add>, %122, %cst_60 [1] : vector<16x8xf32> to vector<16xf32>
    %124 = vector.shape_cast %123 : vector<16xf32> to vector<16x1xf32>
    %125 = vector.broadcast %124 : vector<16x1xf32> to vector<16x8xf32>
    %126 = arith.divf %122, %125 : vector<16x8xf32>
    %127 = arith.truncf %90 : vector<16x64xf32> to vector<16x64xbf16>
    %c0_61 = arith.constant 0 : index
    %c0_62 = arith.constant 0 : index
    %128 = vector.load %arg19[%c0_61, %c0_62] : memref<64x2048xbf16, #tpu.memory_space<vmem>>, vector<64x2048xbf16>
    %cst_63 = arith.constant dense<0.000000e+00> : vector<16x2048xf32>
    %129 = tpu.matmul %127, %128, %cst_63 {dimension_numbers = #tpu.dot_dimension_numbers<[1], [0], [0], [1], [0, 0, 1, 1], [], []>} : vector<16x64xbf16>, vector<64x2048xbf16>, vector<16x2048xf32> -> vector<16x2048xf32>
    %c0_64 = arith.constant 0 : index
    %c0_65 = arith.constant 0 : index
    %130 = vector.load %arg20[%c0_64, %c0_65] : memref<1x2048xf32, #tpu.memory_space<vmem>>, vector<1x2048xf32>
    %131 = vector.broadcast %130 : vector<1x2048xf32> to vector<16x2048xf32>
    %132 = arith.addf %129, %131 : vector<16x2048xf32>
    %cst_66 = arith.constant 0.707106769 : f32
    %133 = vector.broadcast %cst_66 : f32 to vector<16x2048xf32>
    %134 = arith.mulf %132, %133 : vector<16x2048xf32>
    %135 = math.absf %134 : vector<16x2048xf32>
    %cst_67 = arith.constant 0.327591091 : f32
    %136 = vector.broadcast %cst_67 : f32 to vector<16x2048xf32>
    %137 = arith.mulf %136, %135 : vector<16x2048xf32>
    %cst_68 = arith.constant 1.000000e+00 : f32
    %138 = vector.broadcast %cst_68 : f32 to vector<16x2048xf32>
    %139 = arith.addf %138, %137 : vector<16x2048xf32>
    %cst_69 = arith.constant 1.000000e+00 : f32
    %140 = vector.broadcast %cst_69 : f32 to vector<16x2048xf32>
    %141 = arith.divf %140, %139 : vector<16x2048xf32>
    %cst_70 = arith.constant 1.06140542 : f32
    %142 = vector.broadcast %cst_70 : f32 to vector<16x2048xf32>
    %143 = arith.mulf %141, %142 : vector<16x2048xf32>
    %cst_71 = arith.constant -1.45315206 : f32
    %144 = vector.broadcast %cst_71 : f32 to vector<16x2048xf32>
    %145 = arith.addf %144, %143 : vector<16x2048xf32>
    %146 = arith.mulf %141, %145 : vector<16x2048xf32>
    %cst_72 = arith.constant 1.42141378 : f32
    %147 = vector.broadcast %cst_72 : f32 to vector<16x2048xf32>
    %148 = arith.addf %147, %146 : vector<16x2048xf32>
    %149 = arith.mulf %141, %148 : vector<16x2048xf32>
    %cst_73 = arith.constant -0.284496725 : f32
    %150 = vector.broadcast %cst_73 : f32 to vector<16x2048xf32>
    %151 = arith.addf %150, %149 : vector<16x2048xf32>
    %152 = arith.mulf %141, %151 : vector<16x2048xf32>
    %cst_74 = arith.constant 0.254829586 : f32
    %153 = vector.broadcast %cst_74 : f32 to vector<16x2048xf32>
    %154 = arith.addf %153, %152 : vector<16x2048xf32>
    %155 = arith.mulf %141, %154 : vector<16x2048xf32>
    %cst_75 = arith.constant 0.000000e+00 : f32
    %156 = vector.broadcast %cst_75 : f32 to vector<16x2048xf32>
    %157 = arith.subf %156, %135 : vector<16x2048xf32>
    %158 = arith.mulf %157, %135 : vector<16x2048xf32>
    %159 = math.exp %158 : vector<16x2048xf32>
    %160 = arith.mulf %155, %159 : vector<16x2048xf32>
    %cst_76 = arith.constant 1.000000e+00 : f32
    %161 = vector.broadcast %cst_76 : f32 to vector<16x2048xf32>
    %162 = arith.subf %161, %160 : vector<16x2048xf32>
    %cst_77 = arith.constant 0.000000e+00 : f32
    %163 = vector.broadcast %cst_77 : f32 to vector<16x2048xf32>
    %164 = arith.cmpf oge, %134, %163 : vector<16x2048xf32>
    %cst_78 = arith.constant 0.000000e+00 : f32
    %165 = vector.broadcast %cst_78 : f32 to vector<16x2048xf32>
    %166 = arith.subf %165, %162 : vector<16x2048xf32>
    %167 = arith.select %164, %162, %166 : vector<16x2048xi1>, vector<16x2048xf32>
    %cst_79 = arith.constant 5.000000e-01 : f32
    %168 = vector.broadcast %cst_79 : f32 to vector<16x2048xf32>
    %169 = arith.mulf %168, %132 : vector<16x2048xf32>
    %cst_80 = arith.constant 1.000000e+00 : f32
    %170 = vector.broadcast %cst_80 : f32 to vector<16x2048xf32>
    %171 = arith.addf %170, %167 : vector<16x2048xf32>
    %172 = arith.mulf %169, %171 : vector<16x2048xf32>
    %c0_81 = arith.constant 0 : index
    %c0_82 = arith.constant 0 : index
    %173 = vector.load %arg18[%c0_81, %c0_82] : memref<8x2048xf32, #tpu.memory_space<vmem>>, vector<8x2048xf32>
    %cst_83 = arith.constant dense<0.000000e+00> : vector<16x2048xf32>
    %174 = tpu.matmul %126, %173, %cst_83 {dimension_numbers = #tpu.dot_dimension_numbers<[1], [0], [0], [1], [0, 0, 1, 1], [], []>} : vector<16x8xf32>, vector<8x2048xf32>, vector<16x2048xf32> -> vector<16x2048xf32>
    %175 = arith.mulf %172, %174 : vector<16x2048xf32>
    %176 = arith.truncf %175 : vector<16x2048xf32> to vector<16x2048xbf16>
    %c0_84 = arith.constant 0 : index
    %c0_85 = arith.constant 0 : index
    %177 = vector.load %arg21[%c0_84, %c0_85] : memref<2048x64xbf16, #tpu.memory_space<vmem>>, vector<2048x64xbf16>
    %cst_86 = arith.constant dense<0.000000e+00> : vector<16x64xf32>
    %178 = tpu.matmul %176, %177, %cst_86 {dimension_numbers = #tpu.dot_dimension_numbers<[1], [0], [0], [1], [0, 0, 1, 1], [], []>} : vector<16x2048xbf16>, vector<2048x64xbf16>, vector<16x64xf32> -> vector<16x64xf32>
    %c0_87 = arith.constant 0 : index
    %c0_88 = arith.constant 0 : index
    %179 = vector.load %arg22[%c0_87, %c0_88] : memref<8x64xf32, #tpu.memory_space<vmem>>, vector<8x64xf32>
    %cst_89 = arith.constant dense<0.000000e+00> : vector<16x64xf32>
    %180 = tpu.matmul %126, %179, %cst_89 {dimension_numbers = #tpu.dot_dimension_numbers<[1], [0], [0], [1], [0, 0, 1, 1], [], []>} : vector<16x8xf32>, vector<8x64xf32>, vector<16x64xf32> -> vector<16x64xf32>
    %181 = arith.addf %178, %180 : vector<16x64xf32>
    %182 = arith.addf %181, %90 : vector<16x64xf32>
    %183 = arith.addf %182, %10 : vector<16x64xf32>
    %c0_90 = arith.constant 0 : index
    %c0_91 = arith.constant 0 : index
    %184 = vector.load %arg23[%c0_90, %c0_91] : memref<1x64xf32, #tpu.memory_space<vmem>>, vector<1x64xf32>
    %c0_92 = arith.constant 0 : index
    %c0_93 = arith.constant 0 : index
    %185 = vector.load %arg24[%c0_92, %c0_93] : memref<1x64xf32, #tpu.memory_space<vmem>>, vector<1x64xf32>
    %cst_94 = arith.constant dense<0.000000e+00> : vector<16xf32>
    %186 = vector.multi_reduction <add>, %183, %cst_94 [1] : vector<16x64xf32> to vector<16xf32>
    %187 = vector.shape_cast %186 : vector<16xf32> to vector<16x1xf32>
    %cst_95 = arith.constant 6.400000e+01 : f32
    %188 = vector.broadcast %cst_95 : f32 to vector<16x1xf32>
    %189 = arith.divf %187, %188 : vector<16x1xf32>
    %190 = vector.broadcast %189 : vector<16x1xf32> to vector<16x64xf32>
    %191 = arith.subf %183, %190 : vector<16x64xf32>
    %192 = arith.mulf %191, %191 : vector<16x64xf32>
    %cst_96 = arith.constant dense<0.000000e+00> : vector<16xf32>
    %193 = vector.multi_reduction <add>, %192, %cst_96 [1] : vector<16x64xf32> to vector<16xf32>
    %194 = vector.shape_cast %193 : vector<16xf32> to vector<16x1xf32>
    %cst_97 = arith.constant 6.400000e+01 : f32
    %195 = vector.broadcast %cst_97 : f32 to vector<16x1xf32>
    %196 = arith.divf %194, %195 : vector<16x1xf32>
    %cst_98 = arith.constant 9.99999974E-6 : f32
    %197 = vector.broadcast %cst_98 : f32 to vector<16x1xf32>
    %198 = arith.addf %196, %197 : vector<16x1xf32>
    %199 = math.rsqrt %198 : vector<16x1xf32>
    %200 = vector.broadcast %199 : vector<16x1xf32> to vector<16x64xf32>
    %201 = arith.mulf %191, %200 : vector<16x64xf32>
    %202 = vector.broadcast %184 : vector<1x64xf32> to vector<16x64xf32>
    %203 = arith.mulf %201, %202 : vector<16x64xf32>
    %204 = vector.broadcast %185 : vector<1x64xf32> to vector<16x64xf32>
    %205 = arith.addf %203, %204 : vector<16x64xf32>
    %c0_99 = arith.constant 0 : index
    %c0_100 = arith.constant 0 : index
    %206 = vector.load %arg25[%c0_99, %c0_100] : memref<2x16xf32, #tpu.memory_space<vmem>>, vector<2x16xf32>
    %cst_101 = arith.constant dense<0.000000e+00> : vector<2x64xf32>
    %207 = tpu.matmul %206, %205, %cst_101 {dimension_numbers = #tpu.dot_dimension_numbers<[1], [0], [0], [1], [0, 0, 1, 1], [], []>} : vector<2x16xf32>, vector<16x64xf32>, vector<2x64xf32> -> vector<2x64xf32>
    %c0_102 = arith.constant 0 : index
    %c0_103 = arith.constant 0 : index
    %208 = vector.load %arg26[%c0_102, %c0_103] : memref<2x64xf32, #tpu.memory_space<vmem>>, vector<2x64xf32>
    tpu.vector_store %arg26[%c0_102, %c0_103], %207 {strides = array<i32>} : memref<2x64xf32, #tpu.memory_space<vmem>>, vector<2x64xf32>,
    return
  }
  func.func @transform_0(%arg0: i32) -> (i32, i32) {
    %c0_i32 = arith.constant 0 : i32
    %c0_i32_0 = arith.constant 0 : i32
    %c0_i32_1 = arith.constant 0 : i32
    return %c0_i32, %c0_i32_0 : i32, i32
  }
  func.func @transform_1(%arg0: i32) -> (i32, i32) {
    %c0_i32 = arith.constant 0 : i32
    %c0_i32_0 = arith.constant 0 : i32
    %c0_i32_1 = arith.constant 0 : i32
    return %c0_i32, %c0_i32_0 : i32, i32
  }
  func.func @transform_2(%arg0: i32) -> (i32, i32) {
    %c0_i32 = arith.constant 0 : i32
    %c0_i32_0 = arith.constant 0 : i32
    %c0_i32_1 = arith.constant 0 : i32
    return %c0_i32, %c0_i32_0 : i32, i32
  }
  func.func @transform_3(%arg0: i32) -> (i32, i32) {
    %c0_i32 = arith.constant 0 : i32
    %c0_i32_0 = arith.constant 0 : i32
    %c0_i32_1 = arith.constant 0 : i32
    return %c0_i32, %c0_i32_0 : i32, i32
  }
  func.func @transform_4(%arg0: i32) -> (i32, i32) {
    %c0_i32 = arith.constant 0 : i32
    %c0_i32_0 = arith.constant 0 : i32
    %c0_i32_1 = arith.constant 0 : i32
    return %c0_i32, %c0_i32_0 : i32, i32
  }
  func.func @transform_5(%arg0: i32) -> (i32, i32) {
    %c0_i32 = arith.constant 0 : i32
    %c0_i32_0 = arith.constant 0 : i32
    %c0_i32_1 = arith.constant 0 : i32
    return %c0_i32, %c0_i32_0 : i32, i32
  }
  func.func @transform_6(%arg0: i32) -> (i32, i32) {
    %c0_i32 = arith.constant 0 : i32
    %c0_i32_0 = arith.constant 0 : i32
    %c0_i32_1 = arith.constant 0 : i32
    return %c0_i32, %c0_i32_0 : i32, i32
  }
  func.func @transform_7(%arg0: i32) -> (i32, i32) {
    %c0_i32 = arith.constant 0 : i32
    %c0_i32_0 = arith.constant 0 : i32
    %c0_i32_1 = arith.constant 0 : i32
    return %c0_i32, %c0_i32_0 : i32, i32
  }
  func.func @transform_8(%arg0: i32) -> (i32, i32) {
    %c0_i32 = arith.constant 0 : i32
    %c0_i32_0 = arith.constant 0 : i32
    %c0_i32_1 = arith.constant 0 : i32
    return %c0_i32, %c0_i32_0 : i32, i32
  }
  func.func @transform_9(%arg0: i32) -> (i32, i32) {
    %c0_i32 = arith.constant 0 : i32
    %c0_i32_0 = arith.constant 0 : i32
    %c0_i32_1 = arith.constant 0 : i32
    return %c0_i32, %c0_i32_0 : i32, i32
  }
  func.func @transform_10(%arg0: i32) -> (i32, i32) {
    %c0_i32 = arith.constant 0 : i32
    %c0_i32_0 = arith.constant 0 : i32
    %c0_i32_1 = arith.constant 0 : i32
    return %c0_i32, %c0_i32_0 : i32, i32
  }
  func.func @transform_11(%arg0: i32) -> (i32, i32) {
    %c0_i32 = arith.constant 0 : i32
    %c0_i32_0 = arith.constant 0 : i32
    %c0_i32_1 = arith.constant 0 : i32
    return %c0_i32, %c0_i32_0 : i32, i32
  }
  func.func @transform_12(%arg0: i32) -> (i32, i32) {
    %c0_i32 = arith.constant 0 : i32
    %c0_i32_0 = arith.constant 0 : i32
    %c0_i32_1 = arith.constant 0 : i32
    return %c0_i32, %c0_i32_0 : i32, i32
  }
  func.func @transform_13(%arg0: i32) -> (i32, i32) {
    %c0_i32 = arith.constant 0 : i32
    %c0_i32_0 = arith.constant 0 : i32
    %c0_i32_1 = arith.constant 0 : i32
    return %c0_i32, %c0_i32_0 : i32, i32
  }
  func.func @transform_14(%arg0: i32) -> (i32, i32) {
    %c0_i32 = arith.constant 0 : i32
    %c0_i32_0 = arith.constant 0 : i32
    %c0_i32_1 = arith.constant 0 : i32
    return %c0_i32, %c0_i32_0 : i32, i32
  }
  func.func @transform_15(%arg0: i32) -> (i32, i32) {
    %c0_i32 = arith.constant 0 : i32
    %c0_i32_0 = arith.constant 0 : i32
    %c0_i32_1 = arith.constant 0 : i32
    return %c0_i32, %c0_i32_0 : i32, i32
  }
  func.func @transform_16(%arg0: i32) -> (i32, i32) {
    %c0_i32 = arith.constant 0 : i32
    %c0_i32_0 = arith.constant 0 : i32
    %c0_i32_1 = arith.constant 0 : i32
    return %c0_i32, %c0_i32_0 : i32, i32
  }
  func.func @transform_17(%arg0: i32) -> (i32, i32) {
    %c0_i32 = arith.constant 0 : i32
    %c0_i32_0 = arith.constant 0 : i32
    %c0_i32_1 = arith.constant 0 : i32
    return %c0_i32, %c0_i32_0 : i32, i32
  }
  func.func @transform_18(%arg0: i32) -> (i32, i32) {
    %c0_i32 = arith.constant 0 : i32
    %c0_i32_0 = arith.constant 0 : i32
    %c0_i32_1 = arith.constant 0 : i32
    return %c0_i32, %c0_i32_0 : i32, i32
  }
  func.func @transform_19(%arg0: i32) -> (i32, i32) {
    %c0_i32 = arith.constant 0 : i32
    %c0_i32_0 = arith.constant 0 : i32
    %c0_i32_1 = arith.constant 0 : i32
    return %c0_i32, %c0_i32_0 : i32, i32
  }
  func.func @transform_20(%arg0: i32) -> (i32, i32) {
    %c0_i32 = arith.constant 0 : i32
    %c0_i32_0 = arith.constant 0 : i32
    %c0_i32_1 = arith.constant 0 : i32
    return %c0_i32, %c0_i32_0 : i32, i32
  }
  func.func @transform_21(%arg0: i32) -> (i32, i32) {
    %c0_i32 = arith.constant 0 : i32
    %c0_i32_0 = arith.constant 0 : i32
    %c0_i32_1 = arith.constant 0 : i32
    return %c0_i32, %c0_i32_0 : i32, i32
  }
  func.func @transform_22(%arg0: i32) -> (i32, i32) {
    %c0_i32 = arith.constant 0 : i32
    %c0_i32_0 = arith.constant 0 : i32
    %c0_i32_1 = arith.constant 0 : i32
    return %c0_i32, %c0_i32_0 : i32, i32
  }
  func.func @transform_23(%arg0: i32) -> (i32, i32) {
    %c0_i32 = arith.constant 0 : i32
    %c0_i32_0 = arith.constant 0 : i32
    %c0_i32_1 = arith.constant 0 : i32
    return %c0_i32, %c0_i32_0 : i32, i32
  }
  func.func @transform_24(%arg0: i32) -> (i32, i32) {
    %c0_i32 = arith.constant 0 : i32
    %c0_i32_0 = arith.constant 0 : i32
    %c0_i32_1 = arith.constant 0 : i32
    return %c0_i32, %c0_i32_0 : i32, i32
  }
  func.func @transform_25(%arg0: i32) -> (i32, i32) {
    %c0_i32 = arith.constant 0 : i32
    %c0_i32_0 = arith.constant 0 : i32
    %c0_i32_1 = arith.constant 0 : i32
    return %c0_i32, %c0_i32_0 : i32, i32
  }
}

</mosaic_0001>

<bundles_post_ra>
// kernel: _lambda_.1
= control target key start
LH: loop header
LB: loop body
LE: loop exit
PB: predicated region body
PF: predicated region fallthrough
CT: control target
= control target key end

     0   :  { %s8589_s0 = inlined_call_operand.hbm [shape: s32[16,1], index: 0, kind: input, shape index: {}]   ;;  %s8590_s1 = inlined_call_operand.hbm [shape: f32[64,16], index: 1, kind: input, shape index: {}]   ;;  %s8591_s2 = inlined_call_operand.hbm [shape: bf16[16,64], index: 2, kind: input, shape index: {}]   ;;  %s8592_s3 = inlined_call_operand.hbm [shape: f32[1,64], index: 3, kind: input, shape index: {}, may-alias: {3,11,22}]   ;;  %s8593_s4 = inlined_call_operand.hbm [shape: f32[1,64], index: 4, kind: input, shape index: {}, may-alias: {4,12,23}]   ;;  %s8594_s5 = inlined_call_operand.hbm [shape: bf16[64,96], index: 5, kind: input, shape index: {}]   ;;  %s8595_s6 = inlined_call_operand.hbm [shape: f32[16,32], index: 6, kind: input, shape index: {}]   ;;  %s8596_s7 = inlined_call_operand.hbm [shape: f32[16,32], index: 7, kind: input, shape index: {}]   ;;  %s8597_s8 = inlined_call_operand.hbm [shape: f32[32,32], index: 8, kind: input, shape index: {}]   ;;  %s8598_s9 = inlined_call_operand.hbm [shape: f32[16,16], index: 9, kind: input, shape index: {}]   ;;  %s8599_s10 = inlined_call_operand.hbm [shape: bf16[32,64], index: 10, kind: input, shape index: {}]   ;;  %s8600_s11 = inlined_call_operand.hbm [shape: f32[1,64], index: 11, kind: input, shape index: {}, may-alias: {3,11,22}]   ;;  %s8601_s12 = inlined_call_operand.hbm [shape: f32[1,64], index: 12, kind: input, shape index: {}, may-alias: {4,12,23}]   ;;  %s8602_s13 = inlined_call_operand.hbm [shape: f32[64,8], index: 13, kind: input, shape index: {}]   ;;  %s8603_s14 = inlined_call_operand.hbm [shape: f32[1,8], index: 14, kind: input, shape index: {}]   ;;  %s8604_s15 = inlined_call_operand.hbm [shape: f32[1,8], index: 15, kind: input, shape index: {}]   ;;  %s8605_s16 = inlined_call_operand.hbm [shape: f32[1,8], index: 16, kind: input, shape index: {}]   ;;  %s8606_s17 = inlined_call_operand.hbm [shape: f32[8,2048], index: 17, kind: input, shape index: {}]   ;;  %s8607_s18 = inlined_call_operand.hbm [shape: bf16[64,2048], index: 18, kind: input, shape index: {}]   ;;  %s8608_s19 = inlined_call_operand.hbm [shape: f32[1,2048], index: 19, kind: input, shape index: {}]   ;;  %s8609_s20 = inlined_call_operand.hbm [shape: bf16[2048,64], index: 20, kind: input, shape index: {}]   ;;  %s8610_s21 = inlined_call_operand.hbm [shape: f32[8,64], index: 21, kind: input, shape index: {}]   ;;  %s8611_s22 = inlined_call_operand.hbm [shape: f32[1,64], index: 22, kind: input, shape index: {}, may-alias: {3,11,22}]   ;;  %s8612_s23 = inlined_call_operand.hbm [shape: f32[1,64], index: 23, kind: input, shape index: {}, may-alias: {4,12,23}]   ;;  %s8613_s24 = inlined_call_operand.hbm [shape: f32[2,16], index: 24, kind: input, shape index: {}]   ;;  %s8614_s25 = inlined_call_operand.hbm [shape: f32[2,64], index: 25, kind: output, shape index: {}]  }
   0x1   :  { %8707 = sst [smem:[#allocation146_spill]] %s8589_s0 }
   0x2   :  { %8708 = sst [smem:[#allocation147_spill]] %s8590_s1 }
   0x3   :  { %8709 = sst [smem:[#allocation148_spill]] %s8591_s2 }
   0x4   :  { %8710 = sst [smem:[#allocation149_spill]] %s8592_s3 }
   0x5   :  { %8711 = sst [smem:[#allocation150_spill]] %s8593_s4 }
   0x6   :  { %8712 = sst [smem:[#allocation151_spill]] %s8594_s5 }
   0x7   :  { %8713 = sst [smem:[#allocation152_spill]] %s8595_s6 }
   0x8   :  { %8714 = sst [smem:[#allocation153_spill]] %s8596_s7 }
   0x9   :  { %8715 = sst [smem:[#allocation154_spill]] %s8597_s8 }
   0xa   :  { %8716 = sst [smem:[#allocation155_spill]] %s8598_s9 }
   0xb   :  { %8717 = sst [smem:[#allocation156_spill]] %s8611_s22 }
   0xc   :  { %8718 = sst [smem:[#allocation157_spill]] %s8613_s24 }
   0xd   :  { %8719 = sst [smem:[#allocation158_spill]] %s8614_s25 }
   0xe   :  { %30 = vsyncpa [#allocation3], 0 }
   0xf   :  { %31 = vsyncpa [#allocation6], 0 }
  0x10   :  { %32 = vsyncpa [#allocation9], 0 }
  0x11   :  { %33 = vsyncpa [#allocation12], 0 }
  0x12   :  { %34 = vsyncpa [#allocation15], 0 }
  0x13   :  { %35 = vsyncpa [#allocation18], 0 }
  0x14   :  { %36 = vsyncpa [#allocation21], 0 }
  0x15   :  { %37 = vsyncpa [#allocation24], 0 }
  0x16   :  { %38 = vsyncpa [#allocation27], 0 }
  0x17   :  { %39 = vsyncpa [#allocation30], 0 }
  0x18   :  { %40 = vsyncpa [#allocation33], 0 }
  0x19   :  { %41 = vsyncpa [#allocation36], 0 }
  0x1a   :  { %42 = vsyncpa [#allocation39], 0 }
  0x1b   :  { %43 = vsyncpa [#allocation4], 0  ;;  %s6899_s29 = smov [#allocation5]   ;;  %s6900_s6 = smov [#allocation8]  }
  0x1c   :  { %s61_s2 = sshll.u32 %s6899_s29, 4  ;;  %s86_s30 = sshll.u32 %s6900_s6, 4  ;;  %s62_s2 = int_to_ptr.vmem [resolvable:$true] %s61_s2  ;;  %s7066_s30 = int_to_ptr.vmem [resolvable:$true] %s86_s30 }
  0x1d   :  { %s8720_s26 = sld [smem:[#allocation147_spill]] }
  0x23   :  { %s6299_s1 = scalar_lea.hbm %s8720_s26, 1024 }
  0x24   :  { %p6300_p0 = scmp.ne.s32.totalorder %s8720_s26, %s6299_s1  ;;  %p6303_p1 = scmp.lt.u32.totalorder %s6299_s1, %s8720_s26 }
  0x26   :  { %p6305_p2 = pnand %p6303_p1, %p6300_p0 }
  0x28   :  { %6308 = shalt.err (!%p6305_p2)
}
  0x29   :  { %s6309_s9 = scalar_lea.vmem %s62_s2, 1024  ;;  %p6314_p4 = scmp.lt.s32.totalorder %s62_s2, %s62_s2 }
  0x2a   :  { %p6310_p3 = scmp.ne.s32.totalorder %s62_s2, %s6309_s9  ;;  %p6315_p5 = scmp.lt.s32.totalorder %s6309_s9, %s6309_s9 }
  0x2c   :  { %p6316_p6 = por %p6315_p5, %p6314_p4 }
  0x2e   :  { %p6317_p7 = pnand %p6316_p6, %p6310_p3 }
  0x30   :  { %6320 = shalt.err (!%p6317_p7)
}
  0x31   :  { %s8625_s5 = smov 128   ;;  %s8627_s0 = smov 8  }
  0x32   :  { %67 = dma.hbm_to_vmem [thread:$0]  %s8720_s26, 1024, %s62_s2, [#allocation6], %s8625_s5, %s8625_s5, %s8627_s0  }
  0x33   :  { %s8721_s1 = sld [smem:[#allocation149_spill]] }
  0x39   :  { %s6321_s8 = scalar_lea.hbm %s8721_s1, 16 }
  0x3a   :  { %p6322_p8 = scmp.ne.s32.totalorder %s8721_s1, %s6321_s8  ;;  %p6325_p9 = scmp.lt.u32.totalorder %s6321_s8, %s8721_s1 }
  0x3c   :  { %p6327_p10 = pnand %p6325_p9, %p6322_p8 }
  0x3e   :  { %6330 = shalt.err (!%p6327_p10)
}
  0x3f   :  { %s6331_s29 = scalar_lea.vmem %s7066_s30, 16  ;;  %s6335_s2 = scalar_lea.vmem %s7066_s30, 32 }
  0x40   :  { %p6332_p11 = scmp.ne.s32.totalorder %s7066_s30, %s6331_s29  ;;  %p6336_p12 = scmp.lt.s32.totalorder %s7066_s30, %s7066_s30 }
  0x41   :  { %p6337_p13 = scmp.lt.s32.totalorder %s6335_s2, %s6331_s29 }
  0x43   :  { %p6338_p0 = por %p6337_p13, %p6336_p12 }
  0x45   :  { %p6339_p1 = pnand %p6338_p0, %p6332_p11 }
  0x47   :  { %6342 = shalt.err (!%p6339_p1)
}
  0x48   :  { %89 = dma.hbm_to_vmem [thread:$0]  %s8721_s1, 16, %s7066_s30, [#allocation9]  }
  0x49   :  { %s6903_s7 = smov [#allocation11]   ;;  %s6904_s8 = smov [#allocation14]  }
  0x4a   :  { %s105_s3 = sshll.u32 %s6903_s7, 4  ;;  %s129_s27 = sshll.u32 %s6904_s8, 4  ;;  %s106_s3 = int_to_ptr.vmem [resolvable:$true] %s105_s3  ;;  %s7101_s27 = int_to_ptr.vmem [resolvable:$true] %s129_s27 }
  0x4b   :  { %s8722_s9 = sld [smem:[#allocation151_spill]] }
  0x51   :  { %s6343_s5 = scalar_lea.hbm %s8722_s9, 512 }
  0x52   :  { %p6344_p2 = scmp.ne.s32.totalorder %s8722_s9, %s6343_s5  ;;  %p6347_p3 = scmp.lt.u32.totalorder %s6343_s5, %s8722_s9 }
  0x54   :  { %p6349_p4 = pnand %p6347_p3, %p6344_p2 }
  0x56   :  { %6352 = shalt.err (!%p6349_p4)
}
  0x57   :  { %s6353_s30 = scalar_lea.vmem %s106_s3, 512  ;;  %p6358_p6 = scmp.lt.s32.totalorder %s106_s3, %s106_s3 }
  0x58   :  { %p6354_p5 = scmp.ne.s32.totalorder %s106_s3, %s6353_s30  ;;  %p6359_p7 = scmp.lt.s32.totalorder %s6353_s30, %s6353_s30 }
  0x5a   :  { %p6360_p8 = por %p6359_p7, %p6358_p6 }
  0x5c   :  { %p6361_p9 = pnand %p6360_p8, %p6354_p5 }
  0x5e   :  { %6364 = shalt.err (!%p6361_p9)
}
  0x5f   :  { %s8630_s1 = smov 64   ;;  %s8632_s26 = smov 4  }
  0x60   :  { %111 = dma.hbm_to_vmem [thread:$0]  %s8722_s9, 512, %s106_s3, [#allocation12], %s8630_s1, %s8630_s1, %s8632_s26  }
  0x61   :  { %s8723_s0 = sld [smem:[#allocation153_spill]] }
  0x67   :  { %s6365_s8 = scalar_lea.hbm %s8723_s0, 256 }
  0x68   :  { %p6366_p10 = scmp.ne.s32.totalorder %s8723_s0, %s6365_s8  ;;  %p6369_p11 = scmp.lt.u32.totalorder %s6365_s8, %s8723_s0 }
  0x6a   :  { %p6371_p12 = pnand %p6369_p11, %p6366_p10 }
  0x6c   :  { %6374 = shalt.err (!%p6371_p12)
}
  0x6d   :  { %s6375_s30 = scalar_lea.vmem %s7101_s27, 256  ;;  %p6380_p0 = scmp.lt.s32.totalorder %s7101_s27, %s7101_s27 }
  0x6e   :  { %p6376_p13 = scmp.ne.s32.totalorder %s7101_s27, %s6375_s30  ;;  %p6381_p1 = scmp.lt.s32.totalorder %s6375_s30, %s6375_s30 }
  0x70   :  { %p6382_p2 = por %p6381_p1, %p6380_p0 }
  0x72   :  { %p6383_p3 = pnand %p6382_p2, %p6376_p13 }
  0x74   :  { %6386 = shalt.err (!%p6383_p3)
}
  0x75   :  { %s8724_s3 = smov 8   ;;  %s8725_s9 = smov 128  }
  0x76   :  { %135 = dma.hbm_to_vmem [thread:$0]  %s8723_s0, 256, %s7101_s27, [#allocation15], %s8725_s9, %s8725_s9, %s8724_s3  }
  0x77   :  { %s6907_s25 = smov [#allocation17]   ;;  %s6908_s8 = smov [#allocation20]  }
  0x78   :  { %s153_s5 = sshll.u32 %s6907_s25, 4  ;;  %s178_s4 = sshll.u32 %s6908_s8, 4  ;;  %s154_s5 = int_to_ptr.vmem [resolvable:$true] %s153_s5  ;;  %s179_s4 = int_to_ptr.vmem [resolvable:$true] %s178_s4 }
  0x79   :  { %s8726_s2 = sld [smem:[#allocation155_spill]] }
  0x7f   :  { %s6387_s30 = scalar_lea.hbm %s8726_s2, 256 }
  0x80   :  { %p6388_p4 = scmp.ne.s32.totalorder %s8726_s2, %s6387_s30  ;;  %p6391_p5 = scmp.lt.u32.totalorder %s6387_s30, %s8726_s2 }
  0x82   :  { %p6393_p6 = pnand %p6391_p5, %p6388_p4 }
  0x84   :  { %6396 = shalt.err (!%p6393_p6)
}
  0x85   :  { %s6397_s27 = scalar_lea.vmem %s154_s5, 256  ;;  %p6402_p8 = scmp.lt.s32.totalorder %s154_s5, %s154_s5 }
  0x86   :  { %p6398_p7 = scmp.ne.s32.totalorder %s154_s5, %s6397_s27  ;;  %p6403_p9 = scmp.lt.s32.totalorder %s6397_s27, %s6397_s27 }
  0x88   :  { %p6404_p10 = por %p6403_p9, %p6402_p8 }
  0x8a   :  { %p6405_p11 = pnand %p6404_p10, %p6398_p7 }
  0x8c   :  { %6408 = shalt.err (!%p6405_p11)
}
  0x8d   :  { %159 = dma.hbm_to_vmem [thread:$0]  %s8726_s2, 256, %s154_s5, [#allocation18], %s8725_s9, %s8725_s9, %s8724_s3  }
  0x8e   :  { %s6409_s22 = scalar_lea.hbm %s8600_s11, 16 }
  0x8f   :  { %p6410_p12 = scmp.ne.s32.totalorder %s8600_s11, %s6409_s22  ;;  %p6413_p13 = scmp.lt.u32.totalorder %s6409_s22, %s8600_s11 }
  0x91   :  { %p6415_p0 = pnand %p6413_p13, %p6410_p12 }
  0x93   :  { %6418 = shalt.err (!%p6415_p0)
}
  0x94   :  { %s6419_s28 = scalar_lea.vmem %s179_s4, 16  ;;  %s6423_s29 = scalar_lea.vmem %s179_s4, 32 }
  0x95   :  { %p6420_p1 = scmp.ne.s32.totalorder %s179_s4, %s6419_s28  ;;  %p6424_p2 = scmp.lt.s32.totalorder %s179_s4, %s179_s4 }
  0x96   :  { %p6425_p3 = scmp.lt.s32.totalorder %s6423_s29, %s6419_s28 }
  0x98   :  { %p6426_p4 = por %p6425_p3, %p6424_p2 }
  0x9a   :  { %p6427_p5 = pnand %p6426_p4, %p6420_p1 }
  0x9c   :  { %6430 = shalt.err (!%p6427_p5)
}
  0x9d   :  { %181 = dma.hbm_to_vmem [thread:$0]  %s8600_s11, 16, %s179_s4, [#allocation21]  }
  0x9e   :  { %s6909_s30 = smov [#allocation23]   ;;  %s6910_s0 = smov [#allocation26]  }
  0x9f   :  { %s197_s27 = sshll.u32 %s6909_s30, 4  ;;  %s220_s6 = sshll.u32 %s6910_s0, 4  ;;  %s198_s27 = int_to_ptr.vmem [resolvable:$true] %s197_s27  ;;  %s221_s6 = int_to_ptr.vmem [resolvable:$true] %s220_s6 }
  0xa0   :  { %s6431_s22 = scalar_lea.hbm %s8602_s13, 1024 }
  0xa1   :  { %p6432_p6 = scmp.ne.s32.totalorder %s8602_s13, %s6431_s22  ;;  %p6435_p7 = scmp.lt.u32.totalorder %s6431_s22, %s8602_s13 }
  0xa3   :  { %p6437_p8 = pnand %p6435_p7, %p6432_p6 }
  0xa5   :  { %6440 = shalt.err (!%p6437_p8)
}
  0xa6   :  { %s6441_s11 = scalar_lea.vmem %s198_s27, 1024  ;;  %p6446_p10 = scmp.lt.s32.totalorder %s198_s27, %s198_s27 }
  0xa7   :  { %p6442_p9 = scmp.ne.s32.totalorder %s198_s27, %s6441_s11  ;;  %p6447_p11 = scmp.lt.s32.totalorder %s6441_s11, %s6441_s11 }
  0xa9   :  { %p6448_p12 = por %p6447_p11, %p6446_p10 }
  0xab   :  { %p6449_p13 = pnand %p6448_p12, %p6442_p9 }
  0xad   :  { %6452 = shalt.err (!%p6449_p13)
}
  0xae   :  { %203 = dma.hbm_to_vmem [thread:$0]  %s8602_s13, 1024, %s198_s27, [#allocation24], %s8725_s9, %s8725_s9, %s8724_s3  }
  0xaf   :  { %s6453_s2 = scalar_lea.hbm %s8604_s15, 16 }
  0xb0   :  { %p6454_p0 = scmp.ne.s32.totalorder %s8604_s15, %s6453_s2  ;;  %p6457_p1 = scmp.lt.u32.totalorder %s6453_s2, %s8604_s15 }
  0xb2   :  { %p6459_p2 = pnand %p6457_p1, %p6454_p0 }
  0xb4   :  { %6462 = shalt.err (!%p6459_p2)
}
  0xb5   :  { %s6463_s22 = scalar_lea.vmem %s221_s6, 16  ;;  %s6467_s24 = scalar_lea.vmem %s221_s6, 32 }
  0xb6   :  { %p6464_p3 = scmp.ne.s32.totalorder %s221_s6, %s6463_s22  ;;  %p6468_p4 = scmp.lt.s32.totalorder %s221_s6, %s221_s6 }
  0xb7   :  { %p6469_p5 = scmp.lt.s32.totalorder %s6467_s24, %s6463_s22 }
  0xb9   :  { %p6470_p6 = por %p6469_p5, %p6468_p4 }
  0xbb   :  { %p6471_p7 = pnand %p6470_p6, %p6464_p3 }
  0xbd   :  { %6474 = shalt.err (!%p6471_p7)
}
  0xbe   :  { %223 = dma.hbm_to_vmem [thread:$0]  %s8604_s15, 16, %s221_s6, [#allocation27]  }
  0xbf   :  { %s6911_s7 = smov [#allocation29]   ;;  %s6912_s8 = smov [#allocation32]  }
  0xc0   :  { %s240_s25 = sshll.u32 %s6911_s7, 4  ;;  %s262_s11 = sshll.u32 %s6912_s8, 4  ;;  %s241_s25 = int_to_ptr.vmem [resolvable:$true] %s240_s25  ;;  %s263_s11 = int_to_ptr.vmem [resolvable:$true] %s262_s11 }
  0xc1   :  { %s6475_s29 = scalar_lea.hbm %s8606_s17, 2048 }
  0xc2   :  { %p6476_p8 = scmp.ne.s32.totalorder %s8606_s17, %s6475_s29  ;;  %p6479_p9 = scmp.lt.u32.totalorder %s6475_s29, %s8606_s17 }
  0xc4   :  { %p6481_p10 = pnand %p6479_p9, %p6476_p8 }
  0xc6   :  { %6484 = shalt.err (!%p6481_p10)
}
  0xc7   :  { %s6485_s15 = scalar_lea.vmem %s241_s25, 2048  ;;  %p6490_p12 = scmp.lt.s32.totalorder %s241_s25, %s241_s25 }
  0xc8   :  { %p6486_p11 = scmp.ne.s32.totalorder %s241_s25, %s6485_s15  ;;  %p6491_p13 = scmp.lt.s32.totalorder %s6485_s15, %s6485_s15 }
  0xca   :  { %p6492_p0 = por %p6491_p13, %p6490_p12 }
  0xcc   :  { %p6493_p1 = pnand %p6492_p0, %p6486_p11 }
  0xce   :  { %6496 = shalt.err (!%p6493_p1)
}
  0xcf   :  { %243 = dma.hbm_to_vmem [thread:$0]  %s8606_s17, 2048, %s241_s25, [#allocation30]  }
  0xd0   :  { %s6497_s24 = scalar_lea.hbm %s8608_s19, 256 }
  0xd1   :  { %p6498_p2 = scmp.ne.s32.totalorder %s8608_s19, %s6497_s24  ;;  %p6501_p3 = scmp.lt.u32.totalorder %s6497_s24, %s8608_s19 }
  0xd3   :  { %p6503_p4 = pnand %p6501_p3, %p6498_p2 }
  0xd5   :  { %6506 = shalt.err (!%p6503_p4)
}
  0xd6   :  { %s6507_s4 = scalar_lea.vmem %s263_s11, 256  ;;  %p6512_p6 = scmp.lt.s32.totalorder %s263_s11, %s263_s11 }
  0xd7   :  { %p6508_p5 = scmp.ne.s32.totalorder %s263_s11, %s6507_s4  ;;  %p6513_p7 = scmp.lt.s32.totalorder %s6507_s4, %s6507_s4 }
  0xd9   :  { %p6514_p8 = por %p6513_p7, %p6512_p6 }
  0xdb   :  { %p6515_p9 = pnand %p6514_p8, %p6508_p5 }
  0xdd   :  { %6518 = shalt.err (!%p6515_p9)
}
  0xde   :  { %265 = dma.hbm_to_vmem [thread:$0]  %s8608_s19, 256, %s263_s11, [#allocation33]  }
  0xdf   :  { %s6913_s28 = smov [#allocation35]   ;;  %s6914_s5 = smov [#allocation38]  }
  0xe0   :  { %s284_s29 = sshll.u32 %s6913_s28, 4  ;;  %s304_s2 = sshll.u32 %s6914_s5, 4  ;;  %s285_s29 = int_to_ptr.vmem [resolvable:$true] %s284_s29  ;;  %s305_s2 = int_to_ptr.vmem [resolvable:$true] %s304_s2 }
  0xe1   :  { %s6519_s15 = scalar_lea.hbm %s8610_s21, 128 }
  0xe2   :  { %p6520_p10 = scmp.ne.s32.totalorder %s8610_s21, %s6519_s15  ;;  %p6523_p11 = scmp.lt.u32.totalorder %s6519_s15, %s8610_s21 }
  0xe4   :  { %p6525_p12 = pnand %p6523_p11, %p6520_p10 }
  0xe6   :  { %6528 = shalt.err (!%p6525_p12)
}
  0xe7   :  { %s6529_s19 = scalar_lea.vmem %s285_s29, 128  ;;  %p6534_p0 = scmp.lt.s32.totalorder %s285_s29, %s285_s29 }
  0xe8   :  { %p6530_p13 = scmp.ne.s32.totalorder %s285_s29, %s6529_s19  ;;  %p6535_p1 = scmp.lt.s32.totalorder %s6529_s19, %s6529_s19 }
  0xea   :  { %p6536_p2 = por %p6535_p1, %p6534_p0 }
  0xec   :  { %p6537_p3 = pnand %p6536_p2, %p6530_p13 }
  0xee   :  { %6540 = shalt.err (!%p6537_p3)
}
  0xef   :  { %287 = dma.hbm_to_vmem [thread:$0]  %s8610_s21, 128, %s285_s29, [#allocation36]  }
  0xf0   :  { %s6541_s7 = scalar_lea.hbm %s8612_s23, 16 }
  0xf1   :  { %p6542_p4 = scmp.ne.s32.totalorder %s8612_s23, %s6541_s7  ;;  %p6545_p5 = scmp.lt.u32.totalorder %s6541_s7, %s8612_s23 }
  0xf3   :  { %p6547_p6 = pnand %p6545_p5, %p6542_p4 }
  0xf5   :  { %6550 = shalt.err (!%p6547_p6)
}
  0xf6   :  { %s6551_s28 = scalar_lea.vmem %s305_s2, 16  ;;  %s6555_s5 = scalar_lea.vmem %s305_s2, 32 }
  0xf7   :  { %p6552_p7 = scmp.ne.s32.totalorder %s305_s2, %s6551_s28  ;;  %p6556_p8 = scmp.lt.s32.totalorder %s305_s2, %s305_s2 }
  0xf8   :  { %p6557_p9 = scmp.lt.s32.totalorder %s6555_s5, %s6551_s28 }
  0xfa   :  { %p6558_p10 = por %p6557_p9, %p6556_p8 }
  0xfc   :  { %p6559_p11 = pnand %p6558_p10, %p6552_p7 }
  0xfe   :  { %6562 = shalt.err (!%p6559_p11)
}
  0xff   :  { %307 = dma.hbm_to_vmem [thread:$0]  %s8612_s23, 16, %s305_s2, [#allocation39]  }
 0x100   :  { %s6915_s30 = smov [#allocation2]   ;;  %s6916_s15 = smov [#allocation7]  }
 0x101   :  { %s49_s0 = sshll.u32 %s6915_s30, 4  ;;  %s73_s6 = sshll.u32 %s6916_s15, 4  ;;  %s50_s0 = int_to_ptr.vmem [resolvable:$true] %s49_s0  ;;  %s7240_s6 = int_to_ptr.vmem [resolvable:$true] %s73_s6 }
 0x102   :  { %s8727_s22 = sld [smem:[#allocation146_spill]] }
 0x108   :  { %s6563_s19 = scalar_lea.hbm %s8727_s22, 256 }
 0x109   :  { %p6564_p12 = scmp.ne.s32.totalorder %s8727_s22, %s6563_s19  ;;  %p6567_p13 = scmp.lt.u32.totalorder %s6563_s19, %s8727_s22 }
 0x10b   :  { %p6569_p0 = pnand %p6567_p13, %p6564_p12 }
 0x10d   :  { %6572 = shalt.err (!%p6569_p0)
}
 0x10e   :  { %s6573_s23 = scalar_lea.vmem %s50_s0, 256  ;;  %p6578_p2 = scmp.lt.s32.totalorder %s50_s0, %s50_s0 }
 0x10f   :  { %p6574_p1 = scmp.ne.s32.totalorder %s50_s0, %s6573_s23  ;;  %p6579_p3 = scmp.lt.s32.totalorder %s6573_s23, %s6573_s23 }
 0x111   :  { %p6580_p4 = por %p6579_p3, %p6578_p2 }
 0x113   :  { %p6581_p5 = pnand %p6580_p4, %p6574_p1 }
 0x115   :  { %6584 = shalt.err (!%p6581_p5)
}
 0x116   :  { %55 = dma.hbm_to_vmem [thread:$0]  %s8727_s22, 256, %s50_s0, [#allocation3], %s8725_s9, %s8725_s9, %s8724_s3  }
 0x117   :  { %s8728_s17 = sld [smem:[#allocation148_spill]] }
 0x11d   :  { %s6585_s25 = scalar_lea.hbm %s8728_s17, 128 }
 0x11e   :  { %p6586_p6 = scmp.ne.s32.totalorder %s8728_s17, %s6585_s25  ;;  %p6589_p7 = scmp.lt.u32.totalorder %s6585_s25, %s8728_s17 }
 0x120   :  { %p6591_p8 = pnand %p6589_p7, %p6586_p6 }
 0x122   :  { %6594 = shalt.err (!%p6591_p8)
}
 0x123   :  { %s6595_s30 = scalar_lea.vmem %s7240_s6, 128  ;;  %p6600_p10 = scmp.lt.s32.totalorder %s7240_s6, %s7240_s6 }
 0x124   :  { %p6596_p9 = scmp.ne.s32.totalorder %s7240_s6, %s6595_s30  ;;  %p6601_p11 = scmp.lt.s32.totalorder %s6595_s30, %s6595_s30 }
 0x126   :  { %p6602_p12 = por %p6601_p11, %p6600_p10 }
 0x128   :  { %p6603_p13 = pnand %p6602_p12, %p6596_p9 }
 0x12a   :  { %6606 = shalt.err (!%p6603_p13)
}
 0x12b   :  { %s8729_s0 = smov 4   ;;  %s8730_s15 = smov 64  }
 0x12c   :  { %79 = dma.hbm_to_vmem [thread:$0]  %s8728_s17, 128, %s7240_s6, [#allocation6], %s8730_s15, %s8730_s15, %s8729_s0  }
 0x12d   :  { %s6917_s22 = smov [#allocation10]   ;;  %s6918_s11 = smov [#allocation13]  }
 0x12e   :  { %s96_s19 = sshll.u32 %s6917_s22, 4  ;;  %s117_s24 = sshll.u32 %s6918_s11, 4  ;;  %s97_s19 = int_to_ptr.vmem [resolvable:$true] %s96_s19  ;;  %s7277_s24 = int_to_ptr.vmem [resolvable:$true] %s117_s24 }
 0x12f   :  { %s8731_s23 = sld [smem:[#allocation150_spill]] }
 0x135   :  { %s6607_s2 = scalar_lea.hbm %s8731_s23, 16 }
 0x136   :  { %p6608_p0 = scmp.ne.s32.totalorder %s8731_s23, %s6607_s2  ;;  %p6611_p1 = scmp.lt.u32.totalorder %s6607_s2, %s8731_s23 }
 0x138   :  { %p6613_p2 = pnand %p6611_p1, %p6608_p0 }
 0x13a   :  { %6616 = shalt.err (!%p6613_p2)
}
 0x13b   :  { %s6617_s6 = scalar_lea.vmem %s97_s19, 16  ;;  %s6621_s17 = scalar_lea.vmem %s97_s19, 32 }
 0x13c   :  { %p6618_p3 = scmp.ne.s32.totalorder %s97_s19, %s6617_s6  ;;  %p6622_p4 = scmp.lt.s32.totalorder %s97_s19, %s97_s19 }
 0x13d   :  { %p6623_p5 = scmp.lt.s32.totalorder %s6621_s17, %s6617_s6 }
 0x13f   :  { %p6624_p6 = por %p6623_p5, %p6622_p4 }
 0x141   :  { %p6625_p7 = pnand %p6624_p6, %p6618_p3 }
 0x143   :  { %6628 = shalt.err (!%p6625_p7)
}
 0x144   :  { %99 = dma.hbm_to_vmem [thread:$0]  %s8731_s23, 16, %s97_s19, [#allocation9]  }
 0x145   :  { %s8732_s30 = sld [smem:[#allocation152_spill]] }
 0x14b   :  { %s6629_s1 = scalar_lea.hbm %s8732_s30, 256 }
 0x14c   :  { %p6630_p8 = scmp.ne.s32.totalorder %s8732_s30, %s6629_s1  ;;  %p6633_p9 = scmp.lt.u32.totalorder %s6629_s1, %s8732_s30 }
 0x14e   :  { %p6635_p10 = pnand %p6633_p9, %p6630_p8 }
 0x150   :  { %6638 = shalt.err (!%p6635_p10)
}
 0x151   :  { %s6639_s27 = scalar_lea.vmem %s7277_s24, 256  ;;  %p6644_p12 = scmp.lt.s32.totalorder %s7277_s24, %s7277_s24 }
 0x152   :  { %p6640_p11 = scmp.ne.s32.totalorder %s7277_s24, %s6639_s27  ;;  %p6645_p13 = scmp.lt.s32.totalorder %s6639_s27, %s6639_s27 }
 0x154   :  { %p6646_p0 = por %p6645_p13, %p6644_p12 }
 0x156   :  { %p6647_p1 = pnand %p6646_p0, %p6640_p11 }
 0x158   :  { %6650 = shalt.err (!%p6647_p1)
}
 0x159   :  { %123 = dma.hbm_to_vmem [thread:$0]  %s8732_s30, 256, %s7277_s24, [#allocation12], %s8725_s9, %s8725_s9, %s8724_s3  }
 0x15a   :  { %s6919_s2 = smov [#allocation16]   ;;  %s6920_s8 = smov [#allocation19]  }
 0x15b   :  { %s141_s7 = sshll.u32 %s6919_s2, 4  ;;  %s165_s4 = sshll.u32 %s6920_s8, 4  ;;  %s142_s7 = int_to_ptr.vmem [resolvable:$true] %s141_s7  ;;  %s7311_s4 = int_to_ptr.vmem [resolvable:$true] %s165_s4 }
 0x15c   :  { %s8733_s17 = sld [smem:[#allocation154_spill]] }
 0x162   :  { %s6651_s28 = scalar_lea.hbm %s8733_s17, 512 }
 0x163   :  { %p6652_p2 = scmp.ne.s32.totalorder %s8733_s17, %s6651_s28  ;;  %p6655_p3 = scmp.lt.u32.totalorder %s6651_s28, %s8733_s17 }
 0x165   :  { %p6657_p4 = pnand %p6655_p3, %p6652_p2 }
 0x167   :  { %6660 = shalt.err (!%p6657_p4)
}
 0x168   :  { %s6661_s24 = scalar_lea.vmem %s142_s7, 512  ;;  %p6666_p6 = scmp.lt.s32.totalorder %s142_s7, %s142_s7 }
 0x169   :  { %p6662_p5 = scmp.ne.s32.totalorder %s142_s7, %s6661_s24  ;;  %p6667_p7 = scmp.lt.s32.totalorder %s6661_s24, %s6661_s24 }
 0x16b   :  { %p6668_p8 = por %p6667_p7, %p6666_p6 }
 0x16d   :  { %p6669_p9 = pnand %p6668_p8, %p6662_p5 }
 0x16f   :  { %6672 = shalt.err (!%p6669_p9)
}
 0x170   :  { %147 = dma.hbm_to_vmem [thread:$0]  %s8733_s17, 512, %s142_s7, [#allocation15], %s8725_s9, %s8725_s9, %s8724_s3  }
 0x171   :  { %s6673_s13 = scalar_lea.hbm %s8599_s10, 256 }
 0x172   :  { %p6674_p10 = scmp.ne.s32.totalorder %s8599_s10, %s6673_s13  ;;  %p6677_p11 = scmp.lt.u32.totalorder %s6673_s13, %s8599_s10 }
 0x174   :  { %p6679_p12 = pnand %p6677_p11, %p6674_p10 }
 0x176   :  { %6682 = shalt.err (!%p6679_p12)
}
 0x177   :  { %s6683_s8 = scalar_lea.vmem %s7311_s4, 256  ;;  %p6688_p0 = scmp.lt.s32.totalorder %s7311_s4, %s7311_s4 }
 0x178   :  { %p6684_p13 = scmp.ne.s32.totalorder %s7311_s4, %s6683_s8  ;;  %p6689_p1 = scmp.lt.s32.totalorder %s6683_s8, %s6683_s8 }
 0x17a   :  { %p6690_p2 = por %p6689_p1, %p6688_p0 }
 0x17c   :  { %p6691_p3 = pnand %p6690_p2, %p6684_p13 }
 0x17e   :  { %6694 = shalt.err (!%p6691_p3)
}
 0x17f   :  { %171 = dma.hbm_to_vmem [thread:$0]  %s8599_s10, 256, %s7311_s4, [#allocation18], %s8730_s15, %s8730_s15, %s8729_s0  }
 0x180   :  { %s6921_s7 = smov [#allocation22]   ;;  %s6922_s6 = smov [#allocation25]  }
 0x181   :  { %s188_s25 = sshll.u32 %s6921_s7, 4  ;;  %s210_s17 = sshll.u32 %s6922_s6, 4  ;;  %s189_s25 = int_to_ptr.vmem [resolvable:$true] %s188_s25  ;;  %s211_s17 = int_to_ptr.vmem [resolvable:$true] %s210_s17 }
 0x182   :  { %s6695_s21 = scalar_lea.hbm %s8601_s12, 16 }
 0x183   :  { %p6696_p4 = scmp.ne.s32.totalorder %s8601_s12, %s6695_s21  ;;  %p6699_p5 = scmp.lt.u32.totalorder %s6695_s21, %s8601_s12 }
 0x185   :  { %p6701_p6 = pnand %p6699_p5, %p6696_p4 }
 0x187   :  { %6704 = shalt.err (!%p6701_p6)
}
 0x188   :  { %s6705_s10 = scalar_lea.vmem %s189_s25, 16  ;;  %s6709_s4 = scalar_lea.vmem %s189_s25, 32 }
 0x189   :  { %p6706_p7 = scmp.ne.s32.totalorder %s189_s25, %s6705_s10  ;;  %p6710_p8 = scmp.lt.s32.totalorder %s189_s25, %s189_s25 }
 0x18a   :  { %p6711_p9 = scmp.lt.s32.totalorder %s6709_s4, %s6705_s10 }
 0x18c   :  { %p6712_p10 = por %p6711_p9, %p6710_p8 }
 0x18e   :  { %p6713_p11 = pnand %p6712_p10, %p6706_p7 }
 0x190   :  { %6716 = shalt.err (!%p6713_p11)
}
 0x191   :  { %191 = dma.hbm_to_vmem [thread:$0]  %s8601_s12, 16, %s189_s25, [#allocation21]  }
 0x192   :  { %s6717_s27 = scalar_lea.hbm %s8603_s14, 16 }
 0x193   :  { %p6718_p12 = scmp.ne.s32.totalorder %s8603_s14, %s6717_s27  ;;  %p6721_p13 = scmp.lt.u32.totalorder %s6717_s27, %s8603_s14 }
 0x195   :  { %p6723_p0 = pnand %p6721_p13, %p6718_p12 }
 0x197   :  { %6726 = shalt.err (!%p6723_p0)
}
 0x198   :  { %s6727_s3 = scalar_lea.vmem %s211_s17, 16  ;;  %s6731_s9 = scalar_lea.vmem %s211_s17, 32 }
 0x199   :  { %p6728_p1 = scmp.ne.s32.totalorder %s211_s17, %s6727_s3  ;;  %p6732_p2 = scmp.lt.s32.totalorder %s211_s17, %s211_s17 }
 0x19a   :  { %p6733_p3 = scmp.lt.s32.totalorder %s6731_s9, %s6727_s3 }
 0x19c   :  { %p6734_p4 = por %p6733_p3, %p6732_p2 }
 0x19e   :  { %p6735_p5 = pnand %p6734_p4, %p6728_p1 }
 0x1a0   :  { %6738 = shalt.err (!%p6735_p5)
}
 0x1a1   :  { %213 = dma.hbm_to_vmem [thread:$0]  %s8603_s14, 16, %s211_s17, [#allocation24]  }
 0x1a2   :  { %s6923_s25 = smov [#allocation28]   ;;  %s6924_s28 = smov [#allocation31]  }
 0x1a3   :  { %s230_s6 = sshll.u32 %s6923_s25, 4  ;;  %s249_s5 = sshll.u32 %s6924_s28, 4  ;;  %s231_s6 = int_to_ptr.vmem [resolvable:$true] %s230_s6  ;;  %s7372_s5 = int_to_ptr.vmem [resolvable:$true] %s249_s5 }
 0x1a4   :  { %s6739_s1 = scalar_lea.hbm %s8605_s16, 16 }
 0x1a5   :  { %p6740_p6 = scmp.ne.s32.totalorder %s8605_s16, %s6739_s1  ;;  %p6743_p7 = scmp.lt.u32.totalorder %s6739_s1, %s8605_s16 }
 0x1a7   :  { %p6745_p8 = pnand %p6743_p7, %p6740_p6 }
 0x1a9   :  { %6748 = shalt.err (!%p6745_p8)
}
 0x1aa   :  { %s6749_s14 = scalar_lea.vmem %s231_s6, 16  ;;  %s6753_s17 = scalar_lea.vmem %s231_s6, 32 }
 0x1ab   :  { %p6750_p9 = scmp.ne.s32.totalorder %s231_s6, %s6749_s14  ;;  %p6754_p10 = scmp.lt.s32.totalorder %s231_s6, %s231_s6 }
 0x1ac   :  { %p6755_p11 = scmp.lt.s32.totalorder %s6753_s17, %s6749_s14 }
 0x1ae   :  { %p6756_p12 = por %p6755_p11, %p6754_p10 }
 0x1b0   :  { %p6757_p13 = pnand %p6756_p12, %p6750_p9 }
 0x1b2   :  { %6760 = shalt.err (!%p6757_p13)
}
 0x1b3   :  { %233 = dma.hbm_to_vmem [thread:$0]  %s8605_s16, 16, %s231_s6, [#allocation27]  }
 0x1b4   :  { %s6761_s27 = scalar_lea.hbm %s8607_s18, 8192 }
 0x1b5   :  { %p6762_p0 = scmp.ne.s32.totalorder %s8607_s18, %s6761_s27  ;;  %p6765_p1 = scmp.lt.u32.totalorder %s6761_s27, %s8607_s18 }
 0x1b7   :  { %p6767_p2 = pnand %p6765_p1, %p6762_p0 }
 0x1b9   :  { %6770 = shalt.err (!%p6767_p2)
}
 0x1ba   :  { %s6771_s3 = scalar_lea.vmem %s7372_s5, 8192  ;;  %p6776_p4 = scmp.lt.s32.totalorder %s7372_s5, %s7372_s5 }
 0x1bb   :  { %p6772_p3 = scmp.ne.s32.totalorder %s7372_s5, %s6771_s3  ;;  %p6777_p5 = scmp.lt.s32.totalorder %s6771_s3, %s6771_s3 }
 0x1bd   :  { %p6778_p6 = por %p6777_p5, %p6776_p4 }
 0x1bf   :  { %p6779_p7 = pnand %p6778_p6, %p6772_p3 }
 0x1c1   :  { %6782 = shalt.err (!%p6779_p7)
}
 0x1c2   :  { %s6925_s16 = smov 1024   ;;  %s6926_s7 = smov [#allocation34]  }
 0x1c3   :  { %255 = dma.hbm_to_vmem [thread:$0]  %s8607_s18, 8192, %s7372_s5, [#allocation30], %s6925_s16, %s6925_s16, %s8730_s15  }
 0x1c4   :  { %s271_s25 = sshll.u32 %s6926_s7, 4  ;;  %s6927_s6 = smov [#allocation37]   ;;  %s272_s25 = int_to_ptr.vmem [resolvable:$true] %s271_s25 }
 0x1c5   :  { %s294_s28 = sshll.u32 %s6927_s6, 4  ;;  %s6783_s1 = scalar_lea.hbm %s8609_s20, 16384  ;;  %s295_s28 = int_to_ptr.vmem [resolvable:$true] %s294_s28 }
 0x1c6   :  { %p6784_p8 = scmp.ne.s32.totalorder %s8609_s20, %s6783_s1  ;;  %p6787_p9 = scmp.lt.u32.totalorder %s6783_s1, %s8609_s20 }
 0x1c8   :  { %p6789_p10 = pnand %p6787_p9, %p6784_p8 }
 0x1ca   :  { %6792 = shalt.err (!%p6789_p10)
}
 0x1cb   :  { %s6793_s18 = scalar_lea.vmem %s272_s25, 16384  ;;  %p6798_p12 = scmp.lt.s32.totalorder %s272_s25, %s272_s25 }
 0x1cc   :  { %p6794_p11 = scmp.ne.s32.totalorder %s272_s25, %s6793_s18  ;;  %p6799_p13 = scmp.lt.s32.totalorder %s6793_s18, %s6793_s18 }
 0x1ce   :  { %p6800_p0 = por %p6799_p13, %p6798_p12 }
 0x1d0   :  { %p6801_p1 = pnand %p6800_p0, %p6794_p11 }
 0x1d2   :  { %6804 = shalt.err (!%p6801_p1)
}
 0x1d3   :  { %277 = dma.hbm_to_vmem [thread:$0]  %s8609_s20, 16384, %s272_s25, [#allocation33], %s8730_s15, %s8730_s15, %s8729_s0  }
 0x1d4   :  { %s8734_s22 = sld [smem:[#allocation156_spill]] }
 0x1da   :  { %s6805_s11 = scalar_lea.hbm %s8734_s22, 16 }
 0x1db   :  { %p6806_p2 = scmp.ne.s32.totalorder %s8734_s22, %s6805_s11  ;;  %p6809_p3 = scmp.lt.u32.totalorder %s6805_s11, %s8734_s22 }
 0x1dd   :  { %p6811_p4 = pnand %p6809_p3, %p6806_p2 }
 0x1df   :  { %6814 = shalt.err (!%p6811_p4)
}
 0x1e0   :  { %s6815_s2 = scalar_lea.vmem %s295_s28, 16  ;;  %s6819_s8 = scalar_lea.vmem %s295_s28, 32 }
 0x1e1   :  { %p6816_p5 = scmp.ne.s32.totalorder %s295_s28, %s6815_s2  ;;  %p6820_p6 = scmp.lt.s32.totalorder %s295_s28, %s295_s28 }
 0x1e2   :  { %p6821_p7 = scmp.lt.s32.totalorder %s6819_s8, %s6815_s2 }
 0x1e4   :  { %p6822_p8 = por %p6821_p7, %p6820_p6 }
 0x1e6   :  { %p6823_p9 = pnand %p6822_p8, %p6816_p5 }
 0x1e8   :  { %6826 = shalt.err (!%p6823_p9)
}
 0x1e9   :  { %297 = dma.hbm_to_vmem [thread:$0]  %s8734_s22, 16, %s295_s28, [#allocation36]  }
 0x1ea   :  { %s6928_s3 = smov [#allocation40]   ;;  %s8735_s7 = sld [smem:[#allocation157_spill]] }
 0x1eb   :  { %s314_s16 = sshll.u32 %s6928_s3, 4  ;;  %s315_s16 = int_to_ptr.vmem [resolvable:$true] %s314_s16 }
 0x1f0   :  { %s6827_s25 = scalar_lea.hbm %s8735_s7, 32 }
 0x1f1   :  { %p6828_p10 = scmp.ne.s32.totalorder %s8735_s7, %s6827_s25  ;;  %p6831_p11 = scmp.lt.u32.totalorder %s6827_s25, %s8735_s7 }
 0x1f3   :  { %p6833_p12 = pnand %p6831_p11, %p6828_p10 }
 0x1f5   :  { %6836 = shalt.err (!%p6833_p12)
}
 0x1f6   :  { %s6837_s24 = scalar_lea.vmem %s315_s16, 32  ;;  %p6842_p0 = scmp.lt.s32.totalorder %s315_s16, %s315_s16 }
 0x1f7   :  { %p6838_p13 = scmp.ne.s32.totalorder %s315_s16, %s6837_s24  ;;  %p6843_p1 = scmp.lt.s32.totalorder %s6837_s24, %s6837_s24 }
 0x1f9   :  { %p6844_p2 = por %p6843_p1, %p6842_p0 }
 0x1fb   :  { %p6845_p3 = pnand %p6844_p2, %p6838_p13 }
 0x1fd   :  { %6848 = shalt.err (!%p6845_p3)
}
 0x1fe   :  { %317 = dma.hbm_to_vmem [thread:$0]  %s8735_s7, 32, %s315_s16, [#allocation39]  }
 0x1ff   :  { %6871 = dma.done.wait [#allocation3], 256  }
 0x200   :  { %6872 = vsyncadd [#allocation3], 4294967040 }
 0x201   :  { %6873 = dma.done.wait [#allocation6], 1152  }
 0x202   :  { %6874 = vsyncadd [#allocation6], 4294966144 }
 0x203   :  { %6875 = dma.done.wait [#allocation9], 32  }
 0x204   :  { %6876 = vsyncadd [#allocation9], 4294967264 }
 0x205   :  { %6877 = dma.done.wait [#allocation12], 768  }
 0x206   :  { %6878 = vsyncadd [#allocation12], 4294966528 }
 0x207   :  { %6879 = dma.done.wait [#allocation15], 768  }
 0x208   :  { %6880 = vsyncadd [#allocation15], 4294966528 }
 0x209   :  { %6881 = dma.done.wait [#allocation18], 512  }
 0x20a   :  { %6882 = vsyncadd [#allocation18], 4294966784 }
 0x20b   :  { %6883 = dma.done.wait [#allocation21], 32  }
 0x20c   :  { %6884 = vsyncadd [#allocation21], 4294967264 }
 0x20d   :  { %6885 = dma.done.wait [#allocation24], 1040  }
 0x20e   :  { %6886 = vsyncadd [#allocation24], 4294966256 }
 0x20f   :  { %6887 = dma.done.wait [#allocation27], 32  }
 0x210   :  { %6888 = vsyncadd [#allocation27], 4294967264 }
 0x211   :  { %6889 = dma.done.wait [#allocation30], 10240  }
 0x212   :  { %6890 = vsyncadd [#allocation30], 4294957056 }
 0x213   :  { %6891 = dma.done.wait [#allocation33], 16640  }
 0x214   :  { %6892 = vsyncadd [#allocation33], 4294950656 }
 0x215   :  { %6893 = dma.done.wait [#allocation36], 144  }
 0x216   :  { %6894 = vsyncadd [#allocation36], 4294967152 }
 0x217   :  { %6895 = dma.done.wait [#allocation39], 48  }
 0x218   :  { %6896 = vsyncadd [#allocation39], 4294967248  ;;  %v6929_v0 = vmov 0   ;;  %v394_v1 = vld [vmem:[#allocation2] sm:$0xff]  ;;  %v410_v2 = vld [vmem:[#allocation5] sm:$0xff]  ;;  %v8639_v10 = vmov 0.0   ;;  %v396_v16 = vlaneseq }
 0x219   :  { %5993 = vset.pattern.permute.xlu0 %v6929_v0  ;;  %v411_v3 = vld [vmem:[#allocation5 + $0x8] sm:$0xff]  ;;  %v412_v4 = vld [vmem:[#allocation5 + $0x10] sm:$0xff]  ;;  %v413_v5 = vld [vmem:[#allocation5 + $0x18] sm:$0xff]  ;;  %5802 = vmatprep.subr.bf16.mxu1 %v8639_v10  ;;  %vm418_vm0 = vcmask 523264   ;;  %vm6931_vm3 = vmmov 0   ;;  %vm509_vm4 = vcmask 130048  }
 0x21a   :  { %399 = vperm.xlu0 %5993, %v394_v1   ;;  %v395_v6 = vld [vmem:[#allocation2 + $0x8] sm:$0xff]  ;;  %v5895_v7 = vpack.c.bf16 %v411_v3, %v410_v2  ;;  %v5899_v8 = vpack.c.bf16 %v413_v5, %v412_v4  ;;  %v414_v9 = vld [vmem:[#allocation5 + $0x20] sm:$0xff]  ;;  %v415_v11 = vld [vmem:[#allocation5 + $0x28] sm:$0xff]  ;;  %v397_v17 = vand.u32 127, %v396_v16  ;;  %5804 = vmatprep.mubr.msk.bf16.mxu1 %vm6931_vm3, %v8639_v10  ;;  %vm686_vm5 = vcmask 261120   ;;  %s6932_s10 = smov 96  }
 0x21b   :  { %v416_v12 = vld [vmem:[#allocation5 + $0x30] sm:$0xff]  ;;  %v417_v13 = vld [vmem:[#allocation5 + $0x38] sm:$0xff]  ;;  %v5903_v14 = vpack.c.bf16 %v415_v11, %v414_v9  ;;  %v6004_v22 = vld [vmem:[#allocation7] sm:$0xff]   ;;  %s6933_s4 = smov 32   ;;  %vm1286_vm7 = vcmask 64512  }
 0x21c   :  { %5896 = vmatprep.subr.bf16.mxu0 %v5895_v7  ;;  %v5907_v15 = vpack.c.bf16 %v417_v13, %v416_v12  ;;  %5803 = vmatpush3.bf16.msra.mxu1 %v6004_v22  ;;  %v6005_v42 = vld [vmem:[#allocation11] sm:$0xff]   ;;  %v6006_v43 = vld [vmem:[#allocation11 + $0x8] sm:$0xff]   ;;  %v6007_v44 = vld [vmem:[#allocation11 + $0x10] sm:$0xff]  }
 0x21d   :  { %5898 = vmatpush3.bf16.msra.mxu0 %v5895_v7  ;;  %5808 = vmatprep.subr.bf16.mxu1 %v8639_v10  ;;  %v6008_v45 = vld [vmem:[#allocation11 + $0x18] sm:$0xff]   ;;  %v680_v46 = vld [vmem:[#allocation16] sm:$0xff]  ;;  %v681_v47 = vld [vmem:[#allocation16 + $0x8] sm:$0xff] }
 0x21e   :  { %402 = vperm.xlu0 %5993, %v395_v6   ;;  %5900 = vmatprep.subr.bf16.mxu0 %v5899_v8  ;;  %v682_v48 = vld [vmem:[#allocation16 + $0x10] sm:$0xff]  ;;  %v5911_v49 = vpack.c.bf16 %v681_v47, %v680_v46  ;;  %v683_v50 = vld [vmem:[#allocation16 + $0x18] sm:$0xff]  ;;  %v676_v6 = vld [vmem:[#allocation13] sm:$0xff] }
 0x21f   :  { %v5915_v51 = vpack.c.bf16 %v683_v50, %v682_v48  ;;  %v5303_v60 = vld [vmem:[#allocation8] ss:$0 sm:$0xff]  ;;  %v5304_v1 = vld [vmem:[#allocation10] ss:$0 sm:$0xff]  ;;  %vm5928_vm6 = vmpackc.low %vm686_vm5, %vm686_vm5 }
 0x220   :  { %v971_v47 = vld [vmem:[#allocation17 + $0x8] sm:$0xff]  ;;  %v970_v50 = vld [vmem:[#allocation17] sm:$0xff] }
 0x221   :  { %5902 = vmatpush3.bf16.msra.mxu0 %v5899_v8  ;;  %v677_v8 = vld [vmem:[#allocation13 + $0x8] sm:$0xff] }
 0x222   :  { %5904 = vmatprep.subr.bf16.mxu0 %v5903_v14 }
 0x225   :  { %5906 = vmatpush3.bf16.msra.mxu0 %v5903_v14 }
 0x226   :  { %5908 = vmatprep.subr.bf16.mxu0 %v5907_v15 }
 0x229   :  { %5910 = vmatpush3.bf16.msra.mxu0 %v5907_v15 }
 0x22a   :  { %5912 = vmatprep.subr.bf16.mxu0 %v5911_v49 }
 0x299   :  { %v400_v18 = vpop.permute.xlu0 %399 }
 0x29a   :  { %vm404_vm1 = vcmp.eq.s32.totalorder %v397_v17, %v400_v18 }
 0x29b   :  { %v5297_v19 = vsel %vm404_vm1, 1.0, %v8639_v10 }
 0x29c   :  { %5799 = vmatprep.mubr.msk.f32.mxu0 %vm418_vm0, %v5297_v19  ;;  %v679_v19 = vld [vmem:[#allocation14 + $0x8] sm:$0xff] }
 0x29d   :  { %v403_v20 = vpop.permute.xlu0 %402 }
 0x29e   :  { %vm405_vm2 = vcmp.eq.s32.totalorder %v397_v17, %v403_v20  ;;  %v678_v20 = vld [vmem:[#allocation14] sm:$0xff] }
 0x29f   :  { %v5298_v21 = vsel %vm405_vm2, 1.0, %v8639_v10 }
 0x2a0   :  { %5800 = vmatmul.mubr.msk.f32.vlgmr.msra.gmra.mrb[0].mxu0 %vm418_vm0, %v5298_v21 }
 0x2a1   :  { %5914 = vmatpush3.bf16.msra.mxu0 %v5911_v49 }
 0x2a2   :  { %5916 = vmatprep.subr.bf16.mxu0 %v5915_v51 }
 0x2a5   :  { %5918 = vmatpush3.bf16.msra.mxu0 %v5915_v51 }
 0x373   :  { %v5801_v23 = vpop.f32.mrb[0].mxu0 }
 0x374   :  { %v491_v24 = vpop.f32.mrb[1].mxu0 }
 0x375   :  { %v500_v25 = vpack.c.bf16 %v5801_v23, %v491_v24 }
 0x377   :  { %5805 = vmatmul.mubr.msk.bf16.vlgmr.msra.gmra.mrb[0].mxu1 %vm509_vm4, %v500_v25 }
 0x378   :  { %5816 = vmatprep.mubr.msk.bf16.mxu1 %vm6931_vm3, %v8639_v10  ;;  %5809 = vmatpush3.bf16.msra.mxu1 %v6005_v42 }
 0x379   :  { %5810 = vmatprep.subr.bf16.mxu1 %v8639_v10 }
 0x37c   :  { %5811 = vmatpush3.bf16.msra.mxu1 %v6006_v43 }
 0x37d   :  { %5812 = vmatprep.subr.bf16.mxu1 %v8639_v10 }
 0x380   :  { %5813 = vmatpush3.bf16.msra.mxu1 %v6007_v44 }
 0x381   :  { %5814 = vmatprep.subr.bf16.mxu1 %v8639_v10 }
 0x384   :  { %5815 = vmatpush3.bf16.msra.mxu1 %v6008_v45 }
 0x385   :  { %5920 = vmatprep.subr.bf16.mxu1 %v5911_v49 }
 0x44a   :  { %v7456_v26 = vpop.f32.mrb[0].mxu1 }
 0x44b   :  { %8736 = vst [vmem:[#allocation56_spill] sm:$0xff] %v7456_v26  ;;  %v5806_v27 = vpop.f32.mrb[1].mxu1  ;;  %v556_v28 = vsel %vm418_vm0, %v7456_v26, 0.0 }
 0x44c   :  { %557 = vadd.xlane.f32.xlu1 %v556_v28  ;;  %v7460_v29 = vpop.f32.mrb[2].mxu1 }
 0x44d   :  { %8737 = vst [vmem:[#allocation57_spill] sm:$0xff] %v7460_v29  ;;  %v5807_v30 = vpop.f32.mrb[3].mxu1  ;;  %v559_v31 = vsel %vm418_vm0, %v7460_v29, 0.0 }
 0x450   :  { %560 = vadd.xlane.f32.xlu1 %v559_v31 }
 0x4d9   :  { %v558_v32 = vpop.xlane.xlu1 %557 }
 0x4da   :  { %v563_v33 = vmul.f32 0.015625, %v558_v32 }
 0x4dc   :  { %v565_v34 = vsub.f32 %v7456_v26, %v563_v33 }
 0x4dd   :  { %v561_v35 = vpop.xlane.xlu1 %560 }
 0x4de   :  { %v564_v36 = vmul.f32 0.015625, %v561_v35  ;;  %v567_v37 = vmul.f32 %v565_v34, %v565_v34 }
 0x4e0   :  { %v566_v38 = vsub.f32 %v7460_v29, %v564_v36  ;;  %v569_v39 = vsel %vm418_vm0, %v567_v37, 0.0 }
 0x4e1   :  { %570 = vadd.xlane.f32.xlu0 %v569_v39 }
 0x4e2   :  { %v568_v40 = vmul.f32 %v566_v38, %v566_v38 }
 0x4e4   :  { %v572_v41 = vsel %vm418_vm0, %v568_v40, 0.0 }
 0x4e5   :  { %573 = vadd.xlane.f32.xlu1 %v572_v41 }
 0x56e   :  { %v571_v52 = vpop.xlane.xlu0 %570 }
 0x56f   :  { %v575_v53 = vmul.f32 0.015625, %v571_v52 }
 0x571   :  { %v577_v54 = vadd.f32 1e-05, %v575_v53 }
 0x572   :  { %v574_v55 = vpop.xlane.xlu1 %573 }
 0x573   :  { %6139 = vrsqrt.f32 %v577_v54  ;;  %v576_v56 = vmul.f32 0.015625, %v574_v55 }
 0x575   :  { %v578_v57 = vadd.f32 1e-05, %v576_v56 }
 0x577   :  { %6141 = vrsqrt.f32 %v578_v57 }
 0x57d   :  { %v6140_v58 = vpop.eup %6139 }
 0x57e   :  { %v581_v59 = vmul.f32 %v6140_v58, %v565_v34 }
 0x580   :  { %v589_v62 = vmul.f32 %v5303_v60, %v581_v59 }
 0x581   :  { %v6142_v61 = vpop.eup %6141 }
 0x582   :  { %v582_v63 = vmul.f32 %v6142_v61, %v566_v38  ;;  %v7471_v3 = vadd.f32 %v5304_v1, %v589_v62 }
 0x584   :  { %v590_v2 = vmul.f32 %v5303_v60, %v582_v63 }
 0x586   :  { %v7473_v4 = vadd.f32 %v5304_v1, %v590_v2 }
 0x588   :  { %v599_v5 = vpack.c.bf16 %v7473_v4, %v7471_v3 }
 0x58a   :  { %5817 = vmatmul.mubr.msk.bf16.vlgmr.msra.gmra.mrb[4].mxu1 %vm418_vm0, %v599_v5 }
 0x58b   :  { %5922 = vmatpush3.bf16.msra.mxu1 %v5911_v49 }
 0x58c   :  { %5924 = vmatprep.subr.bf16.mxu1 %v5915_v51 }
 0x58f   :  { %5926 = vmatpush3.bf16.msra.mxu1 %v5915_v51 }
 0x65d   :  { %v7478_v7 = vpop.f32.mrb[4].mxu1 }
 0x65e   :  { %782 = vrot.lane.b32.xlu1 %v7478_v7, %s6932_s10  ;;  %v5818_v9 = vpop.f32.mrb[5].mxu1  ;;  %5828 = vmatprep.mubr.msk.f32.mxu0 %vm686_vm5, %v7478_v7  ;;  %v684_v11 = vmul.f32 %v676_v6, %v7478_v7 }
 0x65f   :  { %v672_v12 = vpop.f32.mrb[6].mxu1  ;;  %v6009_v9 = vld [vmem:[#allocation19] sm:$0xff]  }
 0x660   :  { %v5819_v13 = vpop.f32.mrb[7].mxu1  ;;  %5829 = vmatmul.mubr.msk.f32.vlgmr.msra.gmra.mrb[2].mxu0 %vm686_vm5, %v672_v12  ;;  %v685_v14 = vmul.f32 %v677_v8, %v672_v12  ;;  %v5999_v15 = vpack.i.bf16 %v672_v12, %v7478_v7 }
 0x662   :  { %784 = vrot.lane.b32.xlu1 %v672_v12, %s6932_s10 }
 0x666   :  { %774 = vrot.lane.b32.xlu1 %v676_v6, %s6933_s4 }
 0x66a   :  { %776 = vrot.lane.b32.xlu1 %v677_v8, %s6933_s4 }
 0x6d0   :  { %v783_v17 = vpop.permute.xlu1 %782 }
 0x6d1   :  { %5839 = vmatprep.mubr.msk.f32.mxu1 %vm686_vm5, %v783_v17 }
 0x6d4   :  { %v785_v18 = vpop.permute.xlu1 %784 }
 0x6d5   :  { %5840 = vmatmul.mubr.msk.f32.vlgmr.msra.gmra.mrb[8].mxu1 %vm686_vm5, %v785_v18  ;;  %v6010_v18 = vld [vmem:[#allocation19 + $0x8] sm:$0xff]  }
 0x6d8   :  { %v775_v33 = vpop.permute.xlu1 %774 }
 0x6d9   :  { %v780_v36 = vmul.f32 %v775_v33, %v7478_v7 }
 0x6dc   :  { %v777_v34 = vpop.permute.xlu1 %776 }
 0x6dd   :  { %v781_v35 = vmul.f32 %v777_v34, %v672_v12 }
 0x733   :  { %v5830_v21 = vpop.f32.mrb[2].mxu0 }
 0x734   :  { %v769_v22 = vmul.f32 %v5830_v21, %v679_v19  ;;  %v759_v23 = vpop.f32.mrb[3].mxu0 }
 0x735   :  { %v768_v24 = vmul.f32 %v759_v23, %v678_v20 }
 0x736   :  { %v771_v25 = vadd.f32 %v769_v22, %v685_v14 }
 0x737   :  { %v770_v27 = vadd.f32 %v768_v24, %v684_v11 }
 0x739   :  { %5846 = vmatprep.mubr.msk.f32.mxu0 %vm686_vm5, %v770_v27 }
 0x7a8   :  { %v5841_v28 = vpop.f32.mrb[8].mxu1 }
 0x7a9   :  { %v866_v30 = vmul.f32 %v5841_v28, %v679_v19  ;;  %v856_v31 = vpop.f32.mrb[9].mxu1 }
 0x7aa   :  { %v865_v32 = vmul.f32 %v856_v31, %v678_v20 }
 0x7ab   :  { %871 = vrot.lane.b32.xlu1 %v866_v30, %s6933_s4 }
 0x7ac   :  { %869 = vrot.lane.b32.xlu0 %v865_v32, %s6933_s4 }
 0x81d   :  { %v872_v37 = vpop.permute.xlu1 %871 }
 0x81e   :  { %v876_v38 = vadd.f32 %v872_v37, %v781_v35  ;;  %v870_v39 = vpop.permute.xlu0 %869 }
 0x81f   :  { %v875_v40 = vadd.f32 %v870_v39, %v780_v36 }
 0x821   :  { %v5994_v41 = vpack.i.bf16 %v876_v38, %v875_v40  ;;  %v1188_v40 = vld [vmem:[#allocation23] sm:$0xff] }
 0x823   :  { %5995 = vrot.lane.b32.xlu1 %v5994_v41, %s6932_s10  ;;  %v1189_v41 = vld [vmem:[#allocation23 + $0x8] sm:$0xff] }
 0x895   :  { %v5996_v42 = vpop.permute.xlu1 %5995 }
 0x896   :  { %v5998_v43 = vunpack.i.h.bf16 %v5996_v42  ;;  %v5997_v44 = vunpack.i.l.bf16 %v5996_v42  ;;  %v5937_v42 = vpack.c.bf16 %v1189_v41, %v1188_v40  ;;  %v1386_v40 = vld [vmem:[#allocation31 + $0x108] sm:$0xff] }
 0x898   :  { %v5927_v45 = vpack.c.bf16 %v5998_v43, %v5997_v44  ;;  %v1353_v43 = vld [vmem:[#allocation31] sm:$0xff] }
 0x899   :  { %v1361_v44 = vld [vmem:[#allocation31 + $0x40] sm:$0xff] }
 0x89a   :  { %5929 = vmatprep.subr.msk.bf16.mxu0 %vm5928_vm6, %v5927_v45 }
 0x89b   :  { %5932 = vmatpush3.bf16.xpose.msk.msra.mxu0 %vm5928_vm6, %v5927_v45  ;;  %v5331_v45 = vcombine.high %v1353_v43, %v1361_v44 }
 0x89c   :  { %5856 = vmatprep.subr.bf16.mxu0 %v8639_v10 }
 0x8a2   :  { %5847 = vmatmul.mubr.msk.f32.vlgmr.msra.gmra.mrb[4].mxu0 %vm686_vm5, %v771_v25 }
 0x8a3   :  { %5860 = vmatprep.mubr.msk.bf16.mxu0 %vm6931_vm3, %v8639_v10  ;;  %5857 = vmatpush3.bf16.msra.mxu0 %v6009_v9 }
 0x8a4   :  { %5858 = vmatprep.subr.bf16.mxu0 %v8639_v10 }
 0x8a7   :  { %5859 = vmatpush3.bf16.msra.mxu0 %v6010_v18 }
 0x8a8   :  { %1824 = vmatprep.subr.bf16.mxu0 %v5331_v45 }
 0x975   :  { %v5848_v46 = vpop.f32.mrb[4].mxu0 }
 0x976   :  { %v969_v48 = vmul.f32 5.656854, %v5848_v46  ;;  %v959_v49 = vpop.f32.mrb[5].mxu0  ;;  %v5330_v46 = vcombine.low %v1353_v43, %v1361_v44  ;;  %v1387_v43 = vld [vmem:[#allocation31 + $0x110] sm:$0xff] }
 0x977   :  { %v968_v51 = vmul.f32 5.656854, %v959_v49  ;;  %v1395_v44 = vld [vmem:[#allocation31 + $0x150] sm:$0xff] }
 0x978   :  { %v973_v52 = vadd.f32 %v971_v47, %v969_v48  ;;  %v1190_v47 = vld [vmem:[#allocation23 + $0x10] sm:$0xff]  ;;  %v1191_v48 = vld [vmem:[#allocation23 + $0x18] sm:$0xff] }
 0x979   :  { %v972_v53 = vadd.f32 %v970_v50, %v968_v51  ;;  %v5941_v49 = vpack.c.bf16 %v1191_v48, %v1190_v47  ;;  %v1369_v50 = vld [vmem:[#allocation31 + $0x80] sm:$0xff]  ;;  %v1402_v47 = vld [vmem:[#allocation31 + $0x188] sm:$0xff] }
 0x97a   :  { %v977_v54 = vsel %vm509_vm4, %v973_v52, -inf  ;;  %v1377_v51 = vld [vmem:[#allocation31 + $0xc0] sm:$0xff]  ;;  %v1410_v48 = vld [vmem:[#allocation31 + $0x1c8] sm:$0xff] }
 0x97b   :  { %978 = vmax.xlane.f32.xlu0 %v977_v54  ;;  %v974_v55 = vsel %vm509_vm4, %v972_v53, -inf  ;;  %v1192_v54 = vld [vmem:[#allocation23 + $0x20] sm:$0xff] }
 0x97c   :  { %975 = vmax.xlane.f32.xlu1 %v974_v55  ;;  %v1193_v55 = vld [vmem:[#allocation23 + $0x28] sm:$0xff] }
 0x991   :  { %6000 = vrot.lane.b32.xlu0 %v5999_v15, %s8730_s15  ;;  %s6935_s15 = smov [#allocation41]  }
 0x992   :  { %s5276_s18 = sshll.u32 %s6935_s15, 4  ;;  %s5277_s18 = int_to_ptr.vmem [resolvable:$true] %s5276_s18 }
 0x993   :  { %s6849_s5 = scalar_lea.vmem %s5277_s18, 32  ;;  %p6854_p5 = scmp.lt.s32.totalorder %s5277_s18, %s5277_s18 }
 0x994   :  { %p6850_p4 = scmp.ne.s32.totalorder %s5277_s18, %s6849_s5  ;;  %p6855_p6 = scmp.lt.s32.totalorder %s6849_s5, %s6849_s5 }
 0x996   :  { %p6856_p7 = por %p6855_p6, %p6854_p5 }
 0x998   :  { %p6857_p8 = pnand %p6856_p7, %p6850_p4 }
 0xa08   :  { %v979_v56 = vpop.xlane.xlu0 %978 }
 0xa09   :  { %v981_v57 = vsub.f32 %v973_v52, %v979_v56  ;;  %v976_v58 = vpop.xlane.xlu1 %975  ;;  %v5347_v52 = vcombine.high %v1369_v50, %v1377_v51  ;;  %v5945_v56 = vpack.c.bf16 %v1193_v55, %v1192_v54  ;;  %v5366_v54 = vcombine.low %v1387_v43, %v1395_v44  ;;  %v1356_v55 = vld [vmem:[#allocation31 + $0x18] sm:$0xff] }
 0xa0a   :  { %v980_v59 = vsub.f32 %v972_v53, %v976_v58  ;;  %v5346_v53 = vcombine.low %v1369_v50, %v1377_v51  ;;  %v1393_v58 = vld [vmem:[#allocation31 + $0x140] sm:$0xff]  ;;  %v1403_v51 = vld [vmem:[#allocation31 + $0x190] sm:$0xff] }
 0xa0b   :  { %v984_v60 = vmul.f32 1.442695, %v981_v57  ;;  %v1385_v57 = vld [vmem:[#allocation31 + $0x100] sm:$0xff] }
 0xa0c   :  { %v982_v61 = vmul.f32 1.442695, %v980_v59  ;;  %v6001_v62 = vpop.permute.xlu0 %6000  ;;  %v5363_v59 = vcombine.high %v1385_v57, %v1393_v58 }
 0xa0d   :  { %v6003_v63 = vunpack.i.h.bf16 %v6001_v62  ;;  %v6002_v1 = vunpack.i.l.bf16 %v6001_v62  ;;  %v1195_v62 = vld [vmem:[#allocation23 + $0x38] sm:$0xff] }
 0xa0e   :  { %6143 = vpow2.f32 %v982_v61  ;;  %v1194_v61 = vld [vmem:[#allocation23 + $0x30] sm:$0xff] }
 0xa0f   :  { %v5933_v2 = vpack.c.bf16 %v6003_v63, %v6002_v1  ;;  %6145 = vpow2.f32 %v984_v60  ;;  %v5362_v60 = vcombine.low %v1385_v57, %v1393_v58  ;;  %v5949_v63 = vpack.c.bf16 %v1195_v62, %v1194_v61  ;;  %v1401_v1 = vld [vmem:[#allocation31 + $0x180] sm:$0xff] }
 0xa10   :  { %v5380_v58 = vcombine.low %v1402_v47, %v1410_v48 }
 0xa11   :  { %5934 = vmatprep.subr.bf16.mxu1 %v5933_v2 }
 0xa12   :  { %5936 = vmatpush3.bf16.msra.mxu1 %v5933_v2  ;;  %v1409_v2 = vld [vmem:[#allocation31 + $0x1c0] sm:$0xff] }
 0xa13   :  { %5938 = vmatprep.subr.bf16.mxu1 %v5937_v42 }
 0xa18   :  { %v6144_v5 = vpop.eup %6143 }
 0xa19   :  { %v986_v6 = vsel %vm509_vm4, %v6144_v5, 0.0  ;;  %v6146_v7 = vpop.eup %6145 }
 0xa1a   :  { %987 = vadd.xlane.f32.xlu1 %v986_v6  ;;  %v989_v8 = vsel %vm509_vm4, %v6146_v7, 0.0  ;;  %v5378_v6 = vcombine.low %v1401_v1, %v1409_v2 }
 0xa1e   :  { %990 = vadd.xlane.f32.xlu1 %v989_v8  ;;  %v1362_v8 = vld [vmem:[#allocation31 + $0x48] sm:$0xff] }
 0xaa7   :  { %v988_v11 = vpop.xlane.xlu1 %987 }
 0xaa8   :  { %6147 = vrcp.f32 %v988_v11 }
 0xaab   :  { %v991_v12 = vpop.xlane.xlu1 %990 }
 0xaac   :  { %6149 = vrcp.f32 %v991_v12  ;;  %v1355_v12 = vld [vmem:[#allocation31 + $0x10] sm:$0xff] }
 0xab2   :  { %v6148_v13 = vpop.eup %6147 }
 0xab3   :  { %v993_v14 = vmul.f32 %v6148_v13, %v6144_v5  ;;  %v5379_v5 = vcombine.high %v1401_v1, %v1409_v2  ;;  %v1363_v13 = vld [vmem:[#allocation31 + $0x50] sm:$0xff]  ;;  %v1380_v1 = vld [vmem:[#allocation31 + $0xd8] sm:$0xff] }
 0xab5   :  { %5853 = vmatprep.mubr.msk.f32.mxu1 %vm509_vm4, %v993_v14  ;;  %v5335_v14 = vcombine.high %v1355_v12, %v1363_v13 }
 0xab6   :  { %v6150_v15 = vpop.eup %6149 }
 0xab7   :  { %v995_v17 = vmul.f32 %v6150_v15, %v6146_v7  ;;  %v1354_v7 = vld [vmem:[#allocation31 + $0x8] sm:$0xff]  ;;  %v5334_v15 = vcombine.low %v1355_v12, %v1363_v13  ;;  %v1396_v12 = vld [vmem:[#allocation31 + $0x158] sm:$0xff] }
 0xab8   :  { %v5333_v9 = vcombine.high %v1354_v7, %v1362_v8  ;;  %v5332_v11 = vcombine.low %v1354_v7, %v1362_v8  ;;  %v1381_v7 = vld [vmem:[#allocation31 + $0xe0] sm:$0xff] }
 0xab9   :  { %5854 = vmatmul.mubr.msk.f32.vlgmr.msra.gmra.mrb[10].mxu1 %vm509_vm4, %v995_v17 }
 0xaba   :  { %5940 = vmatpush3.bf16.msra.mxu1 %v5937_v42 }
 0xabb   :  { %5942 = vmatprep.subr.bf16.mxu1 %v5941_v49 }
 0xabe   :  { %5944 = vmatpush3.bf16.msra.mxu1 %v5941_v49  ;;  %v5367_v49 = vcombine.high %v1387_v43, %v1395_v44  ;;  %v1375_v43 = vld [vmem:[#allocation31 + $0xb0] sm:$0xff] }
 0xabf   :  { %5946 = vmatprep.subr.bf16.mxu1 %v5945_v56  ;;  %v1383_v44 = vld [vmem:[#allocation31 + $0xf0] sm:$0xff] }
 0xac2   :  { %5948 = vmatpush3.bf16.msra.mxu1 %v5945_v56  ;;  %v1364_v56 = vld [vmem:[#allocation31 + $0x58] sm:$0xff] }
 0xac3   :  { %5950 = vmatprep.subr.bf16.mxu1 %v5949_v63  ;;  %v5337_v61 = vcombine.high %v1356_v55, %v1364_v56 }
 0xac6   :  { %5952 = vmatpush3.bf16.msra.mxu1 %v5949_v63  ;;  %v1372_v63 = vld [vmem:[#allocation31 + $0x98] sm:$0xff] }
 0xac7   :  { %1867 = vmatprep.subr.bf16.mxu1 %v5333_v9  ;;  %v5353_v8 = vcombine.high %v1372_v63, %v1380_v1 }
 0xb8c   :  { %v5855_v19 = vpop.f32.mrb[10].mxu1 }
 0xb8d   :  { %v1074_v20 = vpop.f32.mrb[11].mxu1 }
 0xb8e   :  { %v1083_v21 = vpack.c.bf16 %v5855_v19, %v1074_v20 }
 0xb90   :  { %5861 = vmatmul.mubr.msk.bf16.vlgmr.msra.gmra.mrb[8].mxu0 %vm686_vm5, %v1083_v21 }
 0xb91   :  { %1856 = vmatprep.mubr.bf16.mxu0 %v6929_v0  ;;  %1825 = vmatpush1.bf16.msra.mxu0 %v5330_v46 }
 0xb92   :  { %1826 = vmatprep.subr.bf16.mxu0 %v5347_v52  ;;  %v1411_v52 = vld [vmem:[#allocation31 + $0x1d0] sm:$0xff] }
 0xb93   :  { %v5383_v57 = vcombine.high %v1403_v51, %v1411_v52  ;;  %v5382_v62 = vcombine.low %v1403_v51, %v1411_v52  ;;  %v1391_v51 = vld [vmem:[#allocation31 + $0x130] sm:$0xff] }
 0xb94   :  { %v1399_v52 = vld [vmem:[#allocation31 + $0x170] sm:$0xff] }
 0xb95   :  { %1827 = vmatpush1.bf16.msra.mxu0 %v5346_v53  ;;  %v5381_v53 = vcombine.high %v1402_v47, %v1410_v48  ;;  %v1390_v47 = vld [vmem:[#allocation31 + $0x128] sm:$0xff] }
 0xb96   :  { %1828 = vmatprep.subr.bf16.mxu0 %v5363_v59  ;;  %v1357_v59 = vld [vmem:[#allocation31 + $0x20] sm:$0xff]  ;;  %v1398_v48 = vld [vmem:[#allocation31 + $0x168] sm:$0xff] }
 0xb99   :  { %1829 = vmatpush1.bf16.msra.mxu0 %v5362_v60  ;;  %v1365_v60 = vld [vmem:[#allocation31 + $0x60] sm:$0xff] }
 0xb9a   :  { %1830 = vmatprep.subr.bf16.mxu0 %v5379_v5  ;;  %v5339_v2 = vcombine.high %v1357_v59, %v1365_v60  ;;  %v5336_v5 = vcombine.low %v1356_v55, %v1364_v56  ;;  %v5338_v9 = vcombine.low %v1357_v59, %v1365_v60  ;;  %v1406_v55 = vld [vmem:[#allocation31 + $0x1a8] sm:$0xff]  ;;  %v1407_v59 = vld [vmem:[#allocation31 + $0x1b0] sm:$0xff] }
 0xb9b   :  { %v1414_v56 = vld [vmem:[#allocation31 + $0x1e8] sm:$0xff]  ;;  %v1415_v60 = vld [vmem:[#allocation31 + $0x1f0] sm:$0xff] }
 0xb9d   :  { %1831 = vmatpush1.bf16.msra.mxu0 %v5378_v6  ;;  %v1373_v6 = vld [vmem:[#allocation31 + $0xa0] sm:$0xff] }
 0xb9e   :  { %1910 = vmatprep.subr.bf16.mxu0 %v5335_v14  ;;  %v5355_v13 = vcombine.high %v1373_v6, %v1381_v7  ;;  %v5352_v14 = vcombine.low %v1372_v63, %v1380_v1  ;;  %v1360_v63 = vld [vmem:[#allocation31 + $0x38] sm:$0xff] }
 0xb9f   :  { %v1368_v1 = vld [vmem:[#allocation31 + $0x78] sm:$0xff] }
 0xc63   :  { %v1137_v22 = vpop.f32.mrb[8].mxu0 }
 0xc64   :  { %v1138_v23 = vadd.f32 %v1137_v22, %v7471_v3  ;;  %v5862_v24 = vpop.f32.mrb[9].mxu0 }
 0xc65   :  { %v1140_v25 = vpop.f32.mrb[10].mxu0  ;;  %v5323_v24 = vld [vmem:[#allocation20] ss:$0 sm:$0xff] }
 0xc66   :  { %v1141_v27 = vadd.f32 %v1140_v25, %v7473_v4  ;;  %v5863_v28 = vpop.f32.mrb[11].mxu0  ;;  %v1146_v30 = vsel %vm418_vm0, %v1138_v23, 0.0 }
 0xc67   :  { %1147 = vadd.xlane.f32.xlu1 %v1146_v30 }
 0xc68   :  { %v1149_v31 = vsel %vm418_vm0, %v1141_v27, 0.0 }
 0xc6b   :  { %1150 = vadd.xlane.f32.xlu1 %v1149_v31 }
 0xcf4   :  { %v1148_v32 = vpop.xlane.xlu1 %1147 }
 0xcf5   :  { %v1152_v33 = vmul.f32 0.015625, %v1148_v32 }
 0xcf7   :  { %v7513_v34 = vsub.f32 %v1138_v23, %v1152_v33  ;;  %v1370_v33 = vld [vmem:[#allocation31 + $0x88] sm:$0xff] }
 0xcf8   :  { %v1151_v35 = vpop.xlane.xlu1 %1150 }
 0xcf9   :  { %v1153_v36 = vmul.f32 0.015625, %v1151_v35  ;;  %v1156_v3 = vmul.f32 %v7513_v34, %v7513_v34  ;;  %v1378_v35 = vld [vmem:[#allocation31 + $0xc8] sm:$0xff] }
 0xcfa   :  { %v5348_v42 = vcombine.low %v1370_v33, %v1378_v35 }
 0xcfb   :  { %v7517_v37 = vsub.f32 %v1141_v27, %v1153_v36  ;;  %v1158_v4 = vsel %vm418_vm0, %v1156_v3, 0.0  ;;  %v5324_v27 = vld [vmem:[#allocation22] ss:$0 sm:$0xff]  ;;  %v1371_v3 = vld [vmem:[#allocation31 + $0x90] sm:$0xff] }
 0xcfc   :  { %1159 = vadd.xlane.f32.xlu1 %v1158_v4  ;;  %v1379_v4 = vld [vmem:[#allocation31 + $0xd0] sm:$0xff] }
 0xcfd   :  { %v1157_v38 = vmul.f32 %v7517_v37, %v7517_v37  ;;  %v5350_v46 = vcombine.low %v1371_v3, %v1379_v4 }
 0xcff   :  { %v1161_v39 = vsel %vm418_vm0, %v1157_v38, 0.0 }
 0xd00   :  { %1162 = vadd.xlane.f32.xlu1 %v1161_v39  ;;  %v5349_v39 = vcombine.high %v1370_v33, %v1378_v35 }
 0xd89   :  { %v1160_v17 = vpop.xlane.xlu1 %1159 }
 0xd8a   :  { %v1164_v18 = vmul.f32 0.015625, %v1160_v17  ;;  %v1397_v17 = vld [vmem:[#allocation31 + $0x160] sm:$0xff] }
 0xd8c   :  { %v1166_v19 = vadd.f32 1e-05, %v1164_v18 }
 0xd8d   :  { %v1163_v20 = vpop.xlane.xlu1 %1162 }
 0xd8e   :  { %6151 = vrsqrt.f32 %v1166_v19  ;;  %v1165_v21 = vmul.f32 0.015625, %v1163_v20  ;;  %v5354_v19 = vcombine.low %v1373_v6, %v1381_v7  ;;  %v1404_v20 = vld [vmem:[#allocation31 + $0x198] sm:$0xff]  ;;  %v5345_v6 = vcombine.high %v1360_v63, %v1368_v1 }
 0xd8f   :  { %v5390_v7 = vcombine.low %v1407_v59, %v1415_v60 }
 0xd90   :  { %v1167_v22 = vadd.f32 1e-05, %v1165_v21  ;;  %v1412_v21 = vld [vmem:[#allocation31 + $0x1d8] sm:$0xff] }
 0xd91   :  { %v5384_v35 = vcombine.low %v1404_v20, %v1412_v21 }
 0xd92   :  { %6153 = vrsqrt.f32 %v1167_v22 }
 0xd98   :  { %v6152_v23 = vpop.eup %6151 }
 0xd99   :  { %v1170_v25 = vmul.f32 %v6152_v23, %v7513_v34  ;;  %v1394_v34 = vld [vmem:[#allocation31 + $0x148] sm:$0xff] }
 0xd9a   :  { %v5365_v45 = vcombine.high %v1386_v40, %v1394_v34  ;;  %v5364_v50 = vcombine.low %v1386_v40, %v1394_v34  ;;  %v1374_v40 = vld [vmem:[#allocation31 + $0xa8] sm:$0xff] }
 0xd9b   :  { %v1178_v28 = vmul.f32 %v5323_v24, %v1170_v25  ;;  %v1413_v25 = vld [vmem:[#allocation31 + $0x1e0] sm:$0xff]  ;;  %v1382_v34 = vld [vmem:[#allocation31 + $0xe8] sm:$0xff] }
 0xd9c   :  { %v6154_v30 = vpop.eup %6153 }
 0xd9d   :  { %v1171_v31 = vmul.f32 %v6154_v30, %v7517_v37  ;;  %v7525_v32 = vadd.f32 %v5324_v27, %v1178_v28  ;;  %v5351_v37 = vcombine.high %v1371_v3, %v1379_v4  ;;  %v1358_v30 = vld [vmem:[#allocation31 + $0x28] sm:$0xff]  ;;  %v1367_v3 = vld [vmem:[#allocation31 + $0x70] sm:$0xff] }
 0xd9f   :  { %8738 = vst [vmem:[#allocation58_spill] sm:$0xff] %v7525_v32  ;;  %v1179_v36 = vmul.f32 %v5323_v24, %v1171_v31  ;;  %5880 = vmatprep.mubr.msk.f32.mxu1 %vm418_vm0, %v7525_v32  ;;  %v1405_v24 = vld [vmem:[#allocation31 + $0x1a0] sm:$0xff]  ;;  %v1366_v31 = vld [vmem:[#allocation31 + $0x68] sm:$0xff] }
 0xda0   :  { %v5387_v33 = vcombine.high %v1405_v24, %v1413_v25  ;;  %v5341_v4 = vcombine.high %v1358_v30, %v1366_v31 }
 0xda1   :  { %v7529_v38 = vadd.f32 %v5324_v27, %v1179_v36  ;;  %v5385_v27 = vcombine.high %v1404_v20, %v1412_v21  ;;  %v1359_v36 = vld [vmem:[#allocation31 + $0x30] sm:$0xff] }
 0xda3   :  { %8739 = vst [vmem:[#allocation59_spill] sm:$0xff] %v7529_v38  ;;  %v7533_v41 = vpack.c.bf16 %v7529_v38, %v7525_v32  ;;  %5881 = vmatmul.mubr.msk.f32.vlgmr.msra.gmra.mrb[12].mxu1 %vm418_vm0, %v7529_v38 }
 0xda4   :  { %1868 = vmatpush1.bf16.msra.mxu1 %v5332_v11  ;;  %1899 = vmatprep.mubr.bf16.mxu1 %v6929_v0  ;;  %v1388_v11 = vld [vmem:[#allocation31 + $0x118] sm:$0xff] }
 0xda5   :  { %5394 = vmatmul.mubr.msk.bf16.vlgmr.msra.gmra.mrb[12].mxu0 %vm418_vm0, %v7533_v41  ;;  %1869 = vmatprep.subr.bf16.mxu1 %v5349_v39  ;;  %v5369_v18 = vcombine.high %v1388_v11, %v1396_v12  ;;  %v5368_v23 = vcombine.low %v1388_v11, %v1396_v12  ;;  %v5386_v39 = vcombine.low %v1405_v24, %v1413_v25  ;;  %v7566_v24 = vld [vmem:[#allocation32 + $0x8] sm:$0xff] }
 0xda6   :  { %1911 = vmatpush1.bf16.msra.mxu0 %v5334_v15  ;;  %1942 = vmatprep.mubr.bf16.mxu0 %v6929_v0  ;;  %v1389_v15 = vld [vmem:[#allocation31 + $0x120] sm:$0xff]  ;;  %v5344_v11 = vcombine.low %v1360_v63, %v1368_v1 }
 0xda7   :  { %1912 = vmatprep.subr.bf16.mxu0 %v5351_v37  ;;  %v5371_v22 = vcombine.high %v1389_v15, %v1397_v17  ;;  %v5370_v28 = vcombine.low %v1389_v15, %v1397_v17  ;;  %v5343_v37 = vcombine.high %v1359_v36, %v1367_v3 }
 0xda8   :  { %1870 = vmatpush1.bf16.msra.mxu1 %v5348_v42  ;;  %v5340_v42 = vcombine.low %v1358_v30, %v1366_v31  ;;  %v5325_v31 = vld [vmem:[#allocation25] ss:$0 sm:$0xff] }
 0xda9   :  { %1871 = vmatprep.subr.bf16.mxu1 %v5365_v45  ;;  %v5357_v45 = vcombine.high %v1374_v40, %v1382_v34 }
 0xdaa   :  { %1913 = vmatpush1.bf16.msra.mxu0 %v5350_v46  ;;  %v5342_v46 = vcombine.low %v1359_v36, %v1367_v3 }
 0xdab   :  { %1914 = vmatprep.subr.bf16.mxu0 %v5367_v49  ;;  %v5359_v49 = vcombine.high %v1375_v43, %v1383_v44 }
 0xdac   :  { %1872 = vmatpush1.bf16.msra.mxu1 %v5364_v50  ;;  %v5356_v50 = vcombine.low %v1374_v40, %v1382_v34 }
 0xdad   :  { %1873 = vmatprep.subr.bf16.mxu1 %v5381_v53  ;;  %v5373_v53 = vcombine.high %v1390_v47, %v1398_v48 }
 0xdae   :  { %1915 = vmatpush1.bf16.msra.mxu0 %v5366_v54  ;;  %v5358_v54 = vcombine.low %v1375_v43, %v1383_v44 }
 0xdaf   :  { %1916 = vmatprep.subr.bf16.mxu0 %v5383_v57  ;;  %v5375_v57 = vcombine.high %v1391_v51, %v1399_v52 }
 0xdb0   :  { %1874 = vmatpush1.bf16.msra.mxu1 %v5380_v58  ;;  %v5372_v58 = vcombine.low %v1390_v47, %v1398_v48 }
 0xdb1   :  { %1953 = vmatprep.subr.bf16.mxu1 %v5337_v61  ;;  %v5389_v61 = vcombine.high %v1406_v55, %v1414_v56 }
 0xdb2   :  { %1917 = vmatpush1.bf16.msra.mxu0 %v5382_v62  ;;  %v5374_v62 = vcombine.low %v1391_v51, %v1399_v52 }
 0xdb3   :  { %5395 = vmatmul.mubr.msk.bf16.vlgmr.msra.gmra.mrb[16].mxu1 %vm418_vm0, %v7533_v41  ;;  %1996 = vmatprep.subr.bf16.mxu0 %v5339_v2  ;;  %v5391_v2 = vcombine.high %v1407_v59, %v1415_v60 }
 0xdb4   :  { %1954 = vmatpush1.bf16.msra.mxu1 %v5336_v5  ;;  %1985 = vmatprep.mubr.bf16.mxu1 %v6929_v0  ;;  %v5388_v5 = vcombine.low %v1406_v55, %v1414_v56 }
 0xdb5   :  { %5396 = vmatmul.mubr.msk.bf16.vlgmr.msra.gmra.mrb[16].mxu0 %vm418_vm0, %v7533_v41  ;;  %1955 = vmatprep.subr.bf16.mxu1 %v5353_v8  ;;  %v1376_v8 = vld [vmem:[#allocation31 + $0xb8] sm:$0xff] }
 0xdb6   :  { %1997 = vmatpush1.bf16.msra.mxu0 %v5338_v9  ;;  %2028 = vmatprep.mubr.bf16.mxu0 %v6929_v0  ;;  %v1384_v9 = vld [vmem:[#allocation31 + $0xf8] sm:$0xff] }
 0xdb7   :  { %1998 = vmatprep.subr.bf16.mxu0 %v5355_v13  ;;  %v5361_v12 = vcombine.high %v1376_v8, %v1384_v9  ;;  %v1392_v13 = vld [vmem:[#allocation31 + $0x138] sm:$0xff]  ;;  %v5360_v15 = vcombine.low %v1376_v8, %v1384_v9 }
 0xdb8   :  { %1956 = vmatpush1.bf16.msra.mxu1 %v5352_v14  ;;  %v1400_v14 = vld [vmem:[#allocation31 + $0x178] sm:$0xff] }
 0xdb9   :  { %1957 = vmatprep.subr.bf16.mxu1 %v5369_v18  ;;  %v5377_v17 = vcombine.high %v1392_v13, %v1400_v14  ;;  %v1408_v18 = vld [vmem:[#allocation31 + $0x1b8] sm:$0xff]  ;;  %v5376_v20 = vcombine.low %v1392_v13, %v1400_v14 }
 0xdba   :  { %1999 = vmatpush1.bf16.msra.mxu0 %v5354_v19  ;;  %v1416_v19 = vld [vmem:[#allocation31 + $0x1f8] sm:$0xff] }
 0xdbb   :  { %2000 = vmatprep.subr.bf16.mxu0 %v5371_v22  ;;  %v5393_v21 = vcombine.high %v1408_v18, %v1416_v19  ;;  %v5392_v22 = vcombine.low %v1408_v18, %v1416_v19 }
 0xdbc   :  { %1958 = vmatpush1.bf16.msra.mxu1 %v5368_v23 }
 0xdbd   :  { %1959 = vmatprep.subr.bf16.mxu1 %v5385_v27 }
 0xdbe   :  { %2001 = vmatpush1.bf16.msra.mxu0 %v5370_v28  ;;  %v1417_v28 = vld [vmem:[#allocation32] sm:$0xff] }
 0xdbf   :  { %2002 = vmatprep.subr.bf16.mxu0 %v5387_v33 }
 0xdc0   :  { %1960 = vmatpush1.bf16.msra.mxu1 %v5384_v35 }
 0xdc1   :  { %2039 = vmatprep.subr.bf16.mxu1 %v5341_v4 }
 0xdc2   :  { %2003 = vmatpush1.bf16.msra.mxu0 %v5386_v39 }
 0xdc3   :  { %5397 = vmatmul.mubr.msk.bf16.vlgmr.msra.gmra.mrb[20].mxu1 %vm418_vm0, %v7533_v41  ;;  %2082 = vmatprep.subr.bf16.mxu0 %v5343_v37 }
 0xdc4   :  { %2040 = vmatpush1.bf16.msra.mxu1 %v5340_v42  ;;  %2071 = vmatprep.mubr.bf16.mxu1 %v6929_v0 }
 0xdc5   :  { %5398 = vmatmul.mubr.msk.bf16.vlgmr.msra.gmra.mrb[20].mxu0 %vm418_vm0, %v7533_v41  ;;  %2041 = vmatprep.subr.bf16.mxu1 %v5357_v45 }
 0xdc6   :  { %2083 = vmatpush1.bf16.msra.mxu0 %v5342_v46  ;;  %2114 = vmatprep.mubr.bf16.mxu0 %v6929_v0 }
 0xdc7   :  { %2084 = vmatprep.subr.bf16.mxu0 %v5359_v49 }
 0xdc8   :  { %2042 = vmatpush1.bf16.msra.mxu1 %v5356_v50 }
 0xdc9   :  { %2043 = vmatprep.subr.bf16.mxu1 %v5373_v53 }
 0xdca   :  { %2085 = vmatpush1.bf16.msra.mxu0 %v5358_v54 }
 0xdcb   :  { %2086 = vmatprep.subr.bf16.mxu0 %v5375_v57 }
 0xdcc   :  { %2044 = vmatpush1.bf16.msra.mxu1 %v5372_v58 }
 0xdcd   :  { %2045 = vmatprep.subr.bf16.mxu1 %v5389_v61 }
 0xdce   :  { %2087 = vmatpush1.bf16.msra.mxu0 %v5374_v62 }
 0xdcf   :  { %2088 = vmatprep.subr.bf16.mxu0 %v5391_v2 }
 0xdd0   :  { %2046 = vmatpush1.bf16.msra.mxu1 %v5388_v5 }
 0xdd1   :  { %2125 = vmatprep.subr.bf16.mxu1 %v5345_v6 }
 0xdd2   :  { %2089 = vmatpush1.bf16.msra.mxu0 %v5390_v7 }
 0xdd3   :  { %5399 = vmatmul.mubr.msk.bf16.vlgmr.msra.gmra.mrb[24].mxu1 %vm418_vm0, %v7533_v41 }
 0xdd4   :  { %2126 = vmatpush1.bf16.msra.mxu1 %v5344_v11  ;;  %2157 = vmatprep.mubr.bf16.mxu1 %v6929_v0  ;;  %v7563_v0 = vshrl.u32 %v396_v16, 7 }
 0xdd5   :  { %5400 = vmatmul.mubr.msk.bf16.vlgmr.msra.gmra.mrb[24].mxu0 %vm418_vm0, %v7533_v41  ;;  %2127 = vmatprep.subr.bf16.mxu1 %v5361_v12 }
 0xdd6   :  { %3118 = vmatprep.mubr.f32.mxu0 %v8639_v10  ;;  %v1447_v23 = vsub.s32 6, %v7563_v0  ;;  %v1423_v27 = vsub.s32 0, %v7563_v0  ;;  %v1427_v30 = vsub.s32 1, %v7563_v0  ;;  %v1431_v47 = vsub.s32 2, %v7563_v0 }
 0xdd7   :  { %v1435_v48 = vsub.s32 3, %v7563_v0  ;;  %v1439_v49 = vsub.s32 4, %v7563_v0  ;;  %v1443_v1 = vsub.s32 5, %v7563_v0  ;;  %v1451_v12 = vsub.s32 7, %v7563_v0 }
 0xdd8   :  { %2128 = vmatpush1.bf16.msra.mxu1 %v5360_v15  ;;  %v7569_v25 = vrot.slane %v7566_v24, %v1447_v23  ;;  %v1424_v33 = vrot.slane %v1417_v28, %v1423_v27  ;;  %v1428_v35 = vrot.slane %v1417_v28, %v1427_v30  ;;  %v1432_v50 = vrot.slane %v1417_v28, %v1431_v47 }
 0xdd9   :  { %2129 = vmatprep.subr.bf16.mxu1 %v5377_v17  ;;  %v1436_v51 = vrot.slane %v1417_v28, %v1435_v48  ;;  %v1440_v53 = vrot.slane %v1417_v28, %v1439_v49  ;;  %v1444_v2 = vrot.slane %v1417_v28, %v1443_v1  ;;  %v1448_v17 = vrot.slane %v1417_v28, %v1447_v23 }
 0xdda   :  { %v1452_v18 = vrot.slane %v1417_v28, %v1451_v12 }
 0xddc   :  { %2130 = vmatpush1.bf16.msra.mxu1 %v5376_v20 }
 0xddd   :  { %2131 = vmatprep.subr.bf16.mxu1 %v5393_v21 }
 0xde0   :  { %2132 = vmatpush1.bf16.msra.mxu1 %v5392_v22 }
 0xde3   :  { %5401 = vmatmul.mubr.msk.bf16.vlgmr.msra.gmra.mrb[28].mxu1 %vm418_vm0, %v7533_v41 }
 0xde4   :  { %3272 = vmatprep.mubr.f32.mxu1 %v8639_v10 }
 0xe76   :  { %v5882_v41 = vpop.f32.mrb[12].mxu1 }
 0xe77   :  { %v1275_v36 = vpop.f32.mrb[13].mxu1  ;;  %v7577_v40 = vadd.f32 %v5882_v41, %v5325_v31 }
 0xe78   :  { %v7573_v16 = vadd.f32 %v5325_v31, %v1275_v36  ;;  %v1858_v3 = vpop.f32.mrb[12].mxu0  ;;  %v1460_v36 = vrot.slane %v7566_v24, %v1427_v30 }
 0xe79   :  { %v7575_v4 = vadd.f32 %v1858_v3, %v1424_v33  ;;  %v1860_v39 = vpop.f32.mrb[13].mxu0  ;;  %v1290_v46 = vsel %vm1286_vm7, %v7577_v40, 0.0 }
 0xe7a   :  { %v7579_v34 = vadd.f32 %v1860_v39, %v1428_v35  ;;  %v1862_v37 = vpop.f32.mrb[14].mxu0  ;;  %v1287_v42 = vsel %vm1286_vm7, %v7573_v16, 0.0 }
 0xe7b   :  { %v7583_v43 = vadd.f32 %v1862_v37, %v1424_v33  ;;  %1288 = vadd.xlane.f32.xlu1 %v1287_v42  ;;  %v1864_v44 = vpop.f32.mrb[15].mxu0 }
 0xe7c   :  { %v7585_v45 = vadd.f32 %v1864_v44, %v1428_v35  ;;  %v1456_v35 = vrot.slane %v7566_v24, %v1423_v27  ;;  %v1464_v27 = vrot.slane %v7566_v24, %v1431_v47  ;;  %v1476_v47 = vrot.slane %v7566_v24, %v1443_v1 }
 0xe7f   :  { %1291 = vadd.xlane.f32.xlu1 %v1290_v46 }
 0xe86   :  { %v1901_v52 = vpop.f32.mrb[16].mxu1 }
 0xe87   :  { %v7592_v54 = vadd.f32 %v1901_v52, %v1432_v50  ;;  %v1903_v55 = vpop.f32.mrb[17].mxu1 }
 0xe88   :  { %v7594_v56 = vadd.f32 %v1903_v55, %v1436_v51  ;;  %v1905_v57 = vpop.f32.mrb[18].mxu1  ;;  %v1944_v58 = vpop.f32.mrb[16].mxu0  ;;  %v1468_v55 = vrot.slane %v7566_v24, %v1435_v48 }
 0xe89   :  { %v7596_v59 = vadd.f32 %v1905_v57, %v1432_v50  ;;  %v1907_v60 = vpop.f32.mrb[19].mxu1  ;;  %v1946_v61 = vpop.f32.mrb[17].mxu0  ;;  %v7598_v62 = vadd.f32 %v1944_v58, %v1440_v53 }
 0xe8a   :  { %v1948_v63 = vpop.f32.mrb[18].mxu0  ;;  %v7601_v6 = vadd.f32 %v1907_v60, %v1436_v51  ;;  %v7603_v7 = vadd.f32 %v1946_v61, %v1444_v2 }
 0xe8b   :  { %v1950_v5 = vpop.f32.mrb[19].mxu0  ;;  %v7605_v8 = vadd.f32 %v1948_v63, %v1440_v53 }
 0xe8c   :  { %v7607_v9 = vadd.f32 %v1950_v5, %v1444_v2  ;;  %v1472_v2 = vrot.slane %v7566_v24, %v1439_v49 }
 0xe96   :  { %v1987_v11 = vpop.f32.mrb[20].mxu1 }
 0xe97   :  { %v1989_v13 = vpop.f32.mrb[21].mxu1  ;;  %v7610_v22 = vadd.f32 %v1987_v11, %v1448_v17 }
 0xe98   :  { %v1991_v14 = vpop.f32.mrb[22].mxu1  ;;  %v2030_v15 = vpop.f32.mrb[20].mxu0  ;;  %v7612_v33 = vadd.f32 %v1989_v13, %v1452_v18 }
 0xe99   :  { %v1993_v19 = vpop.f32.mrb[23].mxu1  ;;  %v2032_v20 = vpop.f32.mrb[21].mxu0  ;;  %v7614_v41 = vadd.f32 %v1991_v14, %v1448_v17  ;;  %v7618_v0 = vadd.f32 %v2030_v15, %v1456_v35 }
 0xe9a   :  { %v2034_v21 = vpop.f32.mrb[22].mxu0  ;;  %v7620_v37 = vadd.f32 %v1993_v19, %v1452_v18  ;;  %v7622_v42 = vadd.f32 %v2032_v20, %v1460_v36  ;;  %v1484_v18 = vrot.slane %v7566_v24, %v1451_v12 }
 0xe9b   :  { %v2036_v31 = vpop.f32.mrb[23].mxu0  ;;  %v7624_v52 = vadd.f32 %v2034_v21, %v1456_v35 }
 0xe9c   :  { %v7627_v53 = vadd.f32 %v2036_v31, %v1460_v36 }
 0xea6   :  { %v2073_v3 = vpop.f32.mrb[24].mxu1 }
 0xea7   :  { %v2075_v39 = vpop.f32.mrb[25].mxu1  ;;  %v7629_v30 = vadd.f32 %v2073_v3, %v1464_v27 }
 0xea8   :  { %v2077_v23 = vpop.f32.mrb[26].mxu1  ;;  %v2116_v28 = vpop.f32.mrb[24].mxu0  ;;  %v7632_v58 = vadd.f32 %v2075_v39, %v1468_v55 }
 0xea9   :  { %v2079_v44 = vpop.f32.mrb[27].mxu1  ;;  %v2118_v46 = vpop.f32.mrb[25].mxu0  ;;  %v7634_v63 = vadd.f32 %v2077_v23, %v1464_v27  ;;  %v7637_v11 = vadd.f32 %v2116_v28, %v1472_v2  ;;  %v5328_v27 = vld [vmem:[#allocation26] ss:$0 sm:$0xff] }
 0xeaa   :  { %v2120_v50 = vpop.f32.mrb[26].mxu0  ;;  %v7639_v13 = vadd.f32 %v2079_v44, %v1468_v55  ;;  %v7642_v14 = vadd.f32 %v2118_v46, %v1476_v47 }
 0xeab   :  { %v2122_v51 = vpop.f32.mrb[27].mxu0  ;;  %8740 = vst [vmem:[#allocation60_spill] sm:$0xff] %v7634_v63  ;;  %v7644_v15 = vadd.f32 %v2120_v50, %v1472_v2 }
 0xeac   :  { %8741 = vst [vmem:[#allocation61_spill] sm:$0xff] %v7639_v13  ;;  %v7646_v48 = vadd.f32 %v2122_v51, %v1476_v47 }
 0xeb6   :  { %v2159_v57 = vpop.f32.mrb[28].mxu1 }
 0xeb7   :  { %v2161_v60 = vpop.f32.mrb[29].mxu1  ;;  %v7649_v17 = vadd.f32 %v2159_v57, %v7569_v25  ;;  %v5329_v57 = vld [vmem:[#allocation28] ss:$0 sm:$0xff] }
 0xeb8   :  { %v2163_v61 = vpop.f32.mrb[30].mxu1  ;;  %v7652_v19 = vadd.f32 %v2161_v60, %v1484_v18 }
 0xeb9   :  { %v2165_v5 = vpop.f32.mrb[31].mxu1  ;;  %8742 = vst [vmem:[#allocation62_spill] sm:$0xff] %v7649_v17  ;;  %v7655_v49 = vadd.f32 %v2163_v61, %v7569_v25 }
 0xeba   :  { %8743 = vst [vmem:[#allocation63_spill] sm:$0xff] %v7652_v19  ;;  %v7657_v20 = vadd.f32 %v2165_v5, %v1484_v18 }
 0xebb   :  { %8744 = vst [vmem:[#allocation64_spill] sm:$0xff] %v7655_v49 }
 0xebc   :  { %8745 = vst [vmem:[#allocation65_spill] sm:$0xff] %v7657_v20 }
 0xf08   :  { %v1289_v21 = vpop.xlane.xlu1 %1288 }
 0xf09   :  { %v1294_v1 = vmul.f32 0.125, %v1289_v21 }
 0xf0b   :  { %v1296_v31 = vsub.f32 %v7573_v16, %v1294_v1 }
 0xf0c   :  { %v1292_v35 = vpop.xlane.xlu1 %1291 }
 0xf0d   :  { %v1295_v36 = vmul.f32 0.125, %v1292_v35  ;;  %v1298_v3 = vmul.f32 %v1296_v31, %v1296_v31 }
 0xf0f   :  { %v1297_v39 = vsub.f32 %v7577_v40, %v1295_v36  ;;  %v1300_v23 = vsel %vm1286_vm7, %v1298_v3, 0.0 }
 0xf10   :  { %1301 = vadd.xlane.f32.xlu0 %v1300_v23 }
 0xf11   :  { %v1299_v24 = vmul.f32 %v1297_v39, %v1297_v39 }
 0xf13   :  { %v1303_v12 = vsel %vm1286_vm7, %v1299_v24, 0.0 }
 0xf14   :  { %1304 = vadd.xlane.f32.xlu1 %v1303_v12 }
 0xf9d   :  { %v1302_v25 = vpop.xlane.xlu0 %1301 }
 0xf9e   :  { %v1306_v28 = vmul.f32 0.125, %v1302_v25 }
 0xfa0   :  { %v1308_v44 = vadd.f32 1e-05, %v1306_v28  ;;  %v3033_v28 = vld [vmem:[#allocation29 + $0x8] sm:$0xff] }
 0xfa1   :  { %v1305_v46 = vpop.xlane.xlu1 %1304  ;;  %3054 = vmatprep.subr.mxu0 %v3033_v28  ;;  %v7712_v28 = vmul.f32 0.70710677, %v7579_v34 }
 0xfa2   :  { %6155 = vrsqrt.f32 %v1308_v44  ;;  %v1307_v50 = vmul.f32 0.125, %v1305_v46  ;;  %v3032_v44 = vld [vmem:[#allocation29] sm:$0xff]  ;;  %v3037_v46 = vld [vmem:[#allocation29 + $0x28] sm:$0xff] }
 0xfa3   :  { %3208 = vmatprep.subr.mxu1 %v3037_v46  ;;  %3055 = vmatpush1.msra.mxu0 %v3032_v44  ;;  %v6020_v44 = vld [vmem:[#allocation34 + $0xc8] sm:$0xff]   ;;  %v7719_v46 = vmul.f32 0.70710677, %v7583_v43  ;;  %vm2841_vm10 = vcmp.ge.f32.partialorder %v7712_v28, 0.0 }
 0xfa4   :  { %v1309_v51 = vadd.f32 1e-05, %v1307_v50  ;;  %v3036_v50 = vld [vmem:[#allocation29 + $0x20] sm:$0xff] }
 0xfa5   :  { %3209 = vmatpush1.msra.mxu1 %v3036_v50  ;;  %vm2856_vm12 = vcmp.ge.f32.partialorder %v7719_v46, 0.0 }
 0xfa6   :  { %6157 = vrsqrt.f32 %v1309_v51  ;;  %v3035_v51 = vld [vmem:[#allocation29 + $0x18] sm:$0xff] }
 0xfa7   :  { %3131 = vmatprep.subr.mxu0 %v3035_v51  ;;  %v6022_v51 = vld [vmem:[#allocation34 + $0x88] sm:$0xff]  }
 0xfac   :  { %v6156_v16 = vpop.eup %6155 }
 0xfad   :  { %v1312_v55 = vmul.f32 %v6156_v16, %v1296_v31  ;;  %v3041_v16 = vld [vmem:[#allocation29 + $0x48] sm:$0xff] }
 0xfae   :  { %3362 = vmatprep.subr.mxu1 %v3041_v16  ;;  %v2201_v16 = vand.u32 2147483647, %v7712_v28 }
 0xfaf   :  { %v1320_v40 = vmul.f32 %v5328_v27, %v1312_v55 }
 0xfb0   :  { %v6158_v60 = vpop.eup %6157 }
 0xfb1   :  { %v1328_v61 = vadd.f32 %v5329_v57, %v1320_v40  ;;  %v1313_v2 = vmul.f32 %v6158_v60, %v1297_v39  ;;  %v3034_v60 = vld [vmem:[#allocation29 + $0x10] sm:$0xff] }
 0xfb3   :  { %v1330_v5 = vsel %vm1286_vm7, %v1328_v61, -inf  ;;  %v1321_v47 = vmul.f32 %v5328_v27, %v1313_v2  ;;  %v3039_v2 = vld [vmem:[#allocation29 + $0x38] sm:$0xff] }
 0xfb4   :  { %1331 = vmax.xlane.f32.xlu1 %v1330_v5  ;;  %v3045_v5 = vld [vmem:[#allocation29 + $0x68] sm:$0xff] }
 0xfb5   :  { %v1329_v18 = vadd.f32 %v5329_v57, %v1321_v47 }
 0xfb7   :  { %v1333_v21 = vsel %vm1286_vm7, %v1329_v18, -inf }
 0xfb8   :  { %1334 = vmax.xlane.f32.xlu1 %v1333_v21  ;;  %v3038_v21 = vld [vmem:[#allocation29 + $0x30] sm:$0xff] }
0x1041   :  { %v1332_v1 = vpop.xlane.xlu1 %1331 }
0x1042   :  { %v1336_v35 = vsub.f32 %v1328_v61, %v1332_v1  ;;  %v3040_v61 = vld [vmem:[#allocation29 + $0x40] sm:$0xff] }
0x1043   :  { %v3044_v1 = vld [vmem:[#allocation29 + $0x60] sm:$0xff] }
0x1044   :  { %v1338_v36 = vmul.f32 1.442695, %v1336_v35  ;;  %v3043_v35 = vld [vmem:[#allocation29 + $0x58] sm:$0xff] }
0x1045   :  { %v1335_v3 = vpop.xlane.xlu1 %1334 }
0x1046   :  { %6159 = vpow2.f32 %v1338_v36  ;;  %v1337_v23 = vsub.f32 %v1329_v18, %v1335_v3  ;;  %v3974_v36 = vld [vmem:[#allocation35] sm:$0xff] }
0x1047   :  { %v3042_v3 = vld [vmem:[#allocation29 + $0x50] sm:$0xff] }
0x1048   :  { %v1340_v31 = vmul.f32 1.442695, %v1337_v23  ;;  %v6016_v23 = vld [vmem:[#allocation34 + $0xc0] sm:$0xff]  }
0x104a   :  { %6161 = vpow2.f32 %v1340_v31  ;;  %v3047_v31 = vld [vmem:[#allocation29 + $0x78] sm:$0xff] }
0x1050   :  { %v6160_v24 = vpop.eup %6159 }
0x1051   :  { %v1342_v12 = vsel %vm1286_vm7, %v6160_v24, 0.0 }
0x1052   :  { %1343 = vadd.xlane.f32.xlu1 %v1342_v12  ;;  %v3046_v12 = vld [vmem:[#allocation29 + $0x70] sm:$0xff] }
0x1054   :  { %v6162_v39 = vpop.eup %6161 }
0x1055   :  { %v1345_v25 = vsel %vm1286_vm7, %v6162_v39, 0.0 }
0x1056   :  { %1346 = vadd.xlane.f32.xlu1 %v1345_v25  ;;  %v6018_v25 = vld [vmem:[#allocation34 + $0x80] sm:$0xff]  }
0x10df   :  { %v1344_v27 = vpop.xlane.xlu1 %1343 }
0x10e0   :  { %6163 = vrcp.f32 %v1344_v27  ;;  %v6024_v27 = vld [vmem:[#allocation34 + $0xd0] sm:$0xff]  }
0x10e3   :  { %v1347_v55 = vpop.xlane.xlu1 %1346 }
0x10e4   :  { %6165 = vrcp.f32 %v1347_v55  ;;  %v7725_v55 = vmul.f32 0.70710677, %v7585_v45 }
0x10e6   :  { %8746 = vst [vmem:[#allocation66_spill] sm:$0xff] %v7725_v55 }
0x10ea   :  { %v6164_v57 = vpop.eup %6163 }
0x10eb   :  { %v7667_v40 = vmul.f32 %v6164_v57, %v6160_v24  ;;  %v7709_v24 = vmul.f32 0.70710677, %v7575_v4  ;;  %v2216_v57 = vand.u32 2147483647, %v7719_v46 }
0x10ed   :  { %5402 = vmatmul.mubr.msk.f32.vlgmr.msra.gmra.mrb[6].mxu0 %vm1286_vm7, %v7667_v40  ;;  %5406 = vmatmul.mubr.msk.f32.vlgmr.msra.gmra.mrb[14].mxu1 %vm1286_vm7, %v7667_v40  ;;  %v2200_v50 = vand.u32 2147483647, %v7709_v24  ;;  %v2248_v38 = vmul.f32 0.3275911, %v2216_v57  ;;  %vm2840_vm8 = vcmp.ge.f32.partialorder %v7709_v24, 0.0 }
0x10ee   :  { %v6166_v47 = vpop.eup %6165  ;;  %3124 = vmatprep.mubr.f32.mxu0 %v8639_v10  ;;  %3278 = vmatprep.mubr.f32.mxu1 %v8639_v10 }
0x10ef   :  { %v7675_v18 = vmul.f32 %v6166_v47, %v6162_v39  ;;  %3132 = vmatpush1.msra.mxu0 %v3034_v60  ;;  %3363 = vmatpush1.msra.mxu1 %v3040_v61  ;;  %v6011_v39 = vld [vmem:[#allocation34 + $0x40] sm:$0xff]   ;;  %v2648_v61 = vsub.f32 0.0, %v2200_v50  ;;  %v2649_v47 = vsub.f32 0.0, %v2201_v16 }
0x10f0   :  { %3285 = vmatprep.subr.mxu0 %v3039_v2  ;;  %3516 = vmatprep.subr.mxu1 %v3045_v5  ;;  %v6012_v60 = vld [vmem:[#allocation34] sm:$0xff]   ;;  %v6013_v2 = vld [vmem:[#allocation34 + $0x48] sm:$0xff]   ;;  %v6026_v5 = vld [vmem:[#allocation34 + $0x90] sm:$0xff]  }
0x10f1   :  { %5403 = vmatmul.mubr.msk.f32.gmra.mrb[28].mxu0 %vm1286_vm7, %v7675_v18  ;;  %5407 = vmatmul.mubr.msk.f32.gmra.mrb[32].mxu1 %vm1286_vm7, %v7675_v18 }
0x10f2   :  { %3195 = vmatprep.mubr.f32.mxu0 %v8639_v10  ;;  %3426 = vmatprep.mubr.f32.mxu1 %v8639_v10 }
0x10f5   :  { %5404 = vmatmul.mubr.msk.f32.vlgmr.msra.gmra.mrb[30].mxu0 %vm1286_vm7, %v7667_v40  ;;  %5410 = vmatmul.mubr.msk.f32.vlgmr.msra.gmra.mrb[34].mxu1 %vm1286_vm7, %v7667_v40 }
0x10f6   :  { %3201 = vmatprep.mubr.f32.mxu0 %v8639_v10  ;;  %3432 = vmatprep.mubr.f32.mxu1 %v8639_v10 }
0x10f7   :  { %3286 = vmatpush1.msra.mxu0 %v3038_v21  ;;  %3517 = vmatpush1.msra.mxu1 %v3044_v1  ;;  %v6028_v21 = vld [vmem:[#allocation34 + $0xd8] sm:$0xff]   ;;  %v2232_v1 = vmul.f32 0.3275911, %v2200_v50 }
0x10f8   :  { %3439 = vmatprep.subr.mxu0 %v3043_v35  ;;  %5883 = vmatprep.subr.mxu1 %v3974_v36  ;;  %v2217_v35 = vand.u32 2147483647, %v7725_v55 }
0x10f9   :  { %5405 = vmatmul.mubr.msk.f32.gmra.mrb[32].mxu0 %vm1286_vm7, %v7675_v18  ;;  %5411 = vmatmul.mubr.msk.f32.gmra.mrb[36].mxu1 %vm1286_vm7, %v7675_v18  ;;  %v2264_v29 = vadd.f32 1.0, %v2232_v1 }
0x10fa   :  { %3349 = vmatprep.mubr.f32.mxu0 %v8639_v10  ;;  %3580 = vmatprep.mubr.f32.mxu1 %v8639_v10  ;;  %v2665_v26 = vsub.f32 0.0, %v2217_v35 }
0x10fb   :  { %6167 = vrcp.f32 %v2264_v29 }
0x10fd   :  { %5408 = vmatmul.mubr.msk.f32.vlgmr.msra.gmra.mrb[34].mxu0 %vm1286_vm7, %v7667_v40  ;;  %5414 = vmatmul.mubr.msk.f32.vlgmr.msra.gmra.mrb[38].mxu1 %vm1286_vm7, %v7667_v40 }
0x10fe   :  { %3355 = vmatprep.mubr.f32.mxu0 %v8639_v10  ;;  %3586 = vmatprep.mubr.f32.mxu1 %v8639_v10 }
0x10ff   :  { %3440 = vmatpush1.msra.mxu0 %v3042_v3  ;;  %5884 = vmatpush3.msra.mxu1 %v3974_v36  ;;  %v7733_v36 = vmul.f32 0.70710677, %v7592_v54  ;;  %v2233_v3 = vmul.f32 0.3275911, %v2201_v16 }
0x1100   :  { %3593 = vmatprep.subr.mxu0 %v3047_v31  ;;  %5626 = vmatprep.subr.bf16.mxu1 %v6016_v23  ;;  %v2664_v23 = vsub.f32 0.0, %v2216_v57  ;;  %v7738_v31 = vmul.f32 0.70710677, %v7594_v56 }
0x1101   :  { %5409 = vmatmul.mubr.msk.f32.gmra.mrb[36].mxu0 %vm1286_vm7, %v7675_v18  ;;  %5415 = vmatmul.mubr.msk.f32.gmra.mrb[40].mxu1 %vm1286_vm7, %v7675_v18  ;;  %8747 = vst [vmem:[#allocation67_spill] sm:$0xff] %v7733_v36 }
0x1102   :  { %5885 = vmatprep.mubr.msk.f32.mxu1 %vm1286_vm7, %v7667_v40  ;;  %3503 = vmatprep.mubr.f32.mxu0 %v8639_v10  ;;  %8748 = vst [vmem:[#allocation68_spill] sm:$0xff] %v7738_v31 }
0x1105   :  { %5412 = vmatmul.mubr.msk.f32.vlgmr.msra.gmra.mrb[38].mxu0 %vm1286_vm7, %v7667_v40  ;;  %5886 = vmatmul.mubr.msk.f32.vlgmr.msra.gmra.mrb[42].mxu1 %vm1286_vm7, %v7675_v18 }
0x1106   :  { %3509 = vmatprep.mubr.f32.mxu0 %v8639_v10  ;;  %3594 = vmatpush1.msra.mxu0 %v3046_v12  ;;  %v6014_v12 = vld [vmem:[#allocation34 + $0x8] sm:$0xff]  }
0x1107   :  { %5604 = vmatprep.subr.bf16.mxu0 %v6011_v39  ;;  %5627 = vmatpush3.bf16.msra.mxu1 %v6018_v25  ;;  %v2680_v39 = vmul.f32 %v2648_v61, %v2200_v50  ;;  %v6015_v25 = vld [vmem:[#allocation34 + $0x50] sm:$0xff]   ;;  %v2265_v50 = vadd.f32 1.0, %v2233_v3  ;;  %v2696_v61 = vmul.f32 %v2664_v23, %v2216_v57  ;;  %v7759_v3 = vmul.f32 0.70710677, %v7598_v62 }
0x1108   :  { %5628 = vmatprep.subr.bf16.mxu1 %v6020_v44  ;;  %v6030_v44 = vld [vmem:[#allocation34 + $0x98] sm:$0xff]   ;;  %v2697_v57 = vmul.f32 %v2665_v26, %v2217_v35 }
0x1109   :  { %5413 = vmatmul.mubr.msk.f32.gmra.mrb[40].mxu0 %vm1286_vm7, %v7675_v18  ;;  %6169 = vrcp.f32 %v2265_v50  ;;  %vm2844_vm9 = vcmp.ge.f32.partialorder %v7759_v3, 0.0 }
0x110a   :  { %3657 = vmatprep.mubr.f32.mxu0 %v8639_v10 }
0x110b   :  { %5629 = vmatpush3.bf16.msra.mxu1 %v6022_v51  ;;  %v7742_v51 = vmul.f32 0.5, %v7575_v4  ;;  %v2203_v4 = vand.u32 2147483647, %v7738_v31  ;;  %v7805_v31 = vmul.f32 0.70710677, %v7612_v33 }
0x110c   :  { %5630 = vmatprep.subr.bf16.mxu1 %v6024_v27  ;;  %v2681_v27 = vmul.f32 %v2649_v47, %v2201_v16  ;;  %v6017_v16 = vld [vmem:[#allocation34 + $0x10] sm:$0xff]   ;;  %v2249_v47 = vmul.f32 0.3275911, %v2217_v35  ;;  %v2746_v35 = vmul.f32 1.442695, %v2697_v57  ;;  %v7779_v57 = vmul.f32 0.5, %v7594_v56 }
0x110d   :  { %5416 = vmatmul.mubr.msk.f32.vlgmr.msra.gmra.mrb[42].mxu0 %vm1286_vm7, %v7667_v40  ;;  %8749 = vst [vmem:[#allocation69_spill] sm:$0xff] %v7742_v51  ;;  %v7745_v40 = vmul.f32 0.70710677, %v7596_v59  ;;  %v2651_v32 = vsub.f32 0.0, %v2203_v4  ;;  %v2235_v29 = vmul.f32 0.3275911, %v2203_v4 }
0x110e   :  { %3663 = vmatprep.mubr.f32.mxu0 %v8639_v10  ;;  %5605 = vmatpush3.bf16.msra.mxu0 %v6012_v60  ;;  %v2202_v10 = vand.u32 2147483647, %v7733_v36  ;;  %v7751_v60 = vmul.f32 0.5, %v7579_v34  ;;  %v2714_v1 = vmul.f32 1.442695, %v2681_v27  ;;  %v2280_v34 = vadd.f32 1.0, %v2248_v38 }
0x110f   :  { %5606 = vmatprep.subr.bf16.mxu0 %v6013_v2  ;;  %5631 = vmatpush3.bf16.msra.mxu1 %v6026_v5  ;;  %8750 = vst [vmem:[#allocation70_spill] sm:$0xff] %v7745_v40  ;;  %v2712_v2 = vmul.f32 1.442695, %v2680_v39  ;;  %v7755_v5 = vmul.f32 0.5, %v7583_v43  ;;  %v6021_v43 = vld [vmem:[#allocation34 + $0x18] sm:$0xff]   ;;  %8757 = vst [vmem:[#allocation77_spill] sm:$0xff] %v7779_v57 }
0x1110   :  { %5632 = vmatprep.subr.bf16.mxu1 %v6028_v21  ;;  %8751 = vst [vmem:[#allocation71_spill] sm:$0xff] %v7751_v60  ;;  %v6019_v21 = vld [vmem:[#allocation34 + $0x58] sm:$0xff]   ;;  %v2650_v23 = vsub.f32 0.0, %v2202_v10  ;;  %v2234_v39 = vmul.f32 0.3275911, %v2202_v10  ;;  %8762 = vst [vmem:[#allocation82_spill] sm:$0xff] %v7805_v31 }
0x1111   :  { %5417 = vmatmul.mubr.msk.f32.gmra.mrb[44].mxu0 %vm1286_vm7, %v7675_v18  ;;  %8752 = vst [vmem:[#allocation72_spill] sm:$0xff] %v7755_v5  ;;  %v2218_v18 = vand.u32 2147483647, %v7745_v40  ;;  %6171 = vpow2.f32 %v2712_v2  ;;  %v7765_v27 = vmul.f32 0.70710677, %v7601_v6  ;;  %v6023_v40 = vld [vmem:[#allocation34 + $0x60] sm:$0xff]  }
0x1112   :  { %5607 = vmatpush3.bf16.msra.mxu0 %v6014_v12  ;;  %v2744_v12 = vmul.f32 1.442695, %v2696_v61  ;;  %6173 = vpow2.f32 %v2714_v1  ;;  %v2204_v38 = vand.u32 2147483647, %v7759_v3  ;;  %v2682_v50 = vmul.f32 %v2650_v23, %v2202_v10  ;;  %v6027_v10 = vld [vmem:[#allocation34 + $0x68] sm:$0xff]  }
0x1113   :  { %5608 = vmatprep.subr.bf16.mxu0 %v6015_v25  ;;  %5633 = vmatpush3.bf16.msra.mxu1 %v6030_v44  ;;  %v2281_v25 = vadd.f32 1.0, %v2249_v47  ;;  %v7762_v44 = vmul.f32 0.5, %v7585_v45  ;;  %8754 = vst [vmem:[#allocation74_spill] sm:$0xff] %v7765_v27  ;;  %v2666_v26 = vsub.f32 0.0, %v2218_v18  ;;  %6175 = vrcp.f32 %v2280_v34  ;;  %v6025_v47 = vld [vmem:[#allocation34 + $0x20] sm:$0xff]  }
0x1114   :  { %v7769_v61 = vmul.f32 0.70710677, %v7603_v7  ;;  %6177 = vpow2.f32 %v2744_v12  ;;  %v2683_v45 = vmul.f32 %v2651_v32, %v2203_v4  ;;  %v2250_v2 = vmul.f32 0.3275911, %v2218_v18 }
0x1115   :  { %8753 = vst [vmem:[#allocation73_spill] sm:$0xff] %v7762_v44  ;;  %6179 = vrcp.f32 %v2281_v25  ;;  %v2219_v1 = vand.u32 2147483647, %v7765_v27  ;;  %v7776_v44 = vmul.f32 0.70710677, %v7605_v8  ;;  %v2267_v34 = vadd.f32 1.0, %v2235_v29  ;;  %v7788_v29 = vpop.eup %6167 }
0x1116   :  { %5609 = vmatpush3.bf16.msra.mxu0 %v6017_v16  ;;  %v2266_v16 = vadd.f32 1.0, %v2234_v39  ;;  %v2698_v23 = vmul.f32 %v2666_v26, %v2218_v18  ;;  %v2652_v32 = vsub.f32 0.0, %v2204_v38  ;;  %6181 = vpow2.f32 %v2746_v35  ;;  %v6029_v25 = vld [vmem:[#allocation34 + $0x28] sm:$0xff]  }
0x1117   :  { %5610 = vmatprep.subr.bf16.mxu0 %v6019_v21  ;;  %v7772_v21 = vmul.f32 0.5, %v7592_v54  ;;  %8756 = vst [vmem:[#allocation76_spill] sm:$0xff] %v7776_v44  ;;  %v2716_v4 = vmul.f32 1.442695, %v2682_v50  ;;  %v2205_v12 = vand.u32 2147483647, %v7769_v61  ;;  %v7794_v50 = vpop.eup %6169 }
0x1118   :  { %v7783_v54 = vmul.f32 0.70710677, %v7607_v9  ;;  %6183 = vrcp.f32 %v2266_v16  ;;  %v2718_v39 = vmul.f32 1.442695, %v2683_v45  ;;  %v2282_v56 = vadd.f32 1.0, %v2250_v2 }
0x1119   :  { %8755 = vst [vmem:[#allocation75_spill] sm:$0xff] %v7772_v21  ;;  %v2667_v18 = vsub.f32 0.0, %v2219_v1  ;;  %v2220_v26 = vand.u32 2147483647, %v7776_v44  ;;  %v7792_v35 = vmul.f32 0.70710677, %v7610_v22  ;;  %6185 = vrcp.f32 %v2267_v34 }
0x111a   :  { %5611 = vmatpush3.bf16.msra.mxu0 %v6021_v43  ;;  %8758 = vst [vmem:[#allocation78_spill] sm:$0xff] %v7783_v54  ;;  %v7786_v43 = vmul.f32 0.5, %v7596_v59  ;;  %v2748_v16 = vmul.f32 1.442695, %v2698_v23  ;;  %v2684_v45 = vmul.f32 %v2652_v32, %v2204_v38  ;;  %v7797_v59 = vmul.f32 0.5, %v7598_v62 }
0x111b   :  { %5612 = vmatprep.subr.bf16.mxu0 %v6023_v40  ;;  %v2236_v40 = vmul.f32 0.3275911, %v2204_v38  ;;  %8760 = vst [vmem:[#allocation80_spill] sm:$0xff] %v7792_v35  ;;  %6187 = vpow2.f32 %v2716_v4  ;;  %v2653_v2 = vsub.f32 0.0, %v2205_v12  ;;  %v2221_v57 = vand.u32 2147483647, %v7783_v54 }
0x111c   :  { %8759 = vst [vmem:[#allocation79_spill] sm:$0xff] %v7786_v43  ;;  %8761 = vst [vmem:[#allocation81_spill] sm:$0xff] %v7797_v59  ;;  %v2251_v43 = vmul.f32 0.3275911, %v2219_v1  ;;  %6189 = vpow2.f32 %v2718_v39  ;;  %v2699_v62 = vmul.f32 %v2667_v18, %v2219_v1  ;;  %v2668_v34 = vsub.f32 0.0, %v2220_v26 }
0x111d   :  { %v2268_v27 = vadd.f32 1.0, %v2236_v40  ;;  %6191 = vrcp.f32 %v2282_v56  ;;  %v2206_v23 = vand.u32 2147483647, %v7792_v35  ;;  %v2720_v4 = vmul.f32 1.442695, %v2684_v45 }
0x111e   :  { %5613 = vmatpush3.bf16.msra.mxu0 %v6025_v47  ;;  %v7799_v47 = vpop.eup %6171  ;;  %6193 = vpow2.f32 %v2748_v16  ;;  %v7813_v36 = vmul.f32 0.5, %v7601_v6  ;;  %v7816_v39 = vmul.f32 0.5, %v7603_v7  ;;  %v2685_v5 = vmul.f32 %v2653_v2, %v2205_v12 }
0x111f   :  { %5614 = vmatprep.subr.bf16.mxu0 %v6027_v10  ;;  %v7802_v21 = vpop.eup %6173  ;;  %v2237_v10 = vmul.f32 0.3275911, %v2205_v12  ;;  %v2669_v60 = vsub.f32 0.0, %v2221_v57  ;;  %v7821_v1 = vmul.f32 0.70710677, %v7614_v41  ;;  %v7824_v35 = vmul.f32 0.5, %v7605_v8 }
0x1120   :  { %v7807_v38 = vpop.eup %6175  ;;  %8763 = vst [vmem:[#allocation83_spill] sm:$0xff] %v7813_v36  ;;  %8764 = vst [vmem:[#allocation84_spill] sm:$0xff] %v7816_v39  ;;  %v2252_v18 = vmul.f32 0.3275911, %v2220_v26  ;;  %v2207_v16 = vand.u32 2147483647, %v7805_v31  ;;  %6195 = vrcp.f32 %v2268_v27  ;;  %v2700_v45 = vmul.f32 %v2668_v34, %v2220_v26 }
0x1121   :  { %v7810_v32 = vpop.eup %6177  ;;  %8765 = vst [vmem:[#allocation85_spill] sm:$0xff] %v7821_v1  ;;  %v2269_v56 = vadd.f32 1.0, %v2237_v10  ;;  %8766 = vst [vmem:[#allocation86_spill] sm:$0xff] %v7824_v35  ;;  %v2750_v7 = vmul.f32 1.442695, %v2699_v62  ;;  %v2654_v36 = vsub.f32 0.0, %v2206_v23  ;;  %6197 = vpow2.f32 %v2720_v4 }
0x1122   :  { %5615 = vmatpush3.bf16.msra.mxu0 %v6029_v25  ;;  %v7818_v40 = vpop.eup %6179  ;;  %v2283_v25 = vadd.f32 1.0, %v2251_v43  ;;  %v2253_v12 = vmul.f32 0.3275911, %v2221_v57  ;;  %v7832_v43 = vmul.f32 0.5, %v7607_v9  ;;  %v7835_v2 = vmul.f32 0.70710677, %v7618_v0 }
0x1123   :  { %v7827_v6 = vpop.eup %6181  ;;  %v2722_v8 = vmul.f32 1.442695, %v2685_v5  ;;  %v2701_v10 = vmul.f32 %v2669_v60, %v2221_v57  ;;  %v2222_v31 = vand.u32 2147483647, %v7821_v1  ;;  %v2284_v27 = vadd.f32 1.0, %v2252_v18 }
0x1124   :  { %v7829_v39 = vpop.eup %6183  ;;  %8767 = vst [vmem:[#allocation87_spill] sm:$0xff] %v7832_v43  ;;  %8768 = vst [vmem:[#allocation88_spill] sm:$0xff] %v7835_v2  ;;  %6199 = vrcp.f32 %v2283_v25  ;;  %v2238_v26 = vmul.f32 0.3275911, %v2206_v23  ;;  %v2655_v62 = vsub.f32 0.0, %v2207_v16  ;;  %v2686_v9 = vmul.f32 %v2654_v36, %v2206_v23 }
0x1125   :  { %v7838_v35 = vpop.eup %6185  ;;  %6201 = vrcp.f32 %v2269_v56  ;;  %v2752_v4 = vmul.f32 1.442695, %v2700_v45  ;;  %v7843_v43 = vmul.f32 0.70710677, %v7620_v37  ;;  %v2285_v5 = vadd.f32 1.0, %v2253_v12 }
0x1126   :  { %v7840_v34 = vpop.eup %6187  ;;  %6203 = vpow2.f32 %v2750_v7  ;;  %v7848_v60 = vmul.f32 0.5, %v7610_v22  ;;  %v2208_v57 = vand.u32 2147483647, %v7835_v2  ;;  %v7852_v25 = vmul.f32 0.70710677, %v7622_v42 }
0x1127   :  { %8769 = vst [vmem:[#allocation89_spill] sm:$0xff] %v7840_v34  ;;  %8770 = vst [vmem:[#allocation90_spill] sm:$0xff] %v7843_v43  ;;  %v7845_v59 = vpop.eup %6189  ;;  %6205 = vpow2.f32 %v2722_v8  ;;  %v2754_v18 = vmul.f32 1.442695, %v2701_v10  ;;  %v2239_v7 = vmul.f32 0.3275911, %v2207_v16  ;;  %v2687_v1 = vmul.f32 %v2655_v62, %v2207_v16 }
0x1128   :  { %8771 = vst [vmem:[#allocation91_spill] sm:$0xff] %v7845_v59  ;;  %8772 = vst [vmem:[#allocation92_spill] sm:$0xff] %v7848_v60  ;;  %v7854_v56 = vpop.eup %6191  ;;  %v2670_v36 = vsub.f32 0.0, %v2222_v31  ;;  %6207 = vrcp.f32 %v2284_v27  ;;  %v2270_v45 = vadd.f32 1.0, %v2238_v26  ;;  %v2254_v12 = vmul.f32 0.3275911, %v2222_v31 }
0x1129   :  { %8773 = vst [vmem:[#allocation93_spill] sm:$0xff] %v7852_v25  ;;  %v7856_v23 = vpop.eup %6193  ;;  %6209 = vpow2.f32 %v2752_v4  ;;  %v2724_v22 = vmul.f32 1.442695, %v2686_v9  ;;  %v2223_v60 = vand.u32 2147483647, %v7843_v43  ;;  %v2656_v2 = vsub.f32 0.0, %v2208_v57 }
0x112a   :  { %8774 = vst [vmem:[#allocation94_spill] sm:$0xff] %v7856_v23  ;;  %v7860_v59 = vmul.f32 0.70710677, %v7624_v52  ;;  %6211 = vrcp.f32 %v2285_v5  ;;  %v2209_v8 = vand.u32 2147483647, %v7852_v25  ;;  %v7866_v34 = vpop.eup %6195  ;;  %v2271_v27 = vadd.f32 1.0, %v2239_v7 }
0x112b   :  { %v7864_v10 = vmul.f32 0.70710677, %v7627_v53  ;;  %6213 = vpow2.f32 %v2754_v18  ;;  %v7869_v16 = vmul.f32 0.5, %v7612_v33  ;;  %v2702_v26 = vmul.f32 %v2670_v36, %v2222_v31  ;;  %v7871_v62 = vpop.eup %6197 }
0x112c   :  { %8775 = vst [vmem:[#allocation95_spill] sm:$0xff] %v7860_v59  ;;  %6215 = vrcp.f32 %v2270_v45  ;;  %v2726_v4 = vmul.f32 1.442695, %v2687_v1  ;;  %v7874_v9 = vmul.f32 0.5, %v7614_v41  ;;  %v2240_v5 = vmul.f32 0.3275911, %v2208_v57 }
0x112d   :  { %8776 = vst [vmem:[#allocation96_spill] sm:$0xff] %v7864_v10  ;;  %8777 = vst [vmem:[#allocation97_spill] sm:$0xff] %v7869_v16  ;;  %v2286_v25 = vadd.f32 1.0, %v2254_v12  ;;  %v2671_v23 = vsub.f32 0.0, %v2223_v60  ;;  %v2224_v54 = vand.u32 2147483647, %v7860_v59  ;;  %6217 = vpow2.f32 %v2724_v22 }
0x112e   :  { %8778 = vst [vmem:[#allocation98_spill] sm:$0xff] %v7874_v9  ;;  %v7876_v43 = vpop.eup %6199  ;;  %v7880_v18 = vmul.f32 0.70710677, %v7629_v30  ;;  %v2688_v31 = vmul.f32 %v2656_v2, %v2208_v57  ;;  %v2657_v7 = vsub.f32 0.0, %v2209_v8  ;;  %v2225_v1 = vand.u32 2147483647, %v7864_v10 }
0x112f   :  { %v7882_v33 = vpop.eup %6201  ;;  %6219 = vrcp.f32 %v2271_v27  ;;  %v2756_v41 = vmul.f32 1.442695, %v2702_v26  ;;  %v7888_v45 = vmul.f32 0.5, %v7618_v0  ;;  %v2255_v12 = vmul.f32 0.3275911, %v2223_v60 }
0x1130   :  { %8779 = vst [vmem:[#allocation99_spill] sm:$0xff] %v7880_v18  ;;  %v7885_v36 = vpop.eup %6203  ;;  %6221 = vpow2.f32 %v2726_v4  ;;  %v2272_v9 = vadd.f32 1.0, %v2240_v5  ;;  %v2241_v16 = vmul.f32 0.3275911, %v2209_v8  ;;  %v7891_v59 = vmul.f32 0.70710677, %v7632_v58 }
0x1131   :  { %8780 = vst [vmem:[#allocation100_spill] sm:$0xff] %v7885_v36  ;;  %8781 = vst [vmem:[#allocation101_spill] sm:$0xff] %v7888_v45  ;;  %v7893_v55 = vpop.eup %6205  ;;  %v2703_v2 = vmul.f32 %v2671_v23, %v2223_v60  ;;  %v7896_v57 = vmul.f32 0.5, %v7620_v37  ;;  %v2672_v22 = vsub.f32 0.0, %v2224_v54  ;;  %v2210_v27 = vand.u32 2147483647, %v7880_v18 }
0x1132   :  { %8782 = vst [vmem:[#allocation102_spill] sm:$0xff] %v7891_v59  ;;  %v7899_v26 = vpop.eup %6207  ;;  %6223 = vrcp.f32 %v2286_v25  ;;  %v2728_v0 = vmul.f32 1.442695, %v2688_v31  ;;  %v2689_v45 = vmul.f32 %v2657_v7, %v2209_v8  ;;  %v2673_v4 = vsub.f32 0.0, %v2225_v1 }
0x1133   :  { %8783 = vst [vmem:[#allocation103_spill] sm:$0xff] %v7896_v57  ;;  %v7901_v5 = vpop.eup %6209  ;;  %6225 = vpow2.f32 %v2756_v41  ;;  %v2287_v10 = vadd.f32 1.0, %v2255_v12  ;;  %v7904_v36 = vmul.f32 0.5, %v7622_v42  ;;  %v7907_v60 = vmul.f32 0.70710677, %v7634_v63 }
0x1134   :  { %v7909_v37 = vpop.eup %6211  ;;  %6227 = vrcp.f32 %v2272_v9  ;;  %v2273_v23 = vadd.f32 1.0, %v2241_v16  ;;  %v2256_v57 = vmul.f32 0.3275911, %v2224_v54  ;;  %v2211_v25 = vand.u32 2147483647, %v7891_v59 }
0x1135   :  { %8784 = vst [vmem:[#allocation104_spill] sm:$0xff] %v7904_v36  ;;  %8785 = vst [vmem:[#allocation105_spill] sm:$0xff] %v7907_v60  ;;  %v7912_v31 = vpop.eup %6213  ;;  %v2758_v8 = vmul.f32 1.442695, %v2703_v2  ;;  %v2704_v7 = vmul.f32 %v2672_v22, %v2224_v54  ;;  %v2257_v18 = vmul.f32 0.3275911, %v2225_v1  ;;  %6229 = vpow2.f32 %v2728_v0 }
0x1136   :  { %8786 = vst [vmem:[#allocation106_spill] sm:$0xff] %v7912_v31  ;;  %v2658_v41 = vsub.f32 0.0, %v2210_v27  ;;  %v7914_v12 = vpop.eup %6215  ;;  %v2730_v42 = vmul.f32 1.442695, %v2689_v45  ;;  %v2705_v36 = vmul.f32 %v2673_v4, %v2225_v1  ;;  %v7917_v63 = vmul.f32 0.70710677, %v7637_v11 }
0x1137   :  { %8787 = vst [vmem:[#allocation107_spill] sm:$0xff] %v7914_v12  ;;  %6231 = vrcp.f32 %v2287_v10  ;;  %v2242_v9 = vmul.f32 0.3275911, %v2210_v27  ;;  %v2226_v16 = vand.u32 2147483647, %v7907_v60  ;;  %v7923_v51 = vpop.eup %6217  ;;  %v2288_v54 = vadd.f32 1.0, %v2256_v57 }
0x1138   :  { %8788 = vst [vmem:[#allocation108_spill] sm:$0xff] %v7917_v63  ;;  %v7921_v59 = vmul.f32 0.70710677, %v7639_v13  ;;  %8790 = vst [vmem:[#allocation110_spill] sm:$0xff] %v7923_v51  ;;  %6233 = vrcp.f32 %v2273_v23  ;;  %v2659_v2 = vsub.f32 0.0, %v2211_v25  ;;  %v2289_v0 = vadd.f32 1.0, %v2257_v18 }
0x1139   :  { %v7926_v22 = vmul.f32 0.70710677, %v7642_v14  ;;  %v7928_v45 = vpop.eup %6219  ;;  %6235 = vpow2.f32 %v2758_v8  ;;  %v2760_v1 = vmul.f32 1.442695, %v2704_v7  ;;  %v2690_v10 = vmul.f32 %v2658_v41, %v2210_v27  ;;  %v6032_v7 = vld [vmem:[#allocation34 + $0xe0] sm:$0xff]   ;;  %v6033_v41 = vld [vmem:[#allocation34 + $0x30] sm:$0xff]  }
0x113a   :  { %8789 = vst [vmem:[#allocation109_spill] sm:$0xff] %v7921_v59  ;;  %v7930_v4 = vpop.eup %6221  ;;  %6237 = vpow2.f32 %v2730_v42  ;;  %v2762_v60 = vmul.f32 1.442695, %v2705_v36  ;;  %v2243_v13 = vmul.f32 0.3275911, %v2211_v25  ;;  %v2274_v51 = vadd.f32 1.0, %v2242_v9  ;;  %5634 = vmatprep.subr.bf16.mxu1 %v6032_v7 }
0x113b   :  { %8791 = vst [vmem:[#allocation111_spill] sm:$0xff] %v7926_v22  ;;  %8792 = vst [vmem:[#allocation112_spill] sm:$0xff] %v7930_v4  ;;  %v2212_v12 = vand.u32 2147483647, %v7917_v63  ;;  %v2674_v23 = vsub.f32 0.0, %v2226_v16  ;;  %6239 = vrcp.f32 %v2288_v54  ;;  %v7940_v18 = vmul.f32 0.5, %v7624_v52 }
0x113c   :  { %v2227_v57 = vand.u32 2147483647, %v7921_v59  ;;  %v7935_v44 = vmul.f32 0.70710677, %v7644_v15  ;;  %v7937_v31 = vpop.eup %6223  ;;  %v2691_v27 = vmul.f32 %v2659_v2, %v2211_v25  ;;  %v2213_v8 = vand.u32 2147483647, %v7926_v22 }
0x113d   :  { %8794 = vst [vmem:[#allocation114_spill] sm:$0xff] %v7937_v31  ;;  %8795 = vst [vmem:[#allocation115_spill] sm:$0xff] %v7940_v18  ;;  %v6031_v36 = vld [vmem:[#allocation34 + $0x70] sm:$0xff]   ;;  %v7943_v42 = vpop.eup %6225  ;;  %6241 = vpow2.f32 %v2760_v1  ;;  %v7946_v9 = vmul.f32 0.5, %v7627_v53  ;;  %v2732_v59 = vmul.f32 1.442695, %v2690_v10  ;;  %v2706_v22 = vmul.f32 %v2674_v23, %v2226_v16 }
0x113e   :  { %8793 = vst [vmem:[#allocation113_spill] sm:$0xff] %v7935_v44  ;;  %8796 = vst [vmem:[#allocation116_spill] sm:$0xff] %v7943_v42  ;;  %v2360_v63 = vmul.f32 1.0614054, %v7788_v29  ;;  %v6034_v4 = vld [vmem:[#allocation34 + $0xa0] sm:$0xff]   ;;  %v7949_v54 = vpop.eup %6227  ;;  %6243 = vrcp.f32 %v2289_v0  ;;  %v2275_v52 = vadd.f32 1.0, %v2243_v13  ;;  %5616 = vmatprep.subr.bf16.mxu0 %v6031_v36 }
0x113f   :  { %8797 = vst [vmem:[#allocation117_spill] sm:$0xff] %v7946_v9  ;;  %v2258_v25 = vmul.f32 0.3275911, %v2226_v16  ;;  %v2660_v2 = vsub.f32 0.0, %v2212_v12  ;;  %6245 = vrcp.f32 %v2274_v51  ;;  %v2675_v18 = vsub.f32 0.0, %v2227_v57  ;;  %5617 = vmatpush3.bf16.msra.mxu0 %v6033_v41  ;;  %5635 = vmatpush3.bf16.msra.mxu1 %v6034_v4  ;;  %v7952_v53 = vpop.eup %6229  ;;  %v6038_v31 = vld [vmem:[#allocation34 + $0xa8] sm:$0xff]  }
0x1140   :  { %v2228_v1 = vand.u32 2147483647, %v7935_v44  ;;  %8798 = vst [vmem:[#allocation118_spill] sm:$0xff] %v7952_v53  ;;  %6247 = vpow2.f32 %v2762_v60  ;;  %v7955_v10 = vmul.f32 0.5, %v7629_v30  ;;  %v2734_v42 = vmul.f32 1.442695, %v2691_v27 }
0x1141   :  { %v2661_v0 = vsub.f32 0.0, %v2213_v8  ;;  %v7957_v13 = vpop.eup %6231  ;;  %6249 = vpow2.f32 %v2732_v59  ;;  %v7960_v36 = vmul.f32 0.5, %v7632_v58  ;;  %v2244_v51 = vmul.f32 0.3275911, %v2212_v12  ;;  %v6035_v60 = vld [vmem:[#allocation34 + $0x78] sm:$0xff]   ;;  %v6036_v44 = vld [vmem:[#allocation34 + $0xe8] sm:$0xff]  }
0x1142   :  { %8799 = vst [vmem:[#allocation119_spill] sm:$0xff] %v7955_v10  ;;  %8800 = vst [vmem:[#allocation120_spill] sm:$0xff] %v7957_v13  ;;  %v2392_v16 = vadd.f32 -1.4531521, %v2360_v63  ;;  %v7962_v23 = vpop.eup %6233  ;;  %6251 = vrcp.f32 %v2275_v52  ;;  %v2290_v4 = vadd.f32 1.0, %v2258_v25  ;;  %v2692_v7 = vmul.f32 %v2660_v2, %v2212_v12  ;;  %v6037_v30 = vld [vmem:[#allocation34 + $0x38] sm:$0xff]   ;;  %5618 = vmatprep.subr.bf16.mxu0 %v6035_v60  ;;  %5636 = vmatprep.subr.bf16.mxu1 %v6036_v44 }
0x1143   :  { %8801 = vst [vmem:[#allocation121_spill] sm:$0xff] %v7960_v36  ;;  %v2259_v41 = vmul.f32 0.3275911, %v2227_v57  ;;  %v7964_v10 = vpop.eup %6235  ;;  %v2764_v27 = vmul.f32 1.442695, %v2706_v22  ;;  %v2707_v9 = vmul.f32 %v2675_v18, %v2227_v57  ;;  %v2676_v59 = vsub.f32 0.0, %v2228_v1  ;;  %5619 = vmatpush3.bf16.msra.mxu0 %v6037_v30  ;;  %5637 = vmatpush3.bf16.msra.mxu1 %v6038_v31 }
0x1144   :  { %8802 = vst [vmem:[#allocation122_spill] sm:$0xff] %v7964_v10  ;;  %v2245_v13 = vmul.f32 0.3275911, %v2213_v8  ;;  %v7966_v58 = vpop.eup %6237  ;;  %6253 = vpow2.f32 %v2734_v42  ;;  %v2693_v63 = vmul.f32 %v2661_v0, %v2213_v8  ;;  %v7969_v36 = vmul.f32 0.70710677, %v7646_v48  ;;  %v6039_v52 = vld [vmem:[#allocation34 + $0xf0] sm:$0xff]  }
0x1145   :  { %8803 = vst [vmem:[#allocation123_spill] sm:$0xff] %v7966_v58  ;;  %v2364_v12 = vmul.f32 1.0614054, %v7866_v34  ;;  %v6040_v25 = vld [vmem:[#allocation34 + $0x140] sm:$0xff]   ;;  %v2276_v2 = vadd.f32 1.0, %v2244_v51  ;;  %v2424_v57 = vmul.f32 %v7788_v29, %v2392_v16  ;;  %v6041_v8 = vld [vmem:[#allocation34 + $0xb0] sm:$0xff]   ;;  %v7977_v42 = vpop.eup %6239  ;;  %6255 = vrcp.f32 %v2290_v4  ;;  %5638 = vmatprep.subr.bf16.mxu1 %v6039_v52 }
0x1146   :  { %8804 = vst [vmem:[#allocation124_spill] sm:$0xff] %v7969_v36  ;;  %v7973_v22 = vmul.f32 0.70710677, %v7649_v17  ;;  %v2361_v18 = vmul.f32 1.0614054, %v7794_v50  ;;  %v7980_v60 = vmul.f32 0.5, %v7637_v11  ;;  %5648 = vmatprep.subr.bf16.mxu0 %v6040_v25  ;;  %6257 = vpow2.f32 %v2764_v27 }
0x1147   :  { %v2736_v0 = vmul.f32 1.442695, %v2692_v7  ;;  %v2291_v44 = vadd.f32 1.0, %v2259_v41  ;;  %v7982_v51 = vpop.eup %6241  ;;  %v2766_v17 = vmul.f32 1.442695, %v2707_v9  ;;  %v2277_v16 = vadd.f32 1.0, %v2245_v13  ;;  %5639 = vmatpush3.bf16.msra.mxu1 %v6041_v8 }
0x1148   :  { %8805 = vst [vmem:[#allocation125_spill] sm:$0xff] %v7973_v22  ;;  %8806 = vst [vmem:[#allocation126_spill] sm:$0xff] %v7980_v60  ;;  %v2260_v10 = vmul.f32 0.3275911, %v2228_v1  ;;  %v7984_v58 = vpop.eup %6243  ;;  %v2738_v31 = vmul.f32 1.442695, %v2693_v63  ;;  %v2708_v30 = vmul.f32 %v2676_v59, %v2228_v1  ;;  %6259 = vrcp.f32 %v2276_v2 }
0x1149   :  { %v2229_v53 = vand.u32 2147483647, %v7969_v36  ;;  %v2396_v4 = vadd.f32 -1.4531521, %v2364_v12  ;;  %v7987_v7 = vpop.eup %6245  ;;  %v2214_v11 = vand.u32 2147483647, %v7973_v22  ;;  %6261 = vrcp.f32 %v2291_v44 }
0x114a   :  { %8807 = vst [vmem:[#allocation127_spill] sm:$0xff] %v7987_v7  ;;  %v2456_v41 = vadd.f32 1.4214138, %v2424_v57  ;;  %v2393_v52 = vadd.f32 -1.4531521, %v2361_v18  ;;  %v7990_v25 = vpop.eup %6247  ;;  %v6043_v1 = vld [vmem:[#allocation34 + $0xf8] sm:$0xff]   ;;  %6263 = vpow2.f32 %v2736_v0 }
0x114b   :  { %v7993_v9 = vmul.f32 0.70710677, %v7652_v19  ;;  %v2365_v13 = vmul.f32 1.0614054, %v7882_v33  ;;  %v6045_v27 = vld [vmem:[#allocation34 + $0xb8] sm:$0xff]   ;;  %v7996_v59 = vpop.eup %6249  ;;  %v7999_v63 = vmul.f32 0.5, %v7642_v14  ;;  %6265 = vpow2.f32 %v2766_v17  ;;  %5640 = vmatprep.subr.bf16.mxu1 %v6043_v1 }
0x114c   :  { %8809 = vst [vmem:[#allocation129_spill] sm:$0xff] %v7996_v59  ;;  %v2292_v12 = vadd.f32 1.0, %v2260_v10  ;;  %v2376_v2 = vmul.f32 1.0614054, %v7807_v38  ;;  %v8002_v57 = vpop.eup %6251  ;;  %v2768_v18 = vmul.f32 1.442695, %v2708_v30  ;;  %v2428_v44 = vmul.f32 %v7866_v34, %v2396_v4  ;;  %5641 = vmatpush3.bf16.msra.mxu1 %v6045_v27 }
0x114d   :  { %8808 = vst [vmem:[#allocation128_spill] sm:$0xff] %v7993_v9  ;;  %8810 = vst [vmem:[#allocation130_spill] sm:$0xff] %v7999_v63  ;;  %v8005_v8 = vmul.f32 0.5, %v7644_v15  ;;  %v6048_v19 = vld [vmem:[#allocation34 + $0x1c0] sm:$0xff]   ;;  %6267 = vrcp.f32 %v2277_v16  ;;  %v2677_v22 = vsub.f32 0.0, %v2229_v53  ;;  %v2488_v0 = vmul.f32 %v7788_v29, %v2456_v41 }
0x114e   :  { %8811 = vst [vmem:[#allocation131_spill] sm:$0xff] %v8002_v57  ;;  %v2425_v14 = vmul.f32 %v7794_v50, %v2393_v52  ;;  %v8010_v10 = vpop.eup %6253  ;;  %6269 = vpow2.f32 %v2738_v31  ;;  %v2662_v63 = vsub.f32 0.0, %v2214_v11  ;;  %v2215_v17 = vand.u32 2147483647, %v7993_v9  ;;  %5670 = vmatprep.subr.bf16.mxu1 %v6048_v19 }
0x114f   :  { %8812 = vst [vmem:[#allocation132_spill] sm:$0xff] %v8005_v8  ;;  %8813 = vst [vmem:[#allocation133_spill] sm:$0xff] %v8010_v10  ;;  %v2397_v30 = vadd.f32 -1.4531521, %v2365_v13  ;;  %6271 = vrcp.f32 %v2292_v12  ;;  %v2261_v15 = vmul.f32 0.3275911, %v2229_v53  ;;  %v8016_v1 = vpop.eup %6255  ;;  %v2709_v31 = vmul.f32 %v2677_v22, %v2229_v53 }
0x1150   :  { %v8014_v4 = vmul.f32 0.5, %v7646_v48  ;;  %v2408_v16 = vadd.f32 -1.4531521, %v2376_v2  ;;  %8815 = vst [vmem:[#allocation135_spill] sm:$0xff] %v8016_v1  ;;  %6273 = vpow2.f32 %v2768_v18  ;;  %v2246_v41 = vmul.f32 0.3275911, %v2214_v11  ;;  %v8019_v8 = vpop.eup %6257 }
0x1151   :  { %v2460_v52 = vadd.f32 1.4214138, %v2428_v44  ;;  %v2380_v27 = vmul.f32 1.0614054, %v7899_v26  ;;  %8816 = vst [vmem:[#allocation136_spill] sm:$0xff] %v8019_v8  ;;  %v2694_v12 = vmul.f32 %v2662_v63, %v2214_v11  ;;  %v2663_v10 = vsub.f32 0.0, %v2215_v17 }
0x1152   :  { %8814 = vst [vmem:[#allocation134_spill] sm:$0xff] %v8014_v4  ;;  %v8022_v9 = vmul.f32 0.70710677, %v7655_v49  ;;  %v2520_v19 = vadd.f32 -0.28449672, %v2488_v0  ;;  %v2429_v2 = vmul.f32 %v7882_v33, %v2397_v30  ;;  %v8028_v18 = vpop.eup %6259  ;;  %v2293_v44 = vadd.f32 1.0, %v2261_v15 }
0x1153   :  { %v2457_v13 = vadd.f32 1.4214138, %v2425_v14  ;;  %v8025_v48 = vmul.f32 0.70710677, %v7657_v20  ;;  %v2440_v4 = vmul.f32 %v7807_v38, %v2408_v16  ;;  %v2377_v8 = vmul.f32 1.0614054, %v7818_v40  ;;  %v8033_v22 = vpop.eup %6261 }
0x1154   :  { %8817 = vst [vmem:[#allocation137_spill] sm:$0xff] %v8022_v9  ;;  %v2381_v53 = vmul.f32 1.0614054, %v7909_v37  ;;  %8819 = vst [vmem:[#allocation139_spill] sm:$0xff] %v8033_v22  ;;  %v2278_v0 = vadd.f32 1.0, %v2246_v41  ;;  %v2492_v11 = vmul.f32 %v7866_v34, %v2460_v52  ;;  %v8036_v20 = vpop.eup %6263  ;;  %v2552_v15 = vmul.f32 %v7788_v29, %v2520_v19 }
0x1155   :  { %8818 = vst [vmem:[#allocation138_spill] sm:$0xff] %v8025_v48  ;;  %v2247_v14 = vmul.f32 0.3275911, %v2215_v17  ;;  %v2412_v63 = vadd.f32 -1.4531521, %v2380_v27  ;;  %8820 = vst [vmem:[#allocation140_spill] sm:$0xff] %v8036_v20  ;;  %v2489_v16 = vmul.f32 %v7794_v50, %v2457_v13  ;;  %v8041_v59 = vpop.eup %6265  ;;  %v2695_v36 = vmul.f32 %v2663_v10, %v2215_v17 }
0x1156   :  { %v2770_v49 = vmul.f32 1.442695, %v2709_v31  ;;  %v2230_v30 = vand.u32 2147483647, %v8022_v9  ;;  %8821 = vst [vmem:[#allocation141_spill] sm:$0xff] %v8041_v59  ;;  %6275 = vrcp.f32 %v2293_v44  ;;  %vm2845_vm11 = vcmp.ge.f32.partialorder %v7769_v61, 0.0 }
0x1157   :  { %v2740_v60 = vmul.f32 1.442695, %v2694_v12  ;;  %v2231_v22 = vand.u32 2147483647, %v8025_v48  ;;  %v2461_v41 = vadd.f32 1.4214138, %v2429_v2  ;;  %v8044_v1 = vpop.eup %6267  ;;  %6277 = vrcp.f32 %v2278_v0 }
0x1158   :  { %v2472_v52 = vadd.f32 1.4214138, %v2440_v4  ;;  %v2409_v27 = vadd.f32 -1.4531521, %v2377_v8  ;;  %v2413_v20 = vadd.f32 -1.4531521, %v2381_v53  ;;  %v8046_v31 = vpop.eup %6269  ;;  %v2444_v13 = vmul.f32 %v7899_v26, %v2412_v63 }
0x1159   :  { %8822 = vst [vmem:[#allocation142_spill] sm:$0xff] %v8046_v31  ;;  %v2279_v9 = vadd.f32 1.0, %v2247_v14  ;;  %v2524_v19 = vadd.f32 -0.28449672, %v2492_v11  ;;  %v8049_v57 = vpop.eup %6271  ;;  %6279 = vpow2.f32 %v2770_v49  ;;  %v2262_v10 = vmul.f32 0.3275911, %v2230_v30 }
0x115a   :  { %v2584_v17 = vadd.f32 0.2548296, %v2552_v15  ;;  %v2521_v12 = vadd.f32 -0.28449672, %v2489_v16  ;;  %v8051_v2 = vpop.eup %6273  ;;  %6281 = vpow2.f32 %v2740_v60  ;;  %v2742_v44 = vmul.f32 1.442695, %v2695_v36 }
0x115b   :  { %8823 = vst [vmem:[#allocation143_spill] sm:$0xff] %v8051_v2  ;;  %v2678_v4 = vsub.f32 0.0, %v2230_v30  ;;  %v2493_v8 = vmul.f32 %v7882_v33, %v2461_v41  ;;  %v2679_v53 = vsub.f32 0.0, %v2231_v22  ;;  %v2504_v0 = vmul.f32 %v7807_v38, %v2472_v52 }
0x115c   :  { %v2441_v14 = vmul.f32 %v7818_v40, %v2409_v27  ;;  %v2445_v11 = vmul.f32 %v7909_v37, %v2413_v20  ;;  %6283 = vrcp.f32 %v2279_v9  ;;  %v2556_v49 = vmul.f32 %v7866_v34, %v2524_v19 }
0x115d   :  { %v2476_v63 = vadd.f32 1.4214138, %v2444_v13  ;;  %v2362_v15 = vmul.f32 1.0614054, %v7829_v39  ;;  %v2294_v16 = vadd.f32 1.0, %v2262_v10  ;;  %v2616_v60 = vmul.f32 %v7788_v29, %v2584_v17 }
0x115e   :  { %v2553_v36 = vmul.f32 %v7794_v50, %v2521_v12  ;;  %v2368_v41 = vmul.f32 1.0614054, %v7949_v54  ;;  %6285 = vpow2.f32 %v2742_v44  ;;  %v2710_v48 = vmul.f32 %v2678_v4, %v2230_v30 }
0x115f   :  { %v2263_v52 = vmul.f32 0.3275911, %v2231_v22  ;;  %v2525_v59 = vadd.f32 -0.28449672, %v2493_v8  ;;  %v2711_v27 = vmul.f32 %v2679_v53, %v2231_v22  ;;  %v2536_v2 = vadd.f32 -0.28449672, %v2504_v0 }
0x1160   :  { %v2473_v20 = vadd.f32 1.4214138, %v2441_v14  ;;  %v2477_v9 = vadd.f32 1.4214138, %v2445_v11  ;;  %v2588_v31 = vadd.f32 0.2548296, %v2556_v49  ;;  %v2508_v19 = vmul.f32 %v7899_v26, %v2476_v63  ;;  %v8064_v7 = vpop.eup %6275 }
0x1161   :  { %v2394_v13 = vadd.f32 -1.4531521, %v2362_v15  ;;  %v2363_v10 = vmul.f32 1.0614054, %v7838_v35  ;;  %6287 = vrcp.f32 %v2294_v16  ;;  %v8067_v29 = vmul.f32 %v7799_v47, %v2616_v60  ;;  %v8069_v12 = vpop.eup %6277 }
0x1162   :  { %v2585_v17 = vadd.f32 0.2548296, %v2553_v36  ;;  %v2400_v30 = vadd.f32 -1.4531521, %v2368_v41  ;;  %v2772_v22 = vmul.f32 1.442695, %v2710_v48  ;;  %v2557_v4 = vmul.f32 %v7882_v33, %v2525_v59 }
0x1163   :  { %v2295_v44 = vadd.f32 1.0, %v2263_v52  ;;  %v2369_v8 = vmul.f32 1.0614054, %v7962_v23  ;;  %v8073_v53 = vpop.eup %6279  ;;  %v2774_v0 = vmul.f32 1.442695, %v2711_v27  ;;  %v2568_v14 = vmul.f32 %v7807_v38, %v2536_v2 }
0x1164   :  { %v2505_v11 = vmul.f32 %v7818_v40, %v2473_v20  ;;  %v2509_v47 = vmul.f32 %v7909_v37, %v2477_v9  ;;  %v8078_v49 = vpop.eup %6281  ;;  %v2620_v63 = vmul.f32 %v7866_v34, %v2588_v31  ;;  %v2540_v15 = vadd.f32 -0.28449672, %v2508_v19 }
0x1165   :  { %v2426_v48 = vmul.f32 %v7829_v39, %v2394_v13  ;;  %v2395_v16 = vadd.f32 -1.4531521, %v2363_v10  ;;  %v2808_v59 = vsub.f32 1.0, %v8067_v29  ;;  %v2617_v60 = vmul.f32 %v7794_v50, %v2585_v17 }
0x1166   :  { %v2432_v36 = vmul.f32 %v7949_v54, %v2400_v30  ;;  %v2378_v2 = vmul.f32 1.0614054, %v7854_v56  ;;  %v8086_v41 = vpop.eup %6283  ;;  %6289 = vpow2.f32 %v2772_v22  ;;  %v2589_v52 = vadd.f32 0.2548296, %v2557_v4 }
0x1167   :  { %v2401_v27 = vadd.f32 -1.4531521, %v2369_v8  ;;  %v2384_v34 = vmul.f32 1.0614054, %v7977_v42  ;;  %6291 = vrcp.f32 %v2295_v44  ;;  %v2600_v31 = vadd.f32 0.2548296, %v2568_v14 }
0x1168   :  { %v2537_v20 = vadd.f32 -0.28449672, %v2505_v11  ;;  %v2541_v9 = vadd.f32 -0.28449672, %v2509_v47  ;;  %v8090_v19 = vpop.eup %6285  ;;  %6293 = vpow2.f32 %v2774_v0  ;;  %v2780_v50 = vmul.f32 %v7871_v62, %v2620_v63 }
0x1169   :  { %v2458_v13 = vadd.f32 1.4214138, %v2426_v48  ;;  %v2427_v10 = vmul.f32 %v7838_v35, %v2395_v16  ;;  %v2777_v29 = vmul.f32 %v7802_v21, %v2617_v60  ;;  %v2572_v17 = vmul.f32 %v7899_v26, %v2540_v15 }
0x116a   :  { %v2464_v30 = vadd.f32 1.4214138, %v2432_v36  ;;  %v2410_v22 = vadd.f32 -1.4531521, %v2378_v2  ;;  %v2621_v4 = vmul.f32 %v7882_v33, %v2589_v52  ;;  %v2433_v44 = vmul.f32 %v7962_v23, %v2401_v27 }
0x116b   :  { %v2416_v8 = vadd.f32 -1.4531521, %v2384_v34  ;;  %v2379_v14 = vmul.f32 1.0614054, %v7876_v43  ;;  %v8099_v11 = vpop.eup %6287  ;;  %v2872_v62 = vsub.f32 0.0, %v2808_v59  ;;  %v2632_v0 = vmul.f32 %v7807_v38, %v2600_v31 }
0x116c   :  { %v2569_v21 = vmul.f32 %v7818_v40, %v2537_v20  ;;  %v2573_v47 = vmul.f32 %v7909_v37, %v2541_v9  ;;  %v2812_v63 = vsub.f32 1.0, %v2780_v50  ;;  %v2490_v33 = vmul.f32 %v7829_v39, %v2458_v13 }
0x116d   :  { %v2459_v15 = vadd.f32 1.4214138, %v2427_v10  ;;  %v2385_v48 = vmul.f32 1.0614054, %v7984_v58  ;;  %v2809_v16 = vsub.f32 1.0, %v2777_v29  ;;  %v2496_v36 = vmul.f32 %v7949_v54, %v2464_v30 }
0x116e   :  { %v2604_v60 = vadd.f32 0.2548296, %v2572_v17  ;;  %v2442_v2 = vmul.f32 %v7854_v56, %v2410_v22  ;;  %v2781_v38 = vmul.f32 %v7893_v55, %v2621_v4  ;;  %v2465_v52 = vadd.f32 1.4214138, %v2433_v44 }
0x116f   :  { %v2448_v27 = vmul.f32 %v7977_v42, %v2416_v8  ;;  %v2411_v34 = vadd.f32 -1.4531521, %v2379_v14  ;;  %v2904_v31 = vsel %vm2840_vm8, %v2808_v59, %v2872_v62  ;;  %v2792_v20 = vmul.f32 %v7810_v32, %v2632_v0 }
0x1170   :  { %v2601_v9 = vadd.f32 0.2548296, %v2569_v21  ;;  %v2605_v50 = vadd.f32 0.2548296, %v2573_v47  ;;  %v8115_v13 = vpop.eup %6289  ;;  %v2876_v10 = vsub.f32 0.0, %v2812_v63  ;;  %v2491_v17 = vmul.f32 %v7838_v35, %v2459_v15 }
0x1171   :  { %8824 = vst [vmem:[#allocation144_spill] sm:$0xff] %v8115_v13  ;;  %v2522_v29 = vadd.f32 -0.28449672, %v2490_v33  ;;  %v2417_v30 = vadd.f32 -1.4531521, %v2385_v48  ;;  %v8118_v22 = vpop.eup %6291  ;;  %v2873_v55 = vsub.f32 0.0, %v2809_v16  ;;  %v2636_v4 = vmul.f32 %v7899_v26, %v2604_v60 }
0x1172   :  { %v2528_v24 = vadd.f32 -0.28449672, %v2496_v36  ;;  %v2474_v59 = vadd.f32 1.4214138, %v2442_v2  ;;  %v8122_v44 = vpop.eup %6293  ;;  %v2813_v32 = vsub.f32 1.0, %v2781_v38  ;;  %v2497_v8 = vmul.f32 %v7962_v23, %v2465_v52 }
0x1173   :  { %8825 = vst [vmem:[#allocation145_spill] sm:$0xff] %v8122_v44  ;;  %v2480_v14 = vadd.f32 1.4214138, %v2448_v27  ;;  %v2443_v62 = vmul.f32 %v7876_v43, %v2411_v34  ;;  %v2968_v0 = vadd.f32 1.0, %v2904_v31  ;;  %v2824_v21 = vsub.f32 1.0, %v2792_v20  ;;  %v8826_v20 = vld [vmem:[#allocation106_spill] sm:$0xff] }
0x1174   :  { %v2633_v47 = vmul.f32 %v7818_v40, %v2601_v9  ;;  %v2637_v33 = vmul.f32 %v7909_v37, %v2605_v50  ;;  %v2908_v26 = vsel %vm2844_vm9, %v2812_v63, %v2876_v10  ;;  %v2554_v15 = vmul.f32 %v7829_v39, %v2522_v29  ;;  %v8827_v50 = vld [vmem:[#allocation76_spill] sm:$0xff]  ;;  %v8828_v29 = vld [vmem:[#allocation69_spill] sm:$0xff] }
0x1175   :  { %v2523_v48 = vadd.f32 -0.28449672, %v2491_v17  ;;  %v2449_v60 = vmul.f32 %v7984_v58, %v2417_v30  ;;  %v2905_v36 = vsel %vm2841_vm10, %v2809_v16, %v2873_v55  ;;  %v2796_v2 = vmul.f32 %v7901_v5, %v2636_v4 }
0x1176   :  { %v2560_v38 = vmul.f32 %v7949_v54, %v2528_v24  ;;  %v2506_v52 = vmul.f32 %v7854_v56, %v2474_v59  ;;  %v2877_v40 = vsub.f32 0.0, %v2813_v32  ;;  %v2529_v27 = vadd.f32 -0.28449672, %v2497_v8  ;;  %v8829_v24 = vld [vmem:[#allocation66_spill] sm:$0xff] }
0x1177   :  { %v2512_v37 = vmul.f32 %v7977_v42, %v2480_v14  ;;  %v2475_v3 = vadd.f32 1.4214138, %v2443_v62  ;;  %v2972_v63 = vadd.f32 1.0, %v2908_v26  ;;  %v2888_v34 = vsub.f32 0.0, %v2824_v21  ;;  %v8830_v59 = vld [vmem:[#allocation78_spill] sm:$0xff] }
0x1178   :  { %v2793_v31 = vmul.f32 %v7827_v6, %v2633_v47  ;;  %v2797_v9 = vmul.f32 %v8826_v20, %v2637_v33  ;;  %vm2860_vm13 = vcmp.ge.f32.partialorder %v8827_v50, 0.0  ;;  %v2969_v28 = vadd.f32 1.0, %v2905_v36  ;;  %v8831_v47 = vld [vmem:[#allocation81_spill] sm:$0xff] }
0x1179   :  { %v2586_v16 = vadd.f32 0.2548296, %v2554_v15  ;;  %v2555_v5 = vmul.f32 %v7838_v35, %v2523_v48  ;;  %v2481_v10 = vadd.f32 1.4214138, %v2449_v60  ;;  %v8144_v17 = vmul.f32 %v2968_v0, %v8828_v29  ;;  %v8832_v48 = vld [vmem:[#allocation71_spill] sm:$0xff]  ;;  %v8834_v20 = vld [vmem:[#allocation89_spill] sm:$0xff] }
0x117a   :  { %v2828_v30 = vsub.f32 1.0, %v2796_v2  ;;  %v2592_v55 = vadd.f32 0.2548296, %v2560_v38  ;;  %v2538_v4 = vadd.f32 -0.28449672, %v2506_v52  ;;  %vm2857_vm14 = vcmp.ge.f32.partialorder %v8829_v24, 0.0 }
0x117b   :  { %vm2861_vm15 = vcmp.ge.f32.partialorder %v8830_v59, 0.0  ;;  %v2909_v6 = vsel %vm2845_vm11, %v2813_v32, %v2877_v40  ;;  %v2561_v8 = vmul.f32 %v7962_v23, %v2529_v27  ;;  %v2544_v14 = vadd.f32 -0.28449672, %v2512_v37 }
0x117c   :  { %v2507_v62 = vmul.f32 %v7876_v43, %v2475_v3  ;;  %v8153_v33 = vmul.f32 %v2972_v63, %v8831_v47  ;;  %v2920_v0 = vsel %vm2856_vm12, %v2824_v21, %v2888_v34  ;;  %v2825_v26 = vsub.f32 1.0, %v2793_v31  ;;  %v8833_v34 = vld [vmem:[#allocation107_spill] sm:$0xff] }
0x117d   :  { %v2829_v15 = vsub.f32 1.0, %v2797_v9  ;;  %v8158_v60 = vmul.f32 %v2969_v28, %v8832_v48  ;;  %v2618_v36 = vmul.f32 %v7829_v39, %v2586_v16  ;;  %v2587_v61 = vadd.f32 0.2548296, %v2555_v5  ;;  %v8835_v5 = vld [vmem:[#allocation84_spill] sm:$0xff] }
0x117e   :  { %v2513_v32 = vmul.f32 %v7984_v58, %v2481_v10  ;;  %v2973_v2 = vadd.f32 1.0, %v2909_v6  ;;  %v2892_v38 = vsub.f32 0.0, %v2828_v30  ;;  %v2624_v52 = vmul.f32 %v7949_v54, %v2592_v55  ;;  %v8836_v55 = vld [vmem:[#allocation118_spill] sm:$0xff] }
0x117f   :  { %v2570_v40 = vmul.f32 %v7854_v56, %v2538_v4  ;;  %v2984_v27 = vadd.f32 1.0, %v2920_v0  ;;  %v2593_v37 = vadd.f32 0.2548296, %v2561_v8  ;;  %v2576_v46 = vmul.f32 %v7977_v42, %v2544_v14  ;;  %v8837_v8 = vld [vmem:[#allocation72_spill] sm:$0xff]  ;;  %v8838_v0 = vld [vmem:[#allocation67_spill] sm:$0xff] }
0x1180   :  { %v2539_v21 = vadd.f32 -0.28449672, %v2507_v62  ;;  %v2889_v3 = vsub.f32 0.0, %v2825_v26  ;;  %v2893_v63 = vsub.f32 0.0, %v2829_v15  ;;  %v2366_v31 = vmul.f32 1.0614054, %v8833_v34 }
0x1181   :  { %v2372_v39 = vmul.f32 1.0614054, %v8028_v18  ;;  %v2778_v9 = vmul.f32 %v8834_v20, %v2618_v36  ;;  %v2619_v28 = vmul.f32 %v7838_v35, %v2587_v61  ;;  %v2545_v16 = vadd.f32 -0.28449672, %v2513_v32  ;;  %v8839_v61 = vld [vmem:[#allocation88_spill] sm:$0xff] }
0x1182   :  { %v2367_v54 = vmul.f32 1.0614054, %v7928_v45  ;;  %v8171_v10 = vmul.f32 %v2973_v2, %v8835_v5  ;;  %v2924_v29 = vsel %vm2860_vm13, %v2828_v30, %v2892_v38  ;;  %v2784_v4 = vmul.f32 %v8836_v55, %v2624_v52  ;;  %v8840_v2 = vld [vmem:[#allocation91_spill] sm:$0xff]  ;;  %v8844_v5 = vld [vmem:[#allocation86_spill] sm:$0xff] }
0x1183   :  { %v2602_v6 = vadd.f32 0.2548296, %v2570_v40  ;;  %v8177_v14 = vmul.f32 %v2984_v27, %v8837_v8  ;;  %v2625_v62 = vmul.f32 %v7962_v23, %v2593_v37  ;;  %v2608_v47 = vadd.f32 0.2548296, %v2576_v46  ;;  %v8841_v46 = vld [vmem:[#allocation123_spill] sm:$0xff]  ;;  %v8846_v8 = vld [vmem:[#allocation93_spill] sm:$0xff] }
0x1184   :  { %v2571_v35 = vmul.f32 %v7876_v43, %v2539_v21  ;;  %vm2842_vm1 = vcmp.ge.f32.partialorder %v8838_v0, 0.0  ;;  %v2921_v48 = vsel %vm2857_vm14, %v2825_v26, %v2889_v3  ;;  %v2925_v50 = vsel %vm2861_vm15, %v2829_v15, %v2893_v63 }
0x1185   :  { %v2398_v30 = vadd.f32 -1.4531521, %v2366_v31  ;;  %v2404_v36 = vadd.f32 -1.4531521, %v2372_v39  ;;  %vm2848_vm2 = vcmp.ge.f32.partialorder %v8839_v61, 0.0  ;;  %v2810_v32 = vsub.f32 1.0, %v2778_v9 }
0x1186   :  { %v2779_v38 = vmul.f32 %v8840_v2, %v2619_v28  ;;  %v2577_v23 = vmul.f32 %v7984_v58, %v2545_v16  ;;  %v2399_v52 = vadd.f32 -1.4531521, %v2367_v54  ;;  %v2988_v40 = vadd.f32 1.0, %v2924_v29  ;;  %v8842_v39 = vld [vmem:[#allocation114_spill] sm:$0xff]  ;;  %v8843_v9 = vld [vmem:[#allocation68_spill] sm:$0xff] }
0x1187   :  { %v2816_v27 = vsub.f32 1.0, %v2784_v4  ;;  %v2634_v37 = vmul.f32 %v7854_v56, %v2602_v6  ;;  %v2373_v24 = vmul.f32 1.0614054, %v8044_v1  ;;  %v2985_v26 = vadd.f32 1.0, %v2921_v48 }
0x1188   :  { %v2785_v59 = vmul.f32 %v8841_v46, %v2625_v62  ;;  %v2640_v15 = vmul.f32 %v7977_v42, %v2608_v47  ;;  %v2603_v21 = vadd.f32 0.2548296, %v2571_v35  ;;  %v2989_v3 = vadd.f32 1.0, %v2925_v50  ;;  %v8845_v42 = vld [vmem:[#allocation94_spill] sm:$0xff]  ;;  %v8847_v62 = vld [vmem:[#allocation73_spill] sm:$0xff]  ;;  %v8850_v46 = vld [vmem:[#allocation95_spill] sm:$0xff] }
0x1189   :  { %v2430_v63 = vmul.f32 %v8833_v34, %v2398_v30  ;;  %v2436_v31 = vmul.f32 %v8028_v18, %v2404_v36  ;;  %v2382_v20 = vmul.f32 1.0614054, %v8842_v39  ;;  %vm2843_vm5 = vcmp.ge.f32.partialorder %v8843_v9, 0.0  ;;  %v8848_v30 = vld [vmem:[#allocation87_spill] sm:$0xff] }
0x118a   :  { %v2874_v28 = vsub.f32 0.0, %v2810_v32  ;;  %v2811_v16 = vsub.f32 1.0, %v2779_v38  ;;  %v2609_v56 = vadd.f32 0.2548296, %v2577_v23  ;;  %v2431_v54 = vmul.f32 %v7928_v45, %v2399_v52  ;;  %v8849_v52 = vld [vmem:[#allocation70_spill] sm:$0xff] }
0x118b   :  { %v8199_v29 = vmul.f32 %v2988_v40, %v8844_v5  ;;  %v2880_v55 = vsub.f32 0.0, %v2816_v27  ;;  %v2794_v4 = vmul.f32 %v8845_v42, %v2634_v37  ;;  %v2405_v6 = vadd.f32 -1.4531521, %v2373_v24 }
0x118c   :  { %vm2849_vm6 = vcmp.ge.f32.partialorder %v8846_v8, 0.0  ;;  %v8204_v47 = vmul.f32 %v2985_v26, %v8847_v62  ;;  %v2817_v35 = vsub.f32 1.0, %v2785_v59  ;;  %v2800_v48 = vmul.f32 %v7982_v51, %v2640_v15  ;;  %v8853_v62 = vld [vmem:[#allocation74_spill] sm:$0xff] }
0x118d   :  { %v2635_v50 = vmul.f32 %v7876_v43, %v2603_v21  ;;  %v8209_v36 = vmul.f32 %v2989_v3, %v8848_v30  ;;  %v2462_v2 = vadd.f32 1.4214138, %v2430_v63  ;;  %v2468_v38 = vadd.f32 1.4214138, %v2436_v31  ;;  %v8851_v3 = vld [vmem:[#allocation100_spill] sm:$0xff] }
0x118e   :  { %v2414_v23 = vadd.f32 -1.4531521, %v2382_v20  ;;  %vm2858_vm7 = vcmp.ge.f32.partialorder %v8849_v52, 0.0  ;;  %v2906_v40 = vsel %vm2842_vm1, %v2810_v32, %v2874_v28  ;;  %v2875_v37 = vsub.f32 0.0, %v2811_v16  ;;  %v8852_v31 = vld [vmem:[#allocation120_spill] sm:$0xff] }
0x118f   :  { %v2641_v24 = vmul.f32 %v7984_v58, %v2609_v56  ;;  %v2463_v26 = vadd.f32 1.4214138, %v2431_v54  ;;  %vm2864_vm8 = vcmp.ge.f32.partialorder %v8850_v46, 0.0  ;;  %v2912_v43 = vsel %vm2848_vm2, %v2816_v27, %v2880_v55 }
0x1190   :  { %v2826_v51 = vsub.f32 1.0, %v2794_v4  ;;  %v2437_v59 = vmul.f32 %v8044_v1, %v2405_v6  ;;  %v2388_v15 = vmul.f32 1.0614054, %v8049_v57  ;;  %v2832_v21 = vsub.f32 1.0, %v2800_v48 }
0x1191   :  { %v2795_v63 = vmul.f32 %v8851_v3, %v2635_v50  ;;  %v2383_v0 = vmul.f32 1.0614054, %v8852_v31  ;;  %v2389_v32 = vmul.f32 1.0614054, %v8064_v7  ;;  %v2881_v20 = vsub.f32 0.0, %v2817_v35 }
0x1192   :  { %v2494_v58 = vmul.f32 %v8833_v34, %v2462_v2  ;;  %v2500_v28 = vmul.f32 %v8028_v18, %v2468_v38  ;;  %v2446_v61 = vmul.f32 %v8842_v39, %v2414_v23  ;;  %v2970_v27 = vadd.f32 1.0, %v2906_v40  ;;  %v8854_v38 = vld [vmem:[#allocation96_spill] sm:$0xff] }
0x1193   :  { %v2976_v56 = vadd.f32 1.0, %v2912_v43  ;;  %v2801_v54 = vmul.f32 %v7990_v25, %v2641_v24  ;;  %v2495_v5 = vmul.f32 %v7928_v45, %v2463_v26  ;;  %v2907_v55 = vsel %vm2843_vm5, %v2811_v16, %v2875_v37  ;;  %v8855_v26 = vld [vmem:[#allocation75_spill] sm:$0xff] }
0x1194   :  { %v2890_v42 = vsub.f32 0.0, %v2826_v51  ;;  %v2469_v4 = vadd.f32 1.4214138, %v2437_v59  ;;  %v2420_v6 = vadd.f32 -1.4531521, %v2388_v15  ;;  %vm2859_vm9 = vcmp.ge.f32.partialorder %v8853_v62, 0.0 }
0x1195   :  { %v2896_v48 = vsub.f32 0.0, %v2832_v21  ;;  %v2827_v50 = vsub.f32 1.0, %v2795_v63  ;;  %v2415_v30 = vadd.f32 -1.4531521, %v2383_v0  ;;  %v2421_v2 = vadd.f32 -1.4531521, %v2389_v32 }
0x1196   :  { %vm2865_vm10 = vcmp.ge.f32.partialorder %v8854_v38, 0.0  ;;  %v2913_v23 = vsel %vm2849_vm6, %v2817_v35, %v2881_v20  ;;  %v2526_v25 = vadd.f32 -0.28449672, %v2494_v58  ;;  %v2532_v40 = vadd.f32 -0.28449672, %v2500_v28  ;;  %v8856_v59 = vld [vmem:[#allocation101_spill] sm:$0xff] }
0x1197   :  { %v2478_v24 = vadd.f32 1.4214138, %v2446_v61  ;;  %v8235_v9 = vmul.f32 %v2970_v27, %v8855_v26  ;;  %v2971_v16 = vadd.f32 1.0, %v2907_v55  ;;  %v2833_v37 = vsub.f32 1.0, %v2801_v54  ;;  %v8857_v54 = vld [vmem:[#allocation127_spill] sm:$0xff]  ;;  %v8858_v55 = vld [vmem:[#allocation77_spill] sm:$0xff] }
0x1198   :  { %v2527_v43 = vadd.f32 -0.28449672, %v2495_v5  ;;  %v8238_v15 = vmul.f32 %v2976_v56, %v8856_v59  ;;  %v2922_v3 = vsel %vm2858_vm7, %v2826_v51, %v2890_v42  ;;  %v2501_v63 = vmul.f32 %v8044_v1, %v2469_v4  ;;  %v8859_v4 = vld [vmem:[#allocation131_spill] sm:$0xff] }
0x1199   :  { %v2452_v8 = vmul.f32 %v8049_v57, %v2420_v6  ;;  %v2977_v35 = vadd.f32 1.0, %v2913_v23  ;;  %v2928_v0 = vsel %vm2864_vm8, %v2832_v21, %v2896_v48  ;;  %v2447_v32 = vmul.f32 %v8852_v31, %v2415_v30  ;;  %v8860_v48 = vld [vmem:[#allocation104_spill] sm:$0xff] }
0x119a   :  { %v2453_v20 = vmul.f32 %v8064_v7, %v2421_v2  ;;  %v2891_v58 = vsub.f32 0.0, %v2827_v50  ;;  %v2558_v28 = vmul.f32 %v8833_v34, %v2526_v25  ;;  %v2564_v61 = vmul.f32 %v8028_v18, %v2532_v40 }
0x119b   :  { %v2510_v52 = vmul.f32 %v8842_v39, %v2478_v24  ;;  %v2986_v51 = vadd.f32 1.0, %v2922_v3  ;;  %v2897_v27 = vsub.f32 0.0, %v2833_v37  ;;  %v2559_v56 = vmul.f32 %v7928_v45, %v2527_v43 }
0x119c   :  { %v2370_v5 = vmul.f32 1.0614054, %v8857_v54  ;;  %v8254_v46 = vmul.f32 %v2971_v16, %v8858_v55  ;;  %v2533_v21 = vadd.f32 -0.28449672, %v2501_v63  ;;  %v2484_v42 = vadd.f32 1.4214138, %v2452_v8 }
0x119d   :  { %v2371_v6 = vmul.f32 1.0614054, %v8859_v4  ;;  %v8258_v30 = vmul.f32 %v2977_v35, %v8860_v48  ;;  %v2992_v2 = vadd.f32 1.0, %v2928_v0  ;;  %v2479_v23 = vadd.f32 1.4214138, %v2447_v32  ;;  %v8861_v63 = vld [vmem:[#allocation135_spill] sm:$0xff] }
0x119e   :  { %v2485_v25 = vadd.f32 1.4214138, %v2453_v20  ;;  %v2923_v40 = vsel %vm2859_vm9, %v2827_v50, %v2891_v58  ;;  %v2590_v24 = vadd.f32 0.2548296, %v2558_v28  ;;  %v2596_v26 = vadd.f32 0.2548296, %v2564_v61 }
0x119f   :  { %v2542_v43 = vadd.f32 -0.28449672, %v2510_v52  ;;  %v2929_v16 = vsel %vm2865_vm10, %v2833_v37, %v2897_v27  ;;  %v2591_v59 = vadd.f32 0.2548296, %v2559_v56  ;;  %v2402_v3 = vadd.f32 -1.4531521, %v2370_v5 }
0x11a0   :  { %v2386_v8 = vmul.f32 1.0614054, %v8861_v63  ;;  %v2565_v55 = vmul.f32 %v8044_v1, %v2533_v21  ;;  %v2516_v35 = vmul.f32 %v8049_v57, %v2484_v42  ;;  %v2403_v0 = vadd.f32 -1.4531521, %v2371_v6  ;;  %v8862_v32 = vld [vmem:[#allocation139_spill] sm:$0xff] }
0x11a1   :  { %v2387_v20 = vmul.f32 1.0614054, %v8862_v32  ;;  %v8863_v48 = vld [vmem:[#allocation79_spill] sm:$0xff]  ;;  %v2987_v50 = vadd.f32 1.0, %v2923_v40  ;;  %v2511_v58 = vmul.f32 %v8852_v31, %v2479_v23  ;;  %v2517_v38 = vmul.f32 %v8064_v7, %v2485_v25 }
0x11a2   :  { %v8269_v62 = vmul.f32 %v2986_v51, %v8863_v48  ;;  %v8864_v37 = vld [vmem:[#allocation115_spill] sm:$0xff]  ;;  %v2993_v61 = vadd.f32 1.0, %v2929_v16  ;;  %v2622_v52 = vmul.f32 %v8833_v34, %v2590_v24  ;;  %v2574_v27 = vmul.f32 %v8842_v39, %v2542_v43  ;;  %v8867_v24 = vld [vmem:[#allocation117_spill] sm:$0xff] }
0x11a3   :  { %v8274_v28 = vmul.f32 %v2992_v2, %v8864_v37  ;;  %v2628_v56 = vmul.f32 %v8028_v18, %v2596_v26  ;;  %v2623_v5 = vmul.f32 %v7928_v45, %v2591_v59  ;;  %v2434_v51 = vmul.f32 %v8857_v54, %v2402_v3  ;;  %v8865_v40 = vld [vmem:[#allocation83_spill] sm:$0xff]  ;;  %v8869_v18 = vld [vmem:[#allocation110_spill] sm:$0xff]  ;;  %v8870_v3 = vld [vmem:[#allocation140_spill] sm:$0xff] }
0x11a4   :  { %v2418_v21 = vadd.f32 -1.4531521, %v2386_v8  ;;  %v2597_v42 = vadd.f32 0.2548296, %v2565_v55  ;;  %v2548_v6 = vadd.f32 -0.28449672, %v2516_v35  ;;  %v2435_v23 = vmul.f32 %v8859_v4, %v2403_v0 }
0x11a5   :  { %v2419_v25 = vadd.f32 -1.4531521, %v2387_v20  ;;  %v8283_v2 = vmul.f32 %v2987_v50, %v8865_v40  ;;  %v2543_v16 = vadd.f32 -0.28449672, %v2511_v58  ;;  %v2549_v48 = vadd.f32 -0.28449672, %v2517_v38 }
0x11a6   :  { %v2374_v34 = vmul.f32 1.0614054, %v8069_v12  ;;  %v8287_v43 = vmul.f32 %v2993_v61, %v8867_v24  ;;  %v2782_v45 = vmul.f32 %v8869_v18, %v2622_v52  ;;  %v2606_v26 = vadd.f32 0.2548296, %v2574_v27  ;;  %v8871_v55 = vld [vmem:[#allocation112_spill] sm:$0xff]  ;;  %v8875_v18 = vld [vmem:[#allocation142_spill] sm:$0xff] }
0x11a7   :  { %8866 = vst [vmem:[#allocation106_spill] sm:$0xff] %v8283_v2  ;;  %v2375_v59 = vmul.f32 1.0614054, %v8086_v41  ;;  %v2788_v8 = vmul.f32 %v8870_v3, %v2628_v56  ;;  %v2783_v35 = vmul.f32 %v8871_v55, %v2623_v5  ;;  %v2466_v0 = vadd.f32 1.4214138, %v2434_v51  ;;  %v8872_v61 = vld [vmem:[#allocation80_spill] sm:$0xff] }
0x11a8   :  { %8868 = vst [vmem:[#allocation76_spill] sm:$0xff] %v8287_v43  ;;  %v2450_v20 = vmul.f32 %v8861_v63, %v2418_v21  ;;  %v2629_v50 = vmul.f32 %v8044_v1, %v2597_v42  ;;  %v2580_v58 = vmul.f32 %v8049_v57, %v2548_v6  ;;  %v2467_v38 = vadd.f32 1.4214138, %v2435_v23  ;;  %v8873_v5 = vld [vmem:[#allocation82_spill] sm:$0xff]  ;;  %v8874_v51 = vld [vmem:[#allocation108_spill] sm:$0xff]  ;;  %v8877_v2 = vld [vmem:[#allocation111_spill] sm:$0xff] }
0x11a9   :  { %v2451_v37 = vmul.f32 %v8862_v32, %v2419_v25  ;;  %vm2846_vm11 = vcmp.ge.f32.partialorder %v8872_v61, 0.0  ;;  %v2575_v52 = vmul.f32 %v8852_v31, %v2543_v16  ;;  %v2581_v27 = vmul.f32 %v8064_v7, %v2549_v48 }
0x11aa   :  { %v2406_v40 = vadd.f32 -1.4531521, %v2374_v34  ;;  %v2390_v56 = vmul.f32 1.0614054, %v8099_v11  ;;  %vm2847_vm12 = vcmp.ge.f32.partialorder %v8873_v5, 0.0  ;;  %vm2852_vm13 = vcmp.ge.f32.partialorder %v8874_v51, 0.0 }
0x11ab   :  { %v2814_v21 = vsub.f32 1.0, %v2782_v45  ;;  %v2638_v1 = vmul.f32 %v8842_v39, %v2606_v26  ;;  %v2407_v42 = vadd.f32 -1.4531521, %v2375_v59  ;;  %v2391_v6 = vmul.f32 1.0614054, %v8118_v22  ;;  %v8876_v26 = vld [vmem:[#allocation116_spill] sm:$0xff] }
0x11ac   :  { %v2820_v23 = vsub.f32 1.0, %v2788_v8  ;;  %v2815_v25 = vsub.f32 1.0, %v2783_v35  ;;  %v2498_v24 = vmul.f32 %v8857_v54, %v2466_v0  ;;  %v2482_v16 = vadd.f32 1.4214138, %v2450_v20 }
0x11ad   :  { %v2789_v48 = vmul.f32 %v8875_v18, %v2629_v50  ;;  %v2612_v34 = vadd.f32 0.2548296, %v2580_v58  ;;  %v2499_v3 = vmul.f32 %v8859_v4, %v2467_v38  ;;  %v2483_v55 = vadd.f32 1.4214138, %v2451_v37 }
0x11ae   :  { %v2607_v44 = vadd.f32 0.2548296, %v2575_v52  ;;  %v2613_v13 = vadd.f32 0.2548296, %v2581_v27  ;;  %v2438_v45 = vmul.f32 %v8069_v12, %v2406_v40  ;;  %v2422_v43 = vadd.f32 -1.4531521, %v2390_v56 }
0x11af   :  { %v2878_v39 = vsub.f32 0.0, %v2814_v21  ;;  %v2798_v59 = vmul.f32 %v8876_v26, %v2638_v1  ;;  %v2439_v8 = vmul.f32 %v8086_v41, %v2407_v42  ;;  %v2423_v35 = vadd.f32 -1.4531521, %v2391_v6 }
0x11b0   :  { %vm2853_vm14 = vcmp.ge.f32.partialorder %v8877_v2, 0.0  ;;  %v2884_v0 = vsub.f32 0.0, %v2820_v23  ;;  %v2879_v20 = vsub.f32 0.0, %v2815_v25  ;;  %v2530_v50 = vadd.f32 -0.28449672, %v2498_v24  ;;  %v8886_v2 = vld [vmem:[#allocation97_spill] sm:$0xff] }
0x11b1   :  { %v2514_v58 = vmul.f32 %v8861_v63, %v2482_v16  ;;  %v2821_v38 = vsub.f32 1.0, %v2789_v48  ;;  %v2644_v37 = vmul.f32 %v8049_v57, %v2612_v34  ;;  %v2531_v52 = vadd.f32 -0.28449672, %v2499_v3  ;;  %v8878_v48 = vld [vmem:[#allocation85_spill] sm:$0xff]  ;;  %v8880_v3 = vld [vmem:[#allocation122_spill] sm:$0xff] }
0x11b2   :  { %v2515_v27 = vmul.f32 %v8862_v32, %v2483_v55  ;;  %v2639_v40 = vmul.f32 %v8852_v31, %v2607_v44  ;;  %v2645_v56 = vmul.f32 %v8064_v7, %v2613_v13  ;;  %v2470_v1 = vadd.f32 1.4214138, %v2438_v45 }
0x11b3   :  { %v2454_v42 = vmul.f32 %v8099_v11, %v2422_v43  ;;  %v2910_v6 = vsel %vm2846_vm11, %v2814_v21, %v2878_v39  ;;  %v2830_v18 = vsub.f32 1.0, %v2798_v59  ;;  %v2471_v24 = vadd.f32 1.4214138, %v2439_v8  ;;  %v8879_v43 = vld [vmem:[#allocation143_spill] sm:$0xff]  ;;  %v8881_v59 = vld [vmem:[#allocation113_spill] sm:$0xff] }
0x11b4   :  { %v2455_v16 = vmul.f32 %v8118_v22, %v2423_v35  ;;  %vm2862_vm15 = vcmp.ge.f32.partialorder %v8878_v48, 0.0  ;;  %v2916_v57 = vsel %vm2852_vm13, %v2820_v23, %v2884_v0  ;;  %v2911_v44 = vsel %vm2847_vm12, %v2815_v25, %v2879_v20 }
0x11b5   :  { %v2562_v7 = vmul.f32 %v8857_v54, %v2530_v50  ;;  %v2546_v13 = vadd.f32 -0.28449672, %v2514_v58  ;;  %v2885_v31 = vsub.f32 0.0, %v2821_v38  ;;  %v2804_v34 = vmul.f32 %v8879_v43, %v2644_v37  ;;  %v8882_v50 = vld [vmem:[#allocation90_spill] sm:$0xff]  ;;  %v8883_v58 = vld [vmem:[#allocation124_spill] sm:$0xff] }
0x11b6   :  { %v2563_v61 = vmul.f32 %v8859_v4, %v2531_v52  ;;  %v2547_v21 = vadd.f32 -0.28449672, %v2515_v27  ;;  %v2799_v55 = vmul.f32 %v8880_v3, %v2639_v40  ;;  %v2805_v45 = vmul.f32 %v8073_v53, %v2645_v56 }
0x11b7   :  { %v2502_v39 = vmul.f32 %v8069_v12, %v2470_v1  ;;  %v2486_v51 = vadd.f32 1.4214138, %v2454_v42  ;;  %v2974_v23 = vadd.f32 1.0, %v2910_v6  ;;  %v2980_v26 = vadd.f32 1.0, %v2916_v57  ;;  %v8884_v6 = vld [vmem:[#allocation92_spill] sm:$0xff] }
0x11b8   :  { %v2503_v5 = vmul.f32 %v8086_v41, %v2471_v24  ;;  %v2487_v25 = vadd.f32 1.4214138, %v2455_v16  ;;  %vm2868_vm1 = vcmp.ge.f32.partialorder %v8881_v59, 0.0  ;;  %v2975_v8 = vadd.f32 1.0, %v2911_v44  ;;  %v8885_v16 = vld [vmem:[#allocation126_spill] sm:$0xff] }
0x11b9   :  { %v2894_v35 = vsub.f32 0.0, %v2830_v18  ;;  %v2594_v0 = vadd.f32 0.2548296, %v2562_v7  ;;  %v2578_v20 = vmul.f32 %v8861_v63, %v2546_v13  ;;  %vm2863_vm2 = vcmp.ge.f32.partialorder %v8882_v50, 0.0  ;;  %v8890_v50 = vld [vmem:[#allocation102_spill] sm:$0xff] }
0x11ba   :  { %vm2869_vm5 = vcmp.ge.f32.partialorder %v8883_v58, 0.0  ;;  %v2917_v53 = vsel %vm2853_vm14, %v2821_v38, %v2885_v31  ;;  %v2836_v37 = vsub.f32 1.0, %v2804_v34  ;;  %v2595_v52 = vadd.f32 0.2548296, %v2563_v61 }
0x11bb   :  { %v2579_v27 = vmul.f32 %v8862_v32, %v2547_v21  ;;  %v2831_v40 = vsub.f32 1.0, %v2799_v55  ;;  %v2837_v56 = vsub.f32 1.0, %v2805_v45  ;;  %v2534_v1 = vadd.f32 -0.28449672, %v2502_v39 }
0x11bc   :  { %v2518_v42 = vmul.f32 %v8099_v11, %v2486_v51  ;;  %v8342_v24 = vmul.f32 %v2974_v23, %v8884_v6  ;;  %v8345_v57 = vmul.f32 %v2980_v26, %v8885_v16  ;;  %v2535_v44 = vadd.f32 -0.28449672, %v2503_v5 }
0x11bd   :  { %v2519_v7 = vmul.f32 %v8118_v22, %v2487_v25  ;;  %v8349_v38 = vmul.f32 %v2975_v8, %v8886_v2  ;;  %v8351_v13 = vadd.f32 1.0, %v2917_v53  ;;  %v2626_v31 = vmul.f32 %v8857_v54, %v2594_v0  ;;  %v8887_v0 = vld [vmem:[#allocation129_spill] sm:$0xff] }
0x11be   :  { %v2610_v43 = vadd.f32 0.2548296, %v2578_v20  ;;  %v2926_v34 = vsel %vm2862_vm15, %v2830_v18, %v2894_v35  ;;  %v2900_v61 = vsub.f32 0.0, %v2836_v37  ;;  %v2627_v21 = vmul.f32 %v8859_v4, %v2595_v52 }
0x11bf   :  { %v2611_v3 = vadd.f32 0.2548296, %v2579_v27  ;;  %v2895_v39 = vsub.f32 0.0, %v2831_v40  ;;  %v2901_v51 = vsub.f32 0.0, %v2837_v56  ;;  %v2566_v23 = vmul.f32 %v8069_v12, %v2534_v1 }
0x11c0   :  { %v3120_v55 = vpop.f32.mrb[6].mxu0  ;;  %v3274_v45 = vpop.f32.mrb[14].mxu1  ;;  %v2550_v26 = vadd.f32 -0.28449672, %v2518_v42  ;;  %v2567_v18 = vmul.f32 %v8086_v41, %v2535_v44  ;;  %v2551_v48 = vadd.f32 -0.28449672, %v2519_v7  ;;  %v8366_v20 = vmul.f32 %v8887_v0, %v2626_v31 }
0x11c1   :  { %v3670_v5 = vmul.f32 %v3120_v55, %v8144_v17  ;;  %v8360_v25 = vmul.f32 %v3274_v45, %v8153_v33  ;;  %v3122_v54 = vpop.f32.mrb[7].mxu0  ;;  %v3276_v8 = vpop.f32.mrb[15].mxu1  ;;  %v2642_v53 = vmul.f32 %v8861_v63, %v2610_v43  ;;  %v8369_v52 = vadd.f32 1.0, %v2926_v34  ;;  %v8888_v33 = vld [vmem:[#allocation133_spill] sm:$0xff]  ;;  %v8889_v44 = vld [vmem:[#allocation99_spill] sm:$0xff]  ;;  %v8891_v43 = vld [vmem:[#allocation136_spill] sm:$0xff] }
0x11c2   :  { %v3671_v4 = vmul.f32 %v3122_v54, %v8158_v60  ;;  %v3675_v35 = vmul.f32 %v3276_v8, %v8171_v10  ;;  %v2932_v17 = vsel %vm2868_vm1, %v2836_v37, %v2900_v61  ;;  %v8374_v27 = vmul.f32 %v8888_v33, %v2627_v21  ;;  %v8892_v21 = vld [vmem:[#allocation141_spill] sm:$0xff] }
0x11c3   :  { %v2643_v1 = vmul.f32 %v8862_v32, %v2611_v3  ;;  %v2927_v60 = vsel %vm2863_vm2, %v2831_v40, %v2895_v39  ;;  %v2933_v10 = vsel %vm2869_vm5, %v2837_v56, %v2901_v51  ;;  %v2598_v16 = vadd.f32 0.2548296, %v2566_v23  ;;  %v6042_v51 = vld [vmem:[#allocation34 + $0x100] sm:$0xff]  }
0x11c4   :  { %v3126_v42 = vpop.f32.mrb[28].mxu0  ;;  %v3280_v6 = vpop.f32.mrb[32].mxu1  ;;  %v2582_v63 = vmul.f32 %v8099_v11, %v2550_v26  ;;  %vm2850_vm6 = vcmp.ge.f32.partialorder %v8889_v44, 0.0  ;;  %v2599_v2 = vadd.f32 0.2548296, %v2567_v18  ;;  %v2583_v31 = vmul.f32 %v8118_v22, %v2551_v48  ;;  %v6044_v18 = vld [vmem:[#allocation34 + $0x148] sm:$0xff]  }
0x11c5   :  { %v3686_v59 = vmul.f32 %v3126_v42, %v8177_v14  ;;  %v8385_v37 = vmul.f32 %v3280_v6, %v8199_v29  ;;  %v3128_v7 = vpop.f32.mrb[29].mxu0  ;;  %v3282_v32 = vpop.f32.mrb[33].mxu1  ;;  %vm2851_vm7 = vcmp.ge.f32.partialorder %v8890_v50, 0.0  ;;  %v2818_v56 = vsub.f32 1.0, %v8366_v20 }
0x11c6   :  { %v3687_v58 = vmul.f32 %v3128_v7, %v8204_v47  ;;  %v3691_v40 = vmul.f32 %v3282_v32, %v8209_v36  ;;  %v8393_v34 = vmul.f32 %v8891_v43, %v2642_v53  ;;  %v2819_v61 = vsub.f32 1.0, %v8374_v27  ;;  %v8894_v53 = vld [vmem:[#allocation109_spill] sm:$0xff] }
0x11c7   :  { %v3702_v14 = vpack.c.bf16 %v3686_v59, %v3670_v5  ;;  %v3706_v29 = vpack.c.bf16 %v8385_v37, %v8360_v25  ;;  %v8399_v3 = vmul.f32 %v8892_v21, %v2643_v1  ;;  %v2630_v36 = vmul.f32 %v8069_v12, %v2598_v16  ;;  %v6083_v25 = vld [vmem:[#allocation34 + $0x258] sm:$0xff]   ;;  %v6084_v37 = vld [vmem:[#allocation34 + $0x2c8] sm:$0xff]  }
0x11c8   :  { %v3703_v55 = vpack.c.bf16 %v3687_v58, %v3671_v4  ;;  %v3707_v45 = vpack.c.bf16 %v3691_v40, %v3675_v35  ;;  %v3197_v39 = vpop.f32.mrb[30].mxu0  ;;  %v3428_v47 = vpop.f32.mrb[34].mxu1  ;;  %v2614_v23 = vadd.f32 0.2548296, %v2582_v63  ;;  %v2631_v48 = vmul.f32 %v8086_v41, %v2599_v2  ;;  %v8893_v4 = vld [vmem:[#allocation105_spill] sm:$0xff]  ;;  %v6047_v2 = vld [vmem:[#allocation34 + $0x150] sm:$0xff]  }
0x11c9   :  { %v8403_v26 = vmul.f32 %v3197_v39, %v8235_v9  ;;  %v8406_v5 = vmul.f32 %v3428_v47, %v8238_v15  ;;  %v3199_v54 = vpop.f32.mrb[31].mxu0  ;;  %v3430_v8 = vpop.f32.mrb[35].mxu1  ;;  %v2615_v0 = vadd.f32 0.2548296, %v2583_v31  ;;  %vm2866_vm8 = vcmp.ge.f32.partialorder %v8893_v4, 0.0  ;;  %v8895_v15 = vld [vmem:[#allocation130_spill] sm:$0xff] }
0x11ca   :  { %v3673_v35 = vmul.f32 %v3199_v54, %v8254_v46  ;;  %v8412_v20 = vmul.f32 %v3430_v8, %v8258_v30  ;;  %4850 = vmatprep.mubr.bf16.mxu0 %v3703_v55  ;;  %v2882_v12 = vsub.f32 0.0, %v2818_v56  ;;  %v2834_v9 = vsub.f32 1.0, %v8393_v34  ;;  %v6046_v30 = vld [vmem:[#allocation34 + $0x108] sm:$0xff]   ;;  %v6050_v39 = vld [vmem:[#allocation34 + $0x180] sm:$0xff]   ;;  %v6051_v54 = vld [vmem:[#allocation34 + $0x158] sm:$0xff]  }
0x11cb   :  { %vm2867_vm9 = vcmp.ge.f32.partialorder %v8894_v53, 0.0  ;;  %4851 = vmatmul.mubr.bf16.vlgmr.msra.gmra.mrb[48].mxu0 %v3702_v14  ;;  %v3013_v33 = vmul.f32 %v8351_v13, %v8895_v15  ;;  %v2996_v27 = vadd.f32 1.0, %v2932_v17  ;;  %v2883_v41 = vsub.f32 0.0, %v2819_v61  ;;  %v8899_v14 = vld [vmem:[#allocation128_spill] sm:$0xff]  ;;  %v6052_v8 = vld [vmem:[#allocation34 + $0x1c8] sm:$0xff]  }
0x11cc   :  { %v2835_v1 = vsub.f32 1.0, %v8399_v3  ;;  %5649 = vmatpush3.bf16.msra.mxu0 %v6042_v51  ;;  %v3203_v42 = vpop.f32.mrb[32].mxu0  ;;  %v3434_v46 = vpop.f32.mrb[36].mxu1  ;;  %4932 = vmatprep.mubr.bf16.mxu0 %v3707_v45  ;;  %v2991_v6 = vadd.f32 1.0, %v2927_v60  ;;  %v2997_v16 = vadd.f32 1.0, %v2933_v10  ;;  %v8420_v63 = vmul.f32 %v8078_v49, %v2630_v36  ;;  %v8896_v10 = vld [vmem:[#allocation106_spill] sm:$0xff] }
0x11cd   :  { %v2646_v59 = vmul.f32 %v8099_v11, %v2614_v23  ;;  %v3688_v7 = vmul.f32 %v3203_v42, %v8269_v62  ;;  %v8425_v13 = vmul.f32 %v3434_v46, %v8274_v28  ;;  %v3205_v17 = vpop.f32.mrb[33].mxu0  ;;  %v3436_v32 = vpop.f32.mrb[37].mxu1  ;;  %5650 = vmatprep.subr.bf16.mxu0 %v6044_v18  ;;  %v8428_v31 = vmul.f32 %v8090_v19, %v2631_v48  ;;  %v8897_v49 = vld [vmem:[#allocation76_spill] sm:$0xff]  ;;  %v8898_v28 = vld [vmem:[#allocation125_spill] sm:$0xff]  ;;  %v8904_v46 = vld [vmem:[#allocation103_spill] sm:$0xff] }
0x11ce   :  { %v2647_v60 = vmul.f32 %v8118_v22, %v2615_v0  ;;  %v3689_v58 = vmul.f32 %v3205_v17, %v8896_v10  ;;  %v8433_v40 = vmul.f32 %v3436_v32, %v8897_v49  ;;  %v2914_v11 = vsel %vm2850_vm6, %v2818_v56, %v2882_v12  ;;  %v6049_v45 = vld [vmem:[#allocation34 + $0x110] sm:$0xff]   ;;  %v8901_v48 = vld [vmem:[#allocation145_spill] sm:$0xff]  ;;  %v6055_v10 = vld [vmem:[#allocation34 + $0x160] sm:$0xff]  }
0x11cf   :  { %v2898_v62 = vsub.f32 0.0, %v2834_v9  ;;  %vm2854_vm10 = vcmp.ge.f32.partialorder %v8898_v28, 0.0  ;;  %v3704_v43 = vpack.c.bf16 %v3688_v7, %v8403_v26  ;;  %v3710_v34 = vpack.c.bf16 %v8425_v13, %v8406_v5  ;;  %v8900_v51 = vld [vmem:[#allocation144_spill] sm:$0xff]  ;;  %v6053_v32 = vld [vmem:[#allocation34 + $0x118] sm:$0xff]   ;;  %v8906_v53 = vld [vmem:[#allocation119_spill] sm:$0xff] }
0x11d0   :  { %v2915_v19 = vsel %vm2851_vm7, %v2819_v61, %v2883_v41  ;;  %v2899_v22 = vsub.f32 0.0, %v2835_v1  ;;  %vm2855_vm11 = vcmp.ge.f32.partialorder %v8899_v14, 0.0  ;;  %v3705_v21 = vpack.c.bf16 %v3689_v58, %v3673_v35  ;;  %5651 = vmatpush3.bf16.msra.mxu0 %v6046_v30  ;;  %v3351_v56 = vpop.f32.mrb[34].mxu0  ;;  %v3582_v55 = vpop.f32.mrb[38].mxu1  ;;  %v8903_v41 = vld [vmem:[#allocation132_spill] sm:$0xff]  ;;  %v6115_v5 = vld [vmem:[#allocation34 + $0x358] sm:$0xff]  }
0x11d1   :  { %v3711_v44 = vpack.c.bf16 %v8433_v40, %v8412_v20  ;;  %v2822_v47 = vsub.f32 1.0, %v8420_v63  ;;  %v8450_v36 = vmul.f32 %v8900_v51, %v2646_v59  ;;  %v8453_v50 = vmul.f32 %v3351_v56, %v8342_v24  ;;  %v3353_v23 = vpop.f32.mrb[35].mxu0  ;;  %v3584_v26 = vpop.f32.mrb[39].mxu1  ;;  %5652 = vmatprep.subr.bf16.mxu0 %v6047_v2  ;;  %v8902_v24 = vld [vmem:[#allocation98_spill] sm:$0xff]  ;;  %v6054_v2 = vld [vmem:[#allocation34 + $0x188] sm:$0xff]  }
0x11d2   :  { %v8456_v61 = vmul.f32 %v3582_v55, %v8345_v57  ;;  %v2823_v18 = vsub.f32 1.0, %v8428_v31  ;;  %v8460_v0 = vmul.f32 %v8901_v48, %v2647_v60  ;;  %v3677_v35 = vmul.f32 %v3353_v23, %v8349_v38  ;;  %4891 = vmatprep.mubr.bf16.mxu1 %v3705_v21  ;;  %v6058_v23 = vld [vmem:[#allocation34 + $0x190] sm:$0xff]   ;;  %v6086_v20 = vld [vmem:[#allocation34 + $0x288] sm:$0xff]   ;;  %v6087_v40 = vld [vmem:[#allocation34 + $0x260] sm:$0xff]  }
0x11d3   :  { %v8463_v12 = vmul.f32 %v3584_v26, %v3013_v33  ;;  %v3022_v15 = vmul.f32 %v8369_v52, %v8902_v24  ;;  %v2978_v57 = vadd.f32 1.0, %v2914_v11  ;;  %4892 = vmatmul.mubr.bf16.vlgmr.msra.gmra.mrb[44].mxu1 %v3704_v43  ;;  %v3028_v42 = vmul.f32 %v2996_v27, %v8903_v41  ;;  %v8905_v33 = vld [vmem:[#allocation134_spill] sm:$0xff]  ;;  %v6116_v13 = vld [vmem:[#allocation34 + $0x3c8] sm:$0xff]  }
0x11d4   :  { %v3023_v30 = vmul.f32 %v2991_v6, %v8904_v46  ;;  %v2979_v63 = vadd.f32 1.0, %v2915_v19  ;;  %v2930_v59 = vsel %vm2866_vm8, %v2834_v9, %v2898_v62  ;;  %5653 = vmatpush3.bf16.msra.mxu0 %v6049_v45  ;;  %5671 = vmatpush3.bf16.msra.mxu1 %v6050_v39  ;;  %v3357_v7 = vpop.f32.mrb[36].mxu0  ;;  %v3588_v38 = vpop.f32.mrb[40].mxu1  ;;  %v3029_v17 = vmul.f32 %v2997_v16, %v8905_v33  ;;  %v6056_v16 = vld [vmem:[#allocation34 + $0x1d0] sm:$0xff]   ;;  %v8909_v46 = vld [vmem:[#allocation61_spill] sm:$0xff] }
0x11d5   :  { %v2931_v52 = vsel %vm2867_vm9, %v2835_v1, %v2899_v22  ;;  %v2886_v27 = vsub.f32 0.0, %v2822_v47  ;;  %v2838_v6 = vsub.f32 1.0, %v8450_v36  ;;  %v8477_v31 = vmul.f32 %v3357_v7, %v3022_v15  ;;  %v3359_v9 = vpop.f32.mrb[37].mxu0  ;;  %v3590_v60 = vpop.f32.mrb[41].mxu1  ;;  %5654 = vmatprep.subr.bf16.mxu0 %v6051_v54  ;;  %5672 = vmatprep.subr.bf16.mxu1 %v6052_v8  ;;  %v8907_v22 = vld [vmem:[#allocation121_spill] sm:$0xff]  ;;  %v6057_v36 = vld [vmem:[#allocation34 + $0x120] sm:$0xff]  }
0x11d6   :  { %v8479_v4 = vmul.f32 %v3588_v38, %v3028_v42  ;;  %v2887_v58 = vsub.f32 0.0, %v2823_v18  ;;  %v2839_v49 = vsub.f32 1.0, %v8460_v0  ;;  %v3693_v3 = vmul.f32 %v3359_v9, %v3023_v30  ;;  %v8908_v8 = vld [vmem:[#allocation60_spill] sm:$0xff]  ;;  %v6059_v15 = vld [vmem:[#allocation34 + $0x168] sm:$0xff]   ;;  %v8911_v7 = vld [vmem:[#allocation138_spill] sm:$0xff] }
0x11d7   :  { %v8482_v11 = vmul.f32 %v3590_v60, %v3029_v17  ;;  %v3010_v1 = vmul.f32 %v2978_v57, %v8906_v53  ;;  %v2994_v62 = vadd.f32 1.0, %v2930_v59  ;;  %v3708_v43 = vpack.c.bf16 %v8477_v31, %v8453_v50  ;;  %v6060_v57 = vld [vmem:[#allocation34 + $0x1d8] sm:$0xff]   ;;  %v6061_v17 = vld [vmem:[#allocation34 + $0x128] sm:$0xff]   ;;  %v6063_v60 = vld [vmem:[#allocation34 + $0x170] sm:$0xff]  }
0x11d8   :  { %v3714_v19 = vpack.c.bf16 %v8479_v4, %v8456_v61  ;;  %v3011_v21 = vmul.f32 %v2979_v63, %v8907_v22  ;;  %v2995_v56 = vadd.f32 1.0, %v2931_v52  ;;  %v3709_v55 = vpack.c.bf16 %v3693_v3, %v3677_v35  ;;  %5655 = vmatpush3.bf16.msra.mxu0 %v6053_v32  ;;  %5673 = vmatpush3.bf16.msra.mxu1 %v6054_v2  ;;  %v3505_v39 = vpop.f32.mrb[38].mxu0  ;;  %v8492_v51 = vpop.f32.mrb[42].mxu1  ;;  %v6062_v32 = vld [vmem:[#allocation34 + $0x198] sm:$0xff]   ;;  %v8912_v2 = vld [vmem:[#allocation62_spill] sm:$0xff]  ;;  %v6091_v50 = vld [vmem:[#allocation34 + $0x268] sm:$0xff]  }
0x11d9   :  { %v3715_v45 = vpack.c.bf16 %v8482_v11, %v8463_v12  ;;  %v2918_v26 = vsel %vm2854_vm10, %v2822_v47, %v2886_v27  ;;  %v2902_v54 = vsub.f32 0.0, %v2838_v6  ;;  %v2962_v48 = vmul.f32 0.5, %v8908_v8  ;;  %v3507_v24 = vpop.f32.mrb[39].mxu0  ;;  %v8499_v35 = vpop.f32.mrb[43].mxu1  ;;  %5656 = vmatprep.subr.bf16.mxu0 %v6055_v10  ;;  %5674 = vmatprep.subr.bf16.mxu1 %v6056_v16  ;;  %v8910_v47 = vld [vmem:[#allocation137_spill] sm:$0xff]  ;;  %v6064_v10 = vld [vmem:[#allocation34 + $0x1e0] sm:$0xff]  }
0x11da   :  { %v8497_v0 = vmul.f32 %v3505_v39, %v3010_v1  ;;  %v2919_v41 = vsel %vm2855_vm11, %v2823_v18, %v2887_v58  ;;  %v2903_v42 = vsub.f32 0.0, %v2839_v49  ;;  %v2963_v30 = vmul.f32 0.5, %v8909_v46  ;;  %4973 = vmatprep.mubr.bf16.mxu1 %v3709_v55  ;;  %v8913_v58 = vld [vmem:[#allocation63_spill] sm:$0xff]  ;;  %v6065_v55 = vld [vmem:[#allocation34 + $0x130] sm:$0xff]   ;;  %v6066_v39 = vld [vmem:[#allocation34 + $0x1a0] sm:$0xff]  }
0x11db   :  { %v8504_v28 = vmul.f32 %v3507_v24, %v3011_v21  ;;  %vm2870_vm12 = vcmp.ge.f32.partialorder %v8910_v47, 0.0  ;;  %v3026_v63 = vmul.f32 %v2994_v62, %v2962_v48  ;;  %v2982_v59 = vadd.f32 1.0, %v2918_v26  ;;  %v6067_v8 = vld [vmem:[#allocation34 + $0x178] sm:$0xff]   ;;  %v6068_v48 = vld [vmem:[#allocation34 + $0x1e8] sm:$0xff]   ;;  %v6119_v11 = vld [vmem:[#allocation34 + $0x360] sm:$0xff]  }
0x11dc   :  { %vm2871_vm13 = vcmp.ge.f32.partialorder %v8911_v7, 0.0  ;;  %5657 = vmatpush3.bf16.msra.mxu0 %v6057_v36  ;;  %5675 = vmatpush3.bf16.msra.mxu1 %v6058_v23  ;;  %v3511_v38 = vpop.f32.mrb[40].mxu0  ;;  %v3027_v33 = vmul.f32 %v2995_v56, %v2963_v30  ;;  %v2983_v14 = vadd.f32 1.0, %v2919_v41  ;;  %v2934_v18 = vsel %vm2870_vm12, %v2838_v6, %v2902_v54  ;;  %v8915_v24 = vld [vmem:[#allocation65_spill] sm:$0xff]  ;;  %v6070_v47 = vld [vmem:[#allocation34 + $0x1a8] sm:$0xff]   ;;  %v6071_v7 = vld [vmem:[#allocation34 + $0x1f0] sm:$0xff]  }
0x11dd   :  { %v2950_v52 = vmul.f32 0.5, %v8912_v2  ;;  %v8509_v27 = vmul.f32 %v3511_v38, %v3026_v63  ;;  %v3513_v9 = vpop.f32.mrb[41].mxu0  ;;  %5658 = vmatprep.subr.bf16.mxu0 %v6059_v15  ;;  %5676 = vmatprep.subr.bf16.mxu1 %v6060_v57  ;;  %v2935_v16 = vsel %vm2871_vm13, %v2839_v49, %v2903_v42  ;;  %v2951_v3 = vmul.f32 0.5, %v8913_v58  ;;  %v8914_v49 = vld [vmem:[#allocation64_spill] sm:$0xff]  ;;  %v6069_v30 = vld [vmem:[#allocation34 + $0x138] sm:$0xff]   ;;  %v6072_v38 = vld [vmem:[#allocation34 + $0x240] sm:$0xff]  }
0x11de   :  { %v8514_v53 = vmul.f32 %v3513_v9, %v3027_v33  ;;  %v2998_v62 = vadd.f32 1.0, %v2934_v18  ;;  %v2999_v36 = vadd.f32 1.0, %v2935_v16  ;;  %v2966_v23 = vmul.f32 0.5, %v8914_v49  ;;  %v6074_v18 = vld [vmem:[#allocation34 + $0x200] sm:$0xff]   ;;  %v6075_v2 = vld [vmem:[#allocation34 + $0x1f8] sm:$0xff]   ;;  %v6081_v58 = vld [vmem:[#allocation34 + $0x210] sm:$0xff]  }
0x11df   :  { %v3712_v1 = vpack.c.bf16 %v8509_v27, %v8497_v0  ;;  %v3014_v6 = vmul.f32 %v2982_v59, %v2950_v52  ;;  %v3015_v56 = vmul.f32 %v2983_v14, %v2951_v3  ;;  %v2967_v15 = vmul.f32 0.5, %v8915_v24  ;;  %v6073_v14 = vld [vmem:[#allocation34 + $0x1b0] sm:$0xff]   ;;  %v6076_v52 = vld [vmem:[#allocation34 + $0x248] sm:$0xff]   ;;  %v6077_v9 = vld [vmem:[#allocation34 + $0x1b8] sm:$0xff]  }
0x11e0   :  { %v3713_v22 = vpack.c.bf16 %v8514_v53, %v8504_v28  ;;  %5659 = vmatpush3.bf16.msra.mxu0 %v6061_v17  ;;  %5677 = vmatpush3.bf16.msra.mxu1 %v6062_v32  ;;  %v3659_v21 = vpop.f32.mrb[42].mxu0  ;;  %v3030_v41 = vmul.f32 %v2998_v62, %v2966_v23  ;;  %v6080_v16 = vld [vmem:[#allocation34 + $0x2c0] sm:$0xff]   ;;  %v6090_v62 = vld [vmem:[#allocation34 + $0x290] sm:$0xff]   ;;  %v6092_v31 = vld [vmem:[#allocation34 + $0x2d8] sm:$0xff]  }
0x11e1   :  { %v8521_v26 = vmul.f32 %v3659_v21, %v3014_v6  ;;  %v3661_v54 = vpop.f32.mrb[43].mxu0  ;;  %5660 = vmatprep.subr.bf16.mxu0 %v6063_v60  ;;  %5678 = vmatprep.subr.bf16.mxu1 %v6064_v10  ;;  %v3031_v46 = vmul.f32 %v2999_v36, %v2967_v15  ;;  %v6078_v60 = vld [vmem:[#allocation34 + $0x208] sm:$0xff]   ;;  %v6079_v10 = vld [vmem:[#allocation34 + $0x250] sm:$0xff]   ;;  %v6082_v3 = vld [vmem:[#allocation34 + $0x280] sm:$0xff]  }
0x11e2   :  { %v8524_v57 = vmul.f32 %v3661_v54, %v3015_v56  ;;  %v6089_v6 = vld [vmem:[#allocation34 + $0x220] sm:$0xff]   ;;  %v6094_v21 = vld [vmem:[#allocation34 + $0x298] sm:$0xff]   ;;  %v6095_v28 = vld [vmem:[#allocation34 + $0x270] sm:$0xff]  }
0x11e3   :  { %v6096_v53 = vld [vmem:[#allocation34 + $0x2e0] sm:$0xff]   ;;  %v6101_v36 = vld [vmem:[#allocation34 + $0x238] sm:$0xff]   ;;  %v6102_v49 = vld [vmem:[#allocation34 + $0x2a8] sm:$0xff]  }
0x11e4   :  { %5661 = vmatpush3.bf16.msra.mxu0 %v6065_v55  ;;  %5679 = vmatpush3.bf16.msra.mxu1 %v6066_v39  ;;  %v3665_v42 = vpop.f32.mrb[44].mxu0  ;;  %v6098_v56 = vld [vmem:[#allocation34 + $0x2a0] sm:$0xff]   ;;  %v6099_v55 = vld [vmem:[#allocation34 + $0x278] sm:$0xff]   ;;  %v6100_v39 = vld [vmem:[#allocation34 + $0x2e8] sm:$0xff]  }
0x11e5   :  { %v8526_v63 = vmul.f32 %v3665_v42, %v3030_v41  ;;  %v3667_v59 = vpop.f32.mrb[45].mxu0  ;;  %5662 = vmatprep.subr.bf16.mxu0 %v6067_v8  ;;  %5680 = vmatprep.subr.bf16.mxu1 %v6068_v48  ;;  %v6103_v23 = vld [vmem:[#allocation34 + $0x2f0] sm:$0xff]   ;;  %v6104_v54 = vld [vmem:[#allocation34 + $0x340] sm:$0xff]   ;;  %v6107_v24 = vld [vmem:[#allocation34 + $0x2f8] sm:$0xff]  }
0x11e6   :  { %v8528_v33 = vmul.f32 %v3667_v59, %v3031_v46  ;;  %v6105_v8 = vld [vmem:[#allocation34 + $0x2b0] sm:$0xff]   ;;  %v6106_v48 = vld [vmem:[#allocation34 + $0x300] sm:$0xff]   ;;  %v6108_v15 = vld [vmem:[#allocation34 + $0x348] sm:$0xff]  }
0x11e7   :  { %v3716_v17 = vpack.c.bf16 %v8526_v63, %v8521_v26  ;;  %v6109_v41 = vld [vmem:[#allocation34 + $0x2b8] sm:$0xff]   ;;  %v6110_v42 = vld [vmem:[#allocation34 + $0x308] sm:$0xff]   ;;  %v6111_v46 = vld [vmem:[#allocation34 + $0x350] sm:$0xff]  }
0x11e8   :  { %v3717_v32 = vpack.c.bf16 %v8528_v33, %v8524_v57  ;;  %5663 = vmatpush3.bf16.msra.mxu0 %v6069_v30  ;;  %5681 = vmatpush3.bf16.msra.mxu1 %v6070_v47  ;;  %v6112_v30 = vld [vmem:[#allocation34 + $0x3c0] sm:$0xff]   ;;  %v6113_v47 = vld [vmem:[#allocation34 + $0x310] sm:$0xff]   ;;  %v6118_v12 = vld [vmem:[#allocation34 + $0x388] sm:$0xff]  }
0x11e9   :  { %5682 = vmatprep.subr.bf16.mxu1 %v6071_v7  ;;  %5692 = vmatprep.subr.bf16.mxu0 %v6072_v38  ;;  %v6114_v59 = vld [vmem:[#allocation34 + $0x380] sm:$0xff]   ;;  %v6122_v38 = vld [vmem:[#allocation34 + $0x390] sm:$0xff]   ;;  %v6123_v0 = vld [vmem:[#allocation34 + $0x368] sm:$0xff]  }
0x11ea   :  { %v6121_v7 = vld [vmem:[#allocation34 + $0x320] sm:$0xff]   ;;  %v6124_v27 = vld [vmem:[#allocation34 + $0x3d8] sm:$0xff]   ;;  %v6127_v57 = vld [vmem:[#allocation34 + $0x370] sm:$0xff]  }
0x11eb   :  { %4933 = vmatmul.mubr.bf16.vlgmr.msra.gmra.mrb[52].mxu0 %v3706_v29  ;;  %v6085_v29 = vld [vmem:[#allocation34 + $0x218] sm:$0xff]   ;;  %v6128_v33 = vld [vmem:[#allocation34 + $0x3e0] sm:$0xff]  }
0x11ec   :  { %5683 = vmatpush3.bf16.msra.mxu1 %v6073_v14  ;;  %5693 = vmatpush3.bf16.msra.mxu0 %v6074_v18  ;;  %v6126_v14 = vld [vmem:[#allocation34 + $0x398] sm:$0xff]   ;;  %v6130_v18 = vld [vmem:[#allocation34 + $0x3a0] sm:$0xff]  }
0x11ed   :  { %5014 = vmatprep.mubr.bf16.mxu0 %v3711_v44  ;;  %5684 = vmatprep.subr.bf16.mxu1 %v6075_v2  ;;  %v6088_v44 = vld [vmem:[#allocation34 + $0x2d0] sm:$0xff]   ;;  %v6131_v2 = vld [vmem:[#allocation34 + $0x378] sm:$0xff]  }
0x11ee   :  { %5694 = vmatprep.subr.bf16.mxu0 %v6076_v52  ;;  %v6132_v52 = vld [vmem:[#allocation34 + $0x3e8] sm:$0xff]  }
0x11f0   :  { %5685 = vmatpush3.bf16.msra.mxu1 %v6077_v9  ;;  %5695 = vmatpush3.bf16.msra.mxu0 %v6078_v60  ;;  %v6133_v9 = vld [vmem:[#allocation34 + $0x338] sm:$0xff]   ;;  %v6134_v60 = vld [vmem:[#allocation34 + $0x3a8] sm:$0xff]  }
0x11f1   :  { %5696 = vmatprep.subr.bf16.mxu0 %v6079_v10  ;;  %5714 = vmatprep.subr.bf16.mxu1 %v6080_v16  ;;  %v6135_v10 = vld [vmem:[#allocation34 + $0x3f0] sm:$0xff]  }
0x11f2   :  { %v6136_v16 = vld [vmem:[#allocation34 + $0x3b0] sm:$0xff]  }
0x11f3   :  { %4974 = vmatmul.mubr.bf16.vlgmr.msra.gmra.mrb[48].mxu1 %v3708_v43  ;;  %v6093_v43 = vld [vmem:[#allocation34 + $0x228] sm:$0xff]  }
0x11f4   :  { %5697 = vmatpush3.bf16.msra.mxu0 %v6081_v58  ;;  %5715 = vmatpush3.bf16.msra.mxu1 %v6082_v3  ;;  %v6137_v58 = vld [vmem:[#allocation34 + $0x3f8] sm:$0xff]  }
0x11f5   :  { %5055 = vmatprep.mubr.bf16.mxu1 %v3713_v22  ;;  %5698 = vmatprep.subr.bf16.mxu0 %v6083_v25  ;;  %v6097_v22 = vld [vmem:[#allocation34 + $0x230] sm:$0xff]   ;;  %v6138_v3 = vld [vmem:[#allocation34 + $0x3b8] sm:$0xff]   ;;  %v8916_v25 = vmov 0.0  }
0x11f6   :  { %5716 = vmatprep.subr.bf16.mxu1 %v6084_v37 }
0x11f8   :  { %5699 = vmatpush3.bf16.msra.mxu0 %v6085_v29  ;;  %5717 = vmatpush3.bf16.msra.mxu1 %v6086_v20 }
0x11f9   :  { %5700 = vmatprep.subr.bf16.mxu0 %v6087_v40  ;;  %5718 = vmatprep.subr.bf16.mxu1 %v6088_v44 }
0x11fc   :  { %5701 = vmatpush3.bf16.msra.mxu0 %v6089_v6  ;;  %5719 = vmatpush3.bf16.msra.mxu1 %v6090_v62 }
0x11fd   :  { %5702 = vmatprep.subr.bf16.mxu0 %v6091_v50  ;;  %5720 = vmatprep.subr.bf16.mxu1 %v6092_v31 }
0x1200   :  { %5703 = vmatpush3.bf16.msra.mxu0 %v6093_v43  ;;  %5721 = vmatpush3.bf16.msra.mxu1 %v6094_v21 }
0x1201   :  { %5704 = vmatprep.subr.bf16.mxu0 %v6095_v28  ;;  %5722 = vmatprep.subr.bf16.mxu1 %v6096_v53 }
0x1204   :  { %5705 = vmatpush3.bf16.msra.mxu0 %v6097_v22  ;;  %5723 = vmatpush3.bf16.msra.mxu1 %v6098_v56 }
0x1205   :  { %5706 = vmatprep.subr.bf16.mxu0 %v6099_v55  ;;  %5724 = vmatprep.subr.bf16.mxu1 %v6100_v39 }
0x1208   :  { %5707 = vmatpush3.bf16.msra.mxu0 %v6101_v36  ;;  %5725 = vmatpush3.bf16.msra.mxu1 %v6102_v49 }
0x1209   :  { %5726 = vmatprep.subr.bf16.mxu1 %v6103_v23  ;;  %5736 = vmatprep.subr.bf16.mxu0 %v6104_v54 }
0x120b   :  { %5015 = vmatmul.mubr.bf16.vlgmr.msra.gmra.mrb[56].mxu0 %v3710_v34  ;;  %v6117_v34 = vld [vmem:[#allocation34 + $0x318] sm:$0xff]  }
0x120c   :  { %5727 = vmatpush3.bf16.msra.mxu1 %v6105_v8  ;;  %5737 = vmatpush3.bf16.msra.mxu0 %v6106_v48 }
0x120d   :  { %5096 = vmatprep.mubr.bf16.mxu0 %v3715_v45  ;;  %5728 = vmatprep.subr.bf16.mxu1 %v6107_v24  ;;  %v6120_v45 = vld [vmem:[#allocation34 + $0x3d0] sm:$0xff]  }
0x120e   :  { %5738 = vmatprep.subr.bf16.mxu0 %v6108_v15 }
0x1210   :  { %5729 = vmatpush3.bf16.msra.mxu1 %v6109_v41  ;;  %5739 = vmatpush3.bf16.msra.mxu0 %v6110_v42 }
0x1211   :  { %5740 = vmatprep.subr.bf16.mxu0 %v6111_v46  ;;  %5758 = vmatprep.subr.bf16.mxu1 %v6112_v30 }
0x1213   :  { %5056 = vmatmul.mubr.bf16.vlgmr.msra.gmra.mrb[52].mxu1 %v3712_v1  ;;  %v6125_v1 = vld [vmem:[#allocation34 + $0x328] sm:$0xff]  }
0x1214   :  { %5741 = vmatpush3.bf16.msra.mxu0 %v6113_v47  ;;  %5759 = vmatpush3.bf16.msra.mxu1 %v6114_v59 }
0x1215   :  { %5137 = vmatprep.mubr.bf16.mxu1 %v3717_v32  ;;  %5742 = vmatprep.subr.bf16.mxu0 %v6115_v5  ;;  %v6129_v32 = vld [vmem:[#allocation34 + $0x330] sm:$0xff]  }
0x1216   :  { %5760 = vmatprep.subr.bf16.mxu1 %v6116_v13 }
0x1218   :  { %5743 = vmatpush3.bf16.msra.mxu0 %v6117_v34  ;;  %5761 = vmatpush3.bf16.msra.mxu1 %v6118_v12 }
0x1219   :  { %5744 = vmatprep.subr.bf16.mxu0 %v6119_v11  ;;  %5762 = vmatprep.subr.bf16.mxu1 %v6120_v45 }
0x121c   :  { %5745 = vmatpush3.bf16.msra.mxu0 %v6121_v7  ;;  %5763 = vmatpush3.bf16.msra.mxu1 %v6122_v38 }
0x121d   :  { %5746 = vmatprep.subr.bf16.mxu0 %v6123_v0  ;;  %5764 = vmatprep.subr.bf16.mxu1 %v6124_v27 }
0x1220   :  { %5747 = vmatpush3.bf16.msra.mxu0 %v6125_v1  ;;  %5765 = vmatpush3.bf16.msra.mxu1 %v6126_v14 }
0x1221   :  { %5748 = vmatprep.subr.bf16.mxu0 %v6127_v57  ;;  %5766 = vmatprep.subr.bf16.mxu1 %v6128_v33 }
0x1224   :  { %5749 = vmatpush3.bf16.msra.mxu0 %v6129_v32  ;;  %5767 = vmatpush3.bf16.msra.mxu1 %v6130_v18 }
0x1225   :  { %5750 = vmatprep.subr.bf16.mxu0 %v6131_v2  ;;  %5768 = vmatprep.subr.bf16.mxu1 %v6132_v52 }
0x1228   :  { %5751 = vmatpush3.bf16.msra.mxu0 %v6133_v9  ;;  %5769 = vmatpush3.bf16.msra.mxu1 %v6134_v60 }
0x1229   :  { %5770 = vmatprep.subr.bf16.mxu1 %v6135_v10 }
0x122b   :  { %5097 = vmatmul.mubr.bf16.vlgmr.msra.gmra.mrb[60].mxu0 %v3714_v19 }
0x122c   :  { %5771 = vmatpush3.bf16.msra.mxu1 %v6136_v16  ;;  %5892 = vmatprep.mubr.msk.f32.mxu0 %vm6931_vm3, %v8916_v25 }
0x122d   :  { %5772 = vmatprep.subr.bf16.mxu1 %v6137_v58 }
0x1230   :  { %5773 = vmatpush3.bf16.msra.mxu1 %v6138_v3 }
0x1233   :  { %5138 = vmatmul.mubr.bf16.vlgmr.msra.gmra.mrb[56].mxu1 %v3716_v17 }
0x129e   :  { %v5620_v37 = vpop.f32.mrb[48].mxu0 }
0x129f   :  { %v5621_v29 = vpop.f32.mrb[49].mxu0 }
0x12a0   :  { %v5622_v20 = vadd.f32 %v5621_v29, %v5620_v37  ;;  %v5623_v40 = vpop.f32.mrb[50].mxu0  ;;  %v8917_v37 = vld [vmem:[#allocation58_spill] sm:$0xff] }
0x12a1   :  { %v5624_v44 = vpop.f32.mrb[51].mxu0 }
0x12a2   :  { %v4853_v6 = vadd.f32 %v5622_v20, %v8499_v35  ;;  %v5625_v61 = vadd.f32 %v5624_v44, %v5623_v40  ;;  %v8918_v20 = vld [vmem:[#allocation56_spill] sm:$0xff]  ;;  %v8919_v44 = vld [vmem:[#allocation59_spill] sm:$0xff] }
0x12a4   :  { %v4856_v4 = vadd.f32 %v8492_v51, %v5625_v61 }
0x12a6   :  { %v5642_v19 = vpop.f32.mrb[44].mxu1 }
0x12a7   :  { %v5643_v62 = vpop.f32.mrb[45].mxu1 }
0x12a8   :  { %v5644_v50 = vadd.f32 %v5643_v62, %v5642_v19  ;;  %v5645_v31 = vpop.f32.mrb[46].mxu1 }
0x12a9   :  { %v5646_v43 = vpop.f32.mrb[47].mxu1 }
0x12aa   :  { %v4894_v21 = vadd.f32 %v5644_v50, %v4853_v6  ;;  %v5647_v28 = vadd.f32 %v5646_v43, %v5645_v31 }
0x12ac   :  { %v4897_v53 = vadd.f32 %v5647_v28, %v4856_v4  ;;  %v8920_v4 = vld [vmem:[#allocation57_spill] sm:$0xff] }
0x12be   :  { %v5664_v26 = vpop.f32.mrb[52].mxu0 }
0x12bf   :  { %v5665_v63 = vpop.f32.mrb[53].mxu0 }
0x12c0   :  { %v5666_v17 = vadd.f32 %v5665_v63, %v5664_v26  ;;  %v5667_v22 = vpop.f32.mrb[54].mxu0 }
0x12c1   :  { %v5668_v56 = vpop.f32.mrb[55].mxu0 }
0x12c2   :  { %v4935_v55 = vadd.f32 %v5666_v17, %v4894_v21  ;;  %v5669_v39 = vadd.f32 %v5668_v56, %v5667_v22  ;;  %v6934_v56 = vmov 0.0|0.0  }
0x12c3   :  { %5953 = vmatprep.subr.bf16.mxu0 %v6934_v56 }
0x12c4   :  { %v4938_v36 = vadd.f32 %v5669_v39, %v4897_v53 }
0x12c6   :  { %v5686_v35 = vpop.f32.mrb[48].mxu1 }
0x12c7   :  { %v5687_v49 = vpop.f32.mrb[49].mxu1 }
0x12c8   :  { %v5688_v23 = vadd.f32 %v5687_v49, %v5686_v35  ;;  %v5689_v51 = vpop.f32.mrb[50].mxu1 }
0x12c9   :  { %v5690_v54 = vpop.f32.mrb[51].mxu1 }
0x12ca   :  { %v4976_v8 = vadd.f32 %v5688_v23, %v4935_v55  ;;  %v5691_v48 = vadd.f32 %v5690_v54, %v5689_v51 }
0x12cc   :  { %v4979_v24 = vadd.f32 %v5691_v48, %v4938_v36 }
0x12de   :  { %v5708_v15 = vpop.f32.mrb[56].mxu0 }
0x12df   :  { %v5709_v41 = vpop.f32.mrb[57].mxu0 }
0x12e0   :  { %v5710_v42 = vadd.f32 %v5709_v41, %v5708_v15  ;;  %v5711_v46 = vpop.f32.mrb[58].mxu0  ;;  %v5549_v41 = vld [vmem:[#allocation38] ss:$0 sm:$0xff] }
0x12e1   :  { %v5712_v30 = vpop.f32.mrb[59].mxu0 }
0x12e2   :  { %v5017_v47 = vadd.f32 %v5710_v42, %v4976_v8  ;;  %v5713_v59 = vadd.f32 %v5712_v30, %v5711_v46  ;;  %v5548_v8 = vld [vmem:[#allocation37] ss:$0 sm:$0xff] }
0x12e4   :  { %v5020_v5 = vadd.f32 %v5713_v59, %v4979_v24  ;;  %v5194_v59 = vld [vmem:[#allocation40] sm:$0x3] }
0x12e6   :  { %v5730_v13 = vpop.f32.mrb[52].mxu1 }
0x12e7   :  { %v5731_v34 = vpop.f32.mrb[53].mxu1 }
0x12e8   :  { %v5732_v12 = vadd.f32 %v5731_v34, %v5730_v13  ;;  %v5733_v11 = vpop.f32.mrb[54].mxu1 }
0x12e9   :  { %v5734_v45 = vpop.f32.mrb[55].mxu1 }
0x12ea   :  { %v5058_v7 = vadd.f32 %v5732_v12, %v5017_v47  ;;  %v5735_v38 = vadd.f32 %v5734_v45, %v5733_v11 }
0x12ec   :  { %v5061_v0 = vadd.f32 %v5735_v38, %v5020_v5 }
0x12fe   :  { %v5752_v27 = vpop.f32.mrb[60].mxu0 }
0x12ff   :  { %v5753_v1 = vpop.f32.mrb[61].mxu0 }
0x1300   :  { %v5754_v14 = vadd.f32 %v5753_v1, %v5752_v27  ;;  %v5755_v57 = vpop.f32.mrb[62].mxu0 }
0x1301   :  { %v5756_v33 = vpop.f32.mrb[63].mxu0 }
0x1302   :  { %v5099_v32 = vadd.f32 %v5754_v14, %v5058_v7  ;;  %v5757_v18 = vadd.f32 %v5756_v33, %v5755_v57 }
0x1304   :  { %v5102_v2 = vadd.f32 %v5757_v18, %v5061_v0 }
0x1306   :  { %v5774_v52 = vpop.f32.mrb[56].mxu1 }
0x1307   :  { %v5775_v9 = vpop.f32.mrb[57].mxu1 }
0x1308   :  { %v5776_v60 = vadd.f32 %v5775_v9, %v5774_v52  ;;  %v5777_v10 = vpop.f32.mrb[58].mxu1 }
0x1309   :  { %v5778_v16 = vpop.f32.mrb[59].mxu1 }
0x130a   :  { %v5140_v58 = vadd.f32 %v5776_v60, %v5099_v32  ;;  %v5779_v3 = vadd.f32 %v5778_v16, %v5777_v10 }
0x130c   :  { %v5143_v25 = vadd.f32 %v5779_v3, %v5102_v2  ;;  %v5146_v29 = vadd.f32 %v5140_v58, %v8917_v37 }
0x130e   :  { %v5148_v40 = vadd.f32 %v5146_v29, %v8918_v20  ;;  %v5147_v6 = vadd.f32 %v5143_v25, %v8919_v44 }
0x1310   :  { %v5152_v61 = vsel %vm418_vm0, %v5148_v40, 0.0  ;;  %v5149_v19 = vadd.f32 %v5147_v6, %v8920_v4 }
0x1311   :  { %5153 = vadd.xlane.f32.xlu1 %v5152_v61 }
0x1312   :  { %v5155_v62 = vsel %vm418_vm0, %v5149_v19, 0.0 }
0x1315   :  { %5156 = vadd.xlane.f32.xlu1 %v5155_v62 }
0x139e   :  { %v5154_v50 = vpop.xlane.xlu1 %5153 }
0x139f   :  { %v5158_v31 = vmul.f32 0.015625, %v5154_v50 }
0x13a1   :  { %v5160_v43 = vsub.f32 %v5148_v40, %v5158_v31 }
0x13a2   :  { %v5157_v21 = vpop.xlane.xlu1 %5156 }
0x13a3   :  { %v5159_v28 = vmul.f32 0.015625, %v5157_v21  ;;  %v5162_v53 = vmul.f32 %v5160_v43, %v5160_v43 }
0x13a5   :  { %v5161_v26 = vsub.f32 %v5149_v19, %v5159_v28  ;;  %v5164_v63 = vsel %vm418_vm0, %v5162_v53, 0.0 }
0x13a6   :  { %5165 = vadd.xlane.f32.xlu0 %v5164_v63 }
0x13a7   :  { %v5163_v17 = vmul.f32 %v5161_v26, %v5161_v26 }
0x13a9   :  { %v5167_v22 = vsel %vm418_vm0, %v5163_v17, 0.0  ;;  %vm5268_vm0 = vcmask 517120  }
0x13aa   :  { %5168 = vadd.xlane.f32.xlu1 %v5167_v22 }
0x1433   :  { %v5166_v55 = vpop.xlane.xlu0 %5165 }
0x1434   :  { %v5170_v39 = vmul.f32 0.015625, %v5166_v55 }
0x1436   :  { %v5172_v36 = vadd.f32 1e-05, %v5170_v39 }
0x1437   :  { %v5169_v35 = vpop.xlane.xlu1 %5168 }
0x1438   :  { %6295 = vrsqrt.f32 %v5172_v36  ;;  %v5171_v49 = vmul.f32 0.015625, %v5169_v35 }
0x143a   :  { %v5173_v23 = vadd.f32 1e-05, %v5171_v49 }
0x143c   :  { %6297 = vrsqrt.f32 %v5173_v23 }
0x1442   :  { %v6296_v51 = vpop.eup %6295 }
0x1443   :  { %v5176_v54 = vmul.f32 %v6296_v51, %v5160_v43 }
0x1445   :  { %v5184_v15 = vmul.f32 %v5548_v8, %v5176_v54 }
0x1446   :  { %v6298_v48 = vpop.eup %6297 }
0x1447   :  { %v5177_v24 = vmul.f32 %v6298_v48, %v5161_v26  ;;  %v5192_v46 = vadd.f32 %v5549_v41, %v5184_v15 }
0x1449   :  { %v5185_v42 = vmul.f32 %v5548_v8, %v5177_v24 }
0x144b   :  { %v5193_v30 = vadd.f32 %v5549_v41, %v5185_v42 }
0x144d   :  { %v5954_v47 = vpack.c.bf16 %v5193_v30, %v5192_v46 }
0x144f   :  { %5955 = vmatpush3.bf16.msra.mxu0 %v5954_v47 }
0x1452   :  { %5893 = vmatmul.mubr.msk.f32.vlgmr.msra.gmra.mrb[46].mxu0 %vm509_vm4, %v5194_v59 }
0x1525   :  { %v5264_v5 = vpop.f32.mrb[46].mxu0 }
0x1526   :  { %v5894_v13 = vpop.f32.mrb[47].mxu0  ;;  %5269 = vst.msk [vmem:[#allocation41] sm:$0x3] %vm5268_vm0, %v5264_v5 }
0x1527   :  { %6860 = shalt.err (!%p6857_p8)
}
0x1528   :  { %s8921_s26 = sld [smem:[#allocation158_spill]] }
0x152e   :  { %s6861_s22 = scalar_lea.hbm %s8921_s26, 32 }
0x152f   :  { %p6862_p9 = scmp.ne.s32.totalorder %s8921_s26, %s6861_s22  ;;  %p6865_p10 = scmp.lt.u32.totalorder %s6861_s22, %s8921_s26 }
0x1531   :  { %p6867_p11 = pnand %p6865_p10, %p6862_p9 }
0x1533   :  { %6870 = shalt.err (!%p6867_p11)
}
0x1534   :  { %5279 = dma.vmem_to_hbm [thread:$0]  %s5277_s18, 32, %s8921_s26, [#allocation4]  }
0x1535   :  { %6897 = dma.done.wait [#allocation4], 32  }
0x1536   :  { %6898 = vsyncadd [#allocation4], 4294967264 }
0x1537   :  { %5283 = vsyncpa [#allocation3], 1 }
0x1538   :  { %5284 = vsyncpa [#allocation6], 1 }
0x1539   :  { %5285 = vsyncpa [#allocation9], 1 }
0x153a   :  { %5286 = vsyncpa [#allocation12], 1 }
0x153b   :  { %5287 = vsyncpa [#allocation15], 1 }
0x153c   :  { %5288 = vsyncpa [#allocation18], 1 }
0x153d   :  { %5289 = vsyncpa [#allocation21], 1 }
0x153e   :  { %5290 = vsyncpa [#allocation24], 1 }
0x153f   :  { %5291 = vsyncpa [#allocation27], 1 }
0x1540   :  { %5292 = vsyncpa [#allocation30], 1 }
0x1541   :  { %5293 = vsyncpa [#allocation33], 1 }
0x1542   :  { %5294 = vsyncpa [#allocation36], 1 }
0x1543   :  { %5295 = vsyncpa [#allocation39], 1 }
0x1544   :  { %5296 = vsyncpa [#allocation4], 1 }

</bundles_post_ra>
